<compile_context>
chip_gen: v7x
topology: tpu7x:2x2x1
jax: 0.10.0
libtpu: 0.0.40
codegen_flags: <defaults>
</compile_context>

<pallas_src>
import functools

import jax
import jax.numpy as jnp
from jax import lax
from jax.experimental import pallas as pl
from jax.experimental.pallas import tpu as pltpu


_VMEM_LIMIT = 32 * 1024 * 1024     # <= 50% of v7x's 64 MiB; fine on v5e/v6e
_TILE_BUDGET = 12 * 1024 * 1024    # target double-buffered per-step footprint


def _round_up(x, m):
    return ((x + m - 1) // m) * m


def _pick_tm(m, k_pad, co_pad):
    """Largest row tile that (a) exactly divides the 8-rounded M, (b) keeps
    >=2 grid steps (v7x megacore sharding), (c) stays under the VMEM budget."""
    m8 = _round_up(m, 8)
    w_bytes = 2 * k_pad * co_pad * 2                       # double-buffered bf16 W
    per_row = 2 * (k_pad * 2 + co_pad * 2) + co_pad * 4    # bf16 A + bf16 out (+slack)
    cap = (max(_TILE_BUDGET - w_bytes, 1 << 20) // per_row // 8) * 8
    cap = int(max(8, min(2048, cap)))
    best = None
    tm = 8
    while tm <= min(cap, m8):
        if m8 % tm == 0 and m8 // tm >= 2:
            best = tm
        tm += 8
    if best is None:                                       # tiny M: single step
        best = max(8, min(cap, m8))
    m_pad = _round_up(m8, best)
    return best, m_pad


# ----------------------------------------------------------------------------
# Pallas kernels
# ----------------------------------------------------------------------------
def _leaky(y):
    return jnp.where(y > 0, y, 0.2 * y)


def _matmul_act_kernel(a_ref, w_ref, o_ref):
    """(TM,K) bf16 @ (K,Co) bf16 -> f32 accum, LeakyReLU(0.2), bf16 store."""
    y = jnp.dot(a_ref[...], w_ref[...], preferred_element_type=jnp.float32)
    o_ref[...] = _leaky(y).astype(o_ref.dtype)


def _matmul_stats_kernel(a_ref, w_ref, y_ref, sum_ref, sq_ref):
    """Raw matmul tile (bf16 out) + fused per-tile f32 sum / sum-of-squares."""
    y = jnp.dot(a_ref[...], w_ref[...], preferred_element_type=jnp.float32)
    y_ref[...] = y.astype(y_ref.dtype)
    sum_ref[...] = jnp.sum(y, axis=0, keepdims=True)[None]       # (1, 1, Co)
    sq_ref[...] = jnp.sum(y * y, axis=0, keepdims=True)[None]    # (1, 1, Co)


def _affine_act_kernel(x_ref, scale_ref, shift_ref, o_ref):
    """Folded-BN per-channel affine + LeakyReLU; f32 math, bf16 in/out."""
    y = x_ref[...].astype(jnp.float32) * scale_ref[...] + shift_ref[...]
    o_ref[...] = _leaky(y).astype(o_ref.dtype)


# ----------------------------------------------------------------------------
# pallas_call wrappers
# ----------------------------------------------------------------------------
def pallas_matmul_act(a, w, tm):
    m_pad, k = a.shape
    co = w.shape[1]
    cost = pl.CostEstimate(
        flops=2 * m_pad * k * co,
        transcendentals=0,
        bytes_accessed=a.size * 2 + w.size * 2 + m_pad * co * 2,
    )
    return pl.pallas_call(
        _matmul_act_kernel,
        out_shape=jax.ShapeDtypeStruct((m_pad, co), jnp.bfloat16),
        grid=(m_pad // tm,),
        in_specs=[
            pl.BlockSpec((tm, k), lambda i: (i, 0)),
            # NOTE: at large nf the invariant weight block could use
            # pipeline_mode=pl.Buffered(1) to save VMEM; tiny here.
            pl.BlockSpec((k, co), lambda i: (0, 0)),
        ],
        out_specs=pl.BlockSpec((tm, co), lambda i: (i, 0)),
        compiler_params=pltpu.CompilerParams(
            dimension_semantics=("parallel",),
            vmem_limit_bytes=_VMEM_LIMIT,
        ),
        cost_estimate=cost,
    )(a, w)


def pallas_matmul_stats(a, w, tm):
    m_pad, k = a.shape
    co = w.shape[1]
    nt = m_pad // tm
    cost = pl.CostEstimate(
        flops=2 * m_pad * k * co,
        transcendentals=0,
        bytes_accessed=a.size * 2 + w.size * 2 + m_pad * co * 2 + 2 * nt * co * 4,
    )
    return pl.pallas_call(
        _matmul_stats_kernel,
        out_shape=(
            jax.ShapeDtypeStruct((m_pad, co), jnp.bfloat16),
            jax.ShapeDtypeStruct((nt, 1, co), jnp.float32),
            jax.ShapeDtypeStruct((nt, 1, co), jnp.float32),
        ),
        grid=(nt,),
        in_specs=[
            pl.BlockSpec((tm, k), lambda i: (i, 0)),
            pl.BlockSpec((k, co), lambda i: (0, 0)),
        ],
        out_specs=(
            pl.BlockSpec((tm, co), lambda i: (i, 0)),
            pl.BlockSpec((1, 1, co), lambda i: (i, 0, 0)),
            pl.BlockSpec((1, 1, co), lambda i: (i, 0, 0)),
        ),
        compiler_params=pltpu.CompilerParams(
            dimension_semantics=("parallel",),
            vmem_limit_bytes=_VMEM_LIMIT,
        ),
        cost_estimate=cost,
    )(a, w)


def pallas_affine_act(x, scale, shift, tm):
    m_pad, co = x.shape
    return pl.pallas_call(
        _affine_act_kernel,
        out_shape=jax.ShapeDtypeStruct((m_pad, co), jnp.bfloat16),
        grid=(m_pad // tm,),
        in_specs=[
            pl.BlockSpec((tm, co), lambda i: (i, 0)),
            pl.BlockSpec((1, co), lambda i: (0, 0)),
            pl.BlockSpec((1, co), lambda i: (0, 0)),
        ],
        out_specs=pl.BlockSpec((tm, co), lambda i: (i, 0)),
        compiler_params=pltpu.CompilerParams(
            dimension_semantics=("parallel",),
            vmem_limit_bytes=_VMEM_LIMIT,
        ),
    )(x, scale, shift)


# ----------------------------------------------------------------------------
# JAX glue: channels-last im2col (bf16, reshapes/slices only)
# ----------------------------------------------------------------------------
def im2col_nhwc(x, k, stride, pad):
    """x: (N, H, W, C) -> patches (N*Ho*Wo, k*k*C), flat K ordered (kh, kw, c)."""
    n, h, w, c = x.shape
    ho = (h + 2 * pad - k) // stride + 1
    wo = (w + 2 * pad - k) // stride + 1
    xp = jnp.pad(x, ((0, 0), (pad, pad), (pad, pad), (0, 0)))
    cols = []
    for kh in range(k):
        for kw in range(k):
            sl = xp[:, kh:kh + stride * (ho - 1) + 1:stride,
                    kw:kw + stride * (wo - 1) + 1:stride, :]   # (N, Ho, Wo, C)
            cols.append(sl)
    patches = jnp.stack(cols, axis=3)                          # (N, Ho, Wo, k*k, C)
    return patches.reshape(n * ho * wo, k * k * c), ho, wo


def conv_block(x_nhwc, w_oikk, stride, pad, bn_params):
    """Conv2d(k=4, no bias) [+ BatchNorm2d (batch stats)] + LeakyReLU, NHWC."""
    n = x_nhwc.shape[0]
    co, ci, k, _ = w_oikk.shape
    patches, ho, wo = im2col_nhwc(x_nhwc.astype(jnp.bfloat16), k, stride, pad)
    m, kk = patches.shape

    # Weight (Co, Ci, kh, kw) -> (kh, kw, Ci, Co) -> (K, Co), matching the
    # (kh, kw, c) ordering of the im2col patches.
    wmat = jnp.transpose(w_oikk, (2, 3, 1, 0)).reshape(kk, co)

    k_pad = _round_up(kk, 16)                  # bf16 sublane multiple only
    co_pad = _round_up(co, 128)                # lane-dense output stores
    tm, m_pad = _pick_tm(m, k_pad, co_pad)

    a = patches
    if (m_pad, k_pad) != (m, kk):
        a = jnp.pad(a, ((0, m_pad - m), (0, k_pad - kk)))
    w = jnp.pad(wmat.astype(jnp.bfloat16), ((0, k_pad - kk), (0, co_pad - co)))

    if bn_params is None:
        y = pallas_matmul_act(a, w, tm)                         # (m_pad, co_pad) bf16
    else:
        # Matmul with fused per-tile partial stats; zero-padded A rows and
        # zero-padded W columns contribute 0 to sum / sumsq, so dividing by
        # the true M gives PyTorch training-mode (biased) batch statistics.
        y_raw, s_sum, s_sq = pallas_matmul_stats(a, w, tm)
        gamma, beta = bn_params
        tot = jnp.sum(s_sum[:, 0, :co], axis=0)                 # (co,)
        tot_sq = jnp.sum(s_sq[:, 0, :co], axis=0)
        mean = tot / m
        var = jnp.maximum(tot_sq / m - mean * mean, 0.0)
        rstd = lax.rsqrt(var + 1e-5)
        scale = gamma * rstd
        shift = beta - mean * scale
        scale = jnp.pad(scale, (0, co_pad - co))[None, :]
        shift = jnp.pad(shift, (0, co_pad - co))[None, :]
        y = pallas_affine_act(y_raw, scale, shift, tm)

    return y[:m, :co].reshape(n, ho, wo, co)   # stays channels-last, bf16


def final_conv_sigmoid(h_nhwc, w_oikk):
    """Last layer: 4x4 valid conv, co=1, on a 4x4 map == per-image dot product.
    Trivial GEMV left to XLA (padding co=1 -> 128 would waste 128x MXU lanes)."""
    n = h_nhwc.shape[0]
    wvec = jnp.transpose(w_oikk, (2, 3, 1, 0)).reshape(-1)      # (kh, kw, ci) order
    xflat = h_nhwc.reshape(n, -1).astype(jnp.float32)           # (h, w, c) order
    logits = jnp.dot(xflat, wvec.astype(jnp.float32))
    return jax.nn.sigmoid(logits)                               # (N,) f32


# ----------------------------------------------------------------------------
# Discriminator forward
# ----------------------------------------------------------------------------
def init_params(key, nc, nf):
    ks = jax.random.split(key, 8)
    std = 0.02
    return {
        "w1": std * jax.random.normal(ks[0], (nf, nc, 4, 4), jnp.float32),
        "w2": std * jax.random.normal(ks[1], (2 * nf, nf, 4, 4), jnp.float32),
        "w3": std * jax.random.normal(ks[2], (4 * nf, 2 * nf, 4, 4), jnp.float32),
        "w4": std * jax.random.normal(ks[3], (8 * nf, 4 * nf, 4, 4), jnp.float32),
        "w5": std * jax.random.normal(ks[4], (1, 8 * nf, 4, 4), jnp.float32),
        "g2": 1.0 + std * jax.random.normal(ks[5], (2 * nf,), jnp.float32),
        "b2": jnp.zeros((2 * nf,), jnp.float32),
        "g3": 1.0 + std * jax.random.normal(ks[6], (4 * nf,), jnp.float32),
        "b3": jnp.zeros((4 * nf,), jnp.float32),
        "g4": 1.0 + std * jax.random.normal(ks[7], (8 * nf,), jnp.float32),
        "b4": jnp.zeros((8 * nf,), jnp.float32),
    }


def discriminator_forward(x, p):
    """x: (N, nc, 64, 64) NCHW -> (N,) probabilities."""
    h = jnp.transpose(x, (0, 2, 3, 1))                        # NCHW -> NHWC once
    h = conv_block(h, p["w1"], 2, 1, None)                    # 64 -> 32
    h = conv_block(h, p["w2"], 2, 1, (p["g2"], p["b2"]))      # 32 -> 16
    h = conv_block(h, p["w3"], 2, 1, (p["g3"], p["b3"]))      # 16 -> 8
    h = conv_block(h, p["w4"], 2, 1, (p["g4"], p["b4"]))      # 8  -> 4
    return final_conv_sigmoid(h, p["w5"])                     # 4 -> 1, (N,)


if __name__ == "__main__":
    N, nc, nf, H = 2, 3, 8, 64  # DCGAN discriminator requires 64x64 inputs
    key = jax.random.PRNGKey(0)
    k_x, k_p = jax.random.split(key)
    x = jax.random.normal(k_x, (N, nc, H, H), jnp.float32)
    params = init_params(k_p, nc, nf)

    out = jax.block_until_ready(jax.jit(discriminator_forward)(x, params))
    assert out.shape == (N,), out.shape
    assert bool(jnp.all(jnp.isfinite(out)))
    assert bool(jnp.all((out >= 0.0) & (out <= 1.0)))
    print("KERNEL_OK")
</pallas_src>

<mosaic_0001>
module attributes {stable_mosaic.version = 11 : i64} {
  func.func @_matmul_act_kernel(%arg0: i32, %arg1: memref<1024x48xbf16, #tpu.memory_space<vmem>>, %arg2: memref<48x128xbf16, #tpu.memory_space<vmem>>, %arg3: memref<1024x128xbf16, #tpu.memory_space<vmem>>) attributes {dimension_semantics = [#tpu.dimension_semantics<parallel>], iteration_bounds = array<i64: 2>, scalar_prefetch = 0 : i64, scratch_operands = 0 : i64, tpu.core_type = #tpu.core_type<tc>, window_params = [{transform_indices = @transform_0, window_bounds = array<i64: 1024, 48>}, {pipeline_mode = #tpu.pipeline_mode<synchronous>, transform_indices = @transform_1, window_bounds = array<i64: 48, 128>}, {transform_indices = @transform_2, window_bounds = array<i64: 1024, 128>}]} {
    %c0 = arith.constant 0 : index
    %c0_0 = arith.constant 0 : index
    %0 = vector.load %arg1[%c0, %c0_0] : memref<1024x48xbf16, #tpu.memory_space<vmem>>, vector<1024x48xbf16>
    %c0_1 = arith.constant 0 : index
    %c0_2 = arith.constant 0 : index
    %1 = vector.load %arg2[%c0_1, %c0_2] : memref<48x128xbf16, #tpu.memory_space<vmem>>, vector<48x128xbf16>
    %cst = arith.constant dense<0.000000e+00> : vector<1024x128xf32>
    %2 = tpu.matmul %0, %1, %cst {dimension_numbers = #tpu.dot_dimension_numbers<[1], [0], [0], [1], [0, 0, 1, 1], [], []>} : vector<1024x48xbf16>, vector<48x128xbf16>, vector<1024x128xf32> -> vector<1024x128xf32>
    %cst_3 = arith.constant 0.000000e+00 : f32
    %3 = vector.broadcast %cst_3 : f32 to vector<1024x128xf32>
    %4 = arith.cmpf ogt, %2, %3 : vector<1024x128xf32>
    %cst_4 = arith.constant 2.000000e-01 : f32
    %5 = vector.broadcast %cst_4 : f32 to vector<1024x128xf32>
    %6 = arith.mulf %5, %2 : vector<1024x128xf32>
    %7 = arith.select %4, %2, %6 : vector<1024x128xi1>, vector<1024x128xf32>
    %8 = arith.truncf %7 : vector<1024x128xf32> to vector<1024x128xbf16>
    %c0_5 = arith.constant 0 : index
    %c0_6 = arith.constant 0 : index
    %9 = vector.load %arg3[%c0_5, %c0_6] : memref<1024x128xbf16, #tpu.memory_space<vmem>>, vector<1024x128xbf16>
    tpu.vector_store %arg3[%c0_5, %c0_6], %8 {strides = array<i32>} : memref<1024x128xbf16, #tpu.memory_space<vmem>>, vector<1024x128xbf16>,
    return
  }
  func.func @transform_0(%arg0: i32) -> (i32, i32) {
    %c0_i32 = arith.constant 0 : i32
    %c0_i32_0 = arith.constant 0 : i32
    return %arg0, %c0_i32 : i32, i32
  }
  func.func @transform_1(%arg0: i32) -> (i32, i32) {
    %c0_i32 = arith.constant 0 : i32
    %c0_i32_0 = arith.constant 0 : i32
    %c0_i32_1 = arith.constant 0 : i32
    return %c0_i32, %c0_i32_0 : i32, i32
  }
  func.func @transform_2(%arg0: i32) -> (i32, i32) {
    %c0_i32 = arith.constant 0 : i32
    %c0_i32_0 = arith.constant 0 : i32
    return %arg0, %c0_i32 : i32, i32
  }
}

module attributes {stable_mosaic.version = 11 : i64} {
  func.func @_matmul_stats_kernel(%arg0: i32, %arg1: memref<256x128xbf16, #tpu.memory_space<vmem>>, %arg2: memref<128x128xbf16, #tpu.memory_space<vmem>>, %arg3: memref<256x128xbf16, #tpu.memory_space<vmem>>, %arg4: memref<1x1x128xf32, #tpu.memory_space<vmem>>, %arg5: memref<1x1x128xf32, #tpu.memory_space<vmem>>) attributes {dimension_semantics = [#tpu.dimension_semantics<parallel>], iteration_bounds = array<i64: 2>, scalar_prefetch = 0 : i64, scratch_operands = 0 : i64, tpu.core_type = #tpu.core_type<tc>, window_params = [{transform_indices = @transform_0, window_bounds = array<i64: 256, 128>}, {pipeline_mode = #tpu.pipeline_mode<synchronous>, transform_indices = @transform_1, window_bounds = array<i64: 128, 128>}, {transform_indices = @transform_2, window_bounds = array<i64: 256, 128>}, {transform_indices = @transform_3, window_bounds = array<i64: 1, 1, 128>}, {transform_indices = @transform_4, window_bounds = array<i64: 1, 1, 128>}]} {
    %c0 = arith.constant 0 : index
    %c0_0 = arith.constant 0 : index
    %0 = vector.load %arg1[%c0, %c0_0] : memref<256x128xbf16, #tpu.memory_space<vmem>>, vector<256x128xbf16>
    %c0_1 = arith.constant 0 : index
    %c0_2 = arith.constant 0 : index
    %1 = vector.load %arg2[%c0_1, %c0_2] : memref<128x128xbf16, #tpu.memory_space<vmem>>, vector<128x128xbf16>
    %cst = arith.constant dense<0.000000e+00> : vector<256x128xf32>
    %2 = tpu.matmul %0, %1, %cst {dimension_numbers = #tpu.dot_dimension_numbers<[1], [0], [0], [1], [0, 0, 1, 1], [], []>} : vector<256x128xbf16>, vector<128x128xbf16>, vector<256x128xf32> -> vector<256x128xf32>
    %3 = arith.truncf %2 : vector<256x128xf32> to vector<256x128xbf16>
    %c0_3 = arith.constant 0 : index
    %c0_4 = arith.constant 0 : index
    %4 = vector.load %arg3[%c0_3, %c0_4] : memref<256x128xbf16, #tpu.memory_space<vmem>>, vector<256x128xbf16>
    tpu.vector_store %arg3[%c0_3, %c0_4], %3 {strides = array<i32>} : memref<256x128xbf16, #tpu.memory_space<vmem>>, vector<256x128xbf16>,
    %cst_5 = arith.constant dense<0.000000e+00> : vector<128xf32>
    %5 = vector.multi_reduction <add>, %2, %cst_5 [0] : vector<256x128xf32> to vector<128xf32>
    %6 = vector.shape_cast %5 : vector<128xf32> to vector<1x128xf32>
    %7 = vector.shape_cast %6 : vector<1x128xf32> to vector<1x1x128xf32>
    %c0_6 = arith.constant 0 : index
    %c0_7 = arith.constant 0 : index
    %c0_8 = arith.constant 0 : index
    %8 = vector.load %arg4[%c0_6, %c0_7, %c0_8] : memref<1x1x128xf32, #tpu.memory_space<vmem>>, vector<1x1x128xf32>
    tpu.vector_store %arg4[%c0_6, %c0_7, %c0_8], %7 {strides = array<i32>} : memref<1x1x128xf32, #tpu.memory_space<vmem>>, vector<1x1x128xf32>,
    %9 = arith.mulf %2, %2 : vector<256x128xf32>
    %cst_9 = arith.constant dense<0.000000e+00> : vector<128xf32>
    %10 = vector.multi_reduction <add>, %9, %cst_9 [0] : vector<256x128xf32> to vector<128xf32>
    %11 = vector.shape_cast %10 : vector<128xf32> to vector<1x128xf32>
    %12 = vector.shape_cast %11 : vector<1x128xf32> to vector<1x1x128xf32>
    %c0_10 = arith.constant 0 : index
    %c0_11 = arith.constant 0 : index
    %c0_12 = arith.constant 0 : index
    %13 = vector.load %arg5[%c0_10, %c0_11, %c0_12] : memref<1x1x128xf32, #tpu.memory_space<vmem>>, vector<1x1x128xf32>
    tpu.vector_store %arg5[%c0_10, %c0_11, %c0_12], %12 {strides = array<i32>} : memref<1x1x128xf32, #tpu.memory_space<vmem>>, vector<1x1x128xf32>,
    return
  }
  func.func @transform_0(%arg0: i32) -> (i32, i32) {
    %c0_i32 = arith.constant 0 : i32
    %c0_i32_0 = arith.constant 0 : i32
    return %arg0, %c0_i32 : i32, i32
  }
  func.func @transform_1(%arg0: i32) -> (i32, i32) {
    %c0_i32 = arith.constant 0 : i32
    %c0_i32_0 = arith.constant 0 : i32
    %c0_i32_1 = arith.constant 0 : i32
    return %c0_i32, %c0_i32_0 : i32, i32
  }
  func.func @transform_2(%arg0: i32) -> (i32, i32) {
    %c0_i32 = arith.constant 0 : i32
    %c0_i32_0 = arith.constant 0 : i32
    return %arg0, %c0_i32 : i32, i32
  }
  func.func @transform_3(%arg0: i32) -> (i32, i32, i32) {
    %c0_i32 = arith.constant 0 : i32
    %c0_i32_0 = arith.constant 0 : i32
    %c0_i32_1 = arith.constant 0 : i32
    return %arg0, %c0_i32, %c0_i32_0 : i32, i32, i32
  }
  func.func @transform_4(%arg0: i32) -> (i32, i32, i32) {
    %c0_i32 = arith.constant 0 : i32
    %c0_i32_0 = arith.constant 0 : i32
    %c0_i32_1 = arith.constant 0 : i32
    return %arg0, %c0_i32, %c0_i32_0 : i32, i32, i32
  }
}

module attributes {stable_mosaic.version = 11 : i64} {
  func.func @_affine_act_kernel(%arg0: i32, %arg1: memref<256x128xbf16, #tpu.memory_space<vmem>>, %arg2: memref<1x128xf32, #tpu.memory_space<vmem>>, %arg3: memref<1x128xf32, #tpu.memory_space<vmem>>, %arg4: memref<256x128xbf16, #tpu.memory_space<vmem>>) attributes {dimension_semantics = [#tpu.dimension_semantics<parallel>], iteration_bounds = array<i64: 2>, scalar_prefetch = 0 : i64, scratch_operands = 0 : i64, tpu.core_type = #tpu.core_type<tc>, window_params = [{transform_indices = @transform_0, window_bounds = array<i64: 256, 128>}, {pipeline_mode = #tpu.pipeline_mode<synchronous>, transform_indices = @transform_1, window_bounds = array<i64: 1, 128>}, {pipeline_mode = #tpu.pipeline_mode<synchronous>, transform_indices = @transform_2, window_bounds = array<i64: 1, 128>}, {transform_indices = @transform_3, window_bounds = array<i64: 256, 128>}]} {
    %c0 = arith.constant 0 : index
    %c0_0 = arith.constant 0 : index
    %0 = vector.load %arg1[%c0, %c0_0] : memref<256x128xbf16, #tpu.memory_space<vmem>>, vector<256x128xbf16>
    %1 = arith.extf %0 : vector<256x128xbf16> to vector<256x128xf32>
    %c0_1 = arith.constant 0 : index
    %c0_2 = arith.constant 0 : index
    %2 = vector.load %arg2[%c0_1, %c0_2] : memref<1x128xf32, #tpu.memory_space<vmem>>, vector<1x128xf32>
    %3 = vector.broadcast %2 : vector<1x128xf32> to vector<256x128xf32>
    %4 = arith.mulf %1, %3 : vector<256x128xf32>
    %c0_3 = arith.constant 0 : index
    %c0_4 = arith.constant 0 : index
    %5 = vector.load %arg3[%c0_3, %c0_4] : memref<1x128xf32, #tpu.memory_space<vmem>>, vector<1x128xf32>
    %6 = vector.broadcast %5 : vector<1x128xf32> to vector<256x128xf32>
    %7 = arith.addf %4, %6 : vector<256x128xf32>
    %cst = arith.constant 0.000000e+00 : f32
    %8 = vector.broadcast %cst : f32 to vector<256x128xf32>
    %9 = arith.cmpf ogt, %7, %8 : vector<256x128xf32>
    %cst_5 = arith.constant 2.000000e-01 : f32
    %10 = vector.broadcast %cst_5 : f32 to vector<256x128xf32>
    %11 = arith.mulf %10, %7 : vector<256x128xf32>
    %12 = arith.select %9, %7, %11 : vector<256x128xi1>, vector<256x128xf32>
    %13 = arith.truncf %12 : vector<256x128xf32> to vector<256x128xbf16>
    %c0_6 = arith.constant 0 : index
    %c0_7 = arith.constant 0 : index
    %14 = vector.load %arg4[%c0_6, %c0_7] : memref<256x128xbf16, #tpu.memory_space<vmem>>, vector<256x128xbf16>
    tpu.vector_store %arg4[%c0_6, %c0_7], %13 {strides = array<i32>} : memref<256x128xbf16, #tpu.memory_space<vmem>>, vector<256x128xbf16>,
    return
  }
  func.func @transform_0(%arg0: i32) -> (i32, i32) {
    %c0_i32 = arith.constant 0 : i32
    %c0_i32_0 = arith.constant 0 : i32
    return %arg0, %c0_i32 : i32, i32
  }
  func.func @transform_1(%arg0: i32) -> (i32, i32) {
    %c0_i32 = arith.constant 0 : i32
    %c0_i32_0 = arith.constant 0 : i32
    %c0_i32_1 = arith.constant 0 : i32
    return %c0_i32, %c0_i32_0 : i32, i32
  }
  func.func @transform_2(%arg0: i32) -> (i32, i32) {
    %c0_i32 = arith.constant 0 : i32
    %c0_i32_0 = arith.constant 0 : i32
    %c0_i32_1 = arith.constant 0 : i32
    return %c0_i32, %c0_i32_0 : i32, i32
  }
  func.func @transform_3(%arg0: i32) -> (i32, i32) {
    %c0_i32 = arith.constant 0 : i32
    %c0_i32_0 = arith.constant 0 : i32
    return %arg0, %c0_i32 : i32, i32
  }
}

module attributes {stable_mosaic.version = 11 : i64} {
  func.func @_matmul_stats_kernel(%arg0: i32, %arg1: memref<64x256xbf16, #tpu.memory_space<vmem>>, %arg2: memref<256x128xbf16, #tpu.memory_space<vmem>>, %arg3: memref<64x128xbf16, #tpu.memory_space<vmem>>, %arg4: memref<1x1x128xf32, #tpu.memory_space<vmem>>, %arg5: memref<1x1x128xf32, #tpu.memory_space<vmem>>) attributes {dimension_semantics = [#tpu.dimension_semantics<parallel>], iteration_bounds = array<i64: 2>, scalar_prefetch = 0 : i64, scratch_operands = 0 : i64, tpu.core_type = #tpu.core_type<tc>, window_params = [{transform_indices = @transform_0, window_bounds = array<i64: 64, 256>}, {pipeline_mode = #tpu.pipeline_mode<synchronous>, transform_indices = @transform_1, window_bounds = array<i64: 256, 128>}, {transform_indices = @transform_2, window_bounds = array<i64: 64, 128>}, {transform_indices = @transform_3, window_bounds = array<i64: 1, 1, 128>}, {transform_indices = @transform_4, window_bounds = array<i64: 1, 1, 128>}]} {
    %c0 = arith.constant 0 : index
    %c0_0 = arith.constant 0 : index
    %0 = vector.load %arg1[%c0, %c0_0] : memref<64x256xbf16, #tpu.memory_space<vmem>>, vector<64x256xbf16>
    %c0_1 = arith.constant 0 : index
    %c0_2 = arith.constant 0 : index
    %1 = vector.load %arg2[%c0_1, %c0_2] : memref<256x128xbf16, #tpu.memory_space<vmem>>, vector<256x128xbf16>
    %cst = arith.constant dense<0.000000e+00> : vector<64x128xf32>
    %2 = tpu.matmul %0, %1, %cst {dimension_numbers = #tpu.dot_dimension_numbers<[1], [0], [0], [1], [0, 0, 1, 1], [], []>} : vector<64x256xbf16>, vector<256x128xbf16>, vector<64x128xf32> -> vector<64x128xf32>
    %3 = arith.truncf %2 : vector<64x128xf32> to vector<64x128xbf16>
    %c0_3 = arith.constant 0 : index
    %c0_4 = arith.constant 0 : index
    %4 = vector.load %arg3[%c0_3, %c0_4] : memref<64x128xbf16, #tpu.memory_space<vmem>>, vector<64x128xbf16>
    tpu.vector_store %arg3[%c0_3, %c0_4], %3 {strides = array<i32>} : memref<64x128xbf16, #tpu.memory_space<vmem>>, vector<64x128xbf16>,
    %cst_5 = arith.constant dense<0.000000e+00> : vector<128xf32>
    %5 = vector.multi_reduction <add>, %2, %cst_5 [0] : vector<64x128xf32> to vector<128xf32>
    %6 = vector.shape_cast %5 : vector<128xf32> to vector<1x128xf32>
    %7 = vector.shape_cast %6 : vector<1x128xf32> to vector<1x1x128xf32>
    %c0_6 = arith.constant 0 : index
    %c0_7 = arith.constant 0 : index
    %c0_8 = arith.constant 0 : index
    %8 = vector.load %arg4[%c0_6, %c0_7, %c0_8] : memref<1x1x128xf32, #tpu.memory_space<vmem>>, vector<1x1x128xf32>
    tpu.vector_store %arg4[%c0_6, %c0_7, %c0_8], %7 {strides = array<i32>} : memref<1x1x128xf32, #tpu.memory_space<vmem>>, vector<1x1x128xf32>,
    %9 = arith.mulf %2, %2 : vector<64x128xf32>
    %cst_9 = arith.constant dense<0.000000e+00> : vector<128xf32>
    %10 = vector.multi_reduction <add>, %9, %cst_9 [0] : vector<64x128xf32> to vector<128xf32>
    %11 = vector.shape_cast %10 : vector<128xf32> to vector<1x128xf32>
    %12 = vector.shape_cast %11 : vector<1x128xf32> to vector<1x1x128xf32>
    %c0_10 = arith.constant 0 : index
    %c0_11 = arith.constant 0 : index
    %c0_12 = arith.constant 0 : index
    %13 = vector.load %arg5[%c0_10, %c0_11, %c0_12] : memref<1x1x128xf32, #tpu.memory_space<vmem>>, vector<1x1x128xf32>
    tpu.vector_store %arg5[%c0_10, %c0_11, %c0_12], %12 {strides = array<i32>} : memref<1x1x128xf32, #tpu.memory_space<vmem>>, vector<1x1x128xf32>,
    return
  }
  func.func @transform_0(%arg0: i32) -> (i32, i32) {
    %c0_i32 = arith.constant 0 : i32
    %c0_i32_0 = arith.constant 0 : i32
    return %arg0, %c0_i32 : i32, i32
  }
  func.func @transform_1(%arg0: i32) -> (i32, i32) {
    %c0_i32 = arith.constant 0 : i32
    %c0_i32_0 = arith.constant 0 : i32
    %c0_i32_1 = arith.constant 0 : i32
    return %c0_i32, %c0_i32_0 : i32, i32
  }
  func.func @transform_2(%arg0: i32) -> (i32, i32) {
    %c0_i32 = arith.constant 0 : i32
    %c0_i32_0 = arith.constant 0 : i32
    return %arg0, %c0_i32 : i32, i32
  }
  func.func @transform_3(%arg0: i32) -> (i32, i32, i32) {
    %c0_i32 = arith.constant 0 : i32
    %c0_i32_0 = arith.constant 0 : i32
    %c0_i32_1 = arith.constant 0 : i32
    return %arg0, %c0_i32, %c0_i32_0 : i32, i32, i32
  }
  func.func @transform_4(%arg0: i32) -> (i32, i32, i32) {
    %c0_i32 = arith.constant 0 : i32
    %c0_i32_0 = arith.constant 0 : i32
    %c0_i32_1 = arith.constant 0 : i32
    return %arg0, %c0_i32, %c0_i32_0 : i32, i32, i32
  }
}

module attributes {stable_mosaic.version = 11 : i64} {
  func.func @_affine_act_kernel(%arg0: i32, %arg1: memref<64x128xbf16, #tpu.memory_space<vmem>>, %arg2: memref<1x128xf32, #tpu.memory_space<vmem>>, %arg3: memref<1x128xf32, #tpu.memory_space<vmem>>, %arg4: memref<64x128xbf16, #tpu.memory_space<vmem>>) attributes {dimension_semantics = [#tpu.dimension_semantics<parallel>], iteration_bounds = array<i64: 2>, scalar_prefetch = 0 : i64, scratch_operands = 0 : i64, tpu.core_type = #tpu.core_type<tc>, window_params = [{transform_indices = @transform_0, window_bounds = array<i64: 64, 128>}, {pipeline_mode = #tpu.pipeline_mode<synchronous>, transform_indices = @transform_1, window_bounds = array<i64: 1, 128>}, {pipeline_mode = #tpu.pipeline_mode<synchronous>, transform_indices = @transform_2, window_bounds = array<i64: 1, 128>}, {transform_indices = @transform_3, window_bounds = array<i64: 64, 128>}]} {
    %c0 = arith.constant 0 : index
    %c0_0 = arith.constant 0 : index
    %0 = vector.load %arg1[%c0, %c0_0] : memref<64x128xbf16, #tpu.memory_space<vmem>>, vector<64x128xbf16>
    %1 = arith.extf %0 : vector<64x128xbf16> to vector<64x128xf32>
    %c0_1 = arith.constant 0 : index
    %c0_2 = arith.constant 0 : index
    %2 = vector.load %arg2[%c0_1, %c0_2] : memref<1x128xf32, #tpu.memory_space<vmem>>, vector<1x128xf32>
    %3 = vector.broadcast %2 : vector<1x128xf32> to vector<64x128xf32>
    %4 = arith.mulf %1, %3 : vector<64x128xf32>
    %c0_3 = arith.constant 0 : index
    %c0_4 = arith.constant 0 : index
    %5 = vector.load %arg3[%c0_3, %c0_4] : memref<1x128xf32, #tpu.memory_space<vmem>>, vector<1x128xf32>
    %6 = vector.broadcast %5 : vector<1x128xf32> to vector<64x128xf32>
    %7 = arith.addf %4, %6 : vector<64x128xf32>
    %cst = arith.constant 0.000000e+00 : f32
    %8 = vector.broadcast %cst : f32 to vector<64x128xf32>
    %9 = arith.cmpf ogt, %7, %8 : vector<64x128xf32>
    %cst_5 = arith.constant 2.000000e-01 : f32
    %10 = vector.broadcast %cst_5 : f32 to vector<64x128xf32>
    %11 = arith.mulf %10, %7 : vector<64x128xf32>
    %12 = arith.select %9, %7, %11 : vector<64x128xi1>, vector<64x128xf32>
    %13 = arith.truncf %12 : vector<64x128xf32> to vector<64x128xbf16>
    %c0_6 = arith.constant 0 : index
    %c0_7 = arith.constant 0 : index
    %14 = vector.load %arg4[%c0_6, %c0_7] : memref<64x128xbf16, #tpu.memory_space<vmem>>, vector<64x128xbf16>
    tpu.vector_store %arg4[%c0_6, %c0_7], %13 {strides = array<i32>} : memref<64x128xbf16, #tpu.memory_space<vmem>>, vector<64x128xbf16>,
    return
  }
  func.func @transform_0(%arg0: i32) -> (i32, i32) {
    %c0_i32 = arith.constant 0 : i32
    %c0_i32_0 = arith.constant 0 : i32
    return %arg0, %c0_i32 : i32, i32
  }
  func.func @transform_1(%arg0: i32) -> (i32, i32) {
    %c0_i32 = arith.constant 0 : i32
    %c0_i32_0 = arith.constant 0 : i32
    %c0_i32_1 = arith.constant 0 : i32
    return %c0_i32, %c0_i32_0 : i32, i32
  }
  func.func @transform_2(%arg0: i32) -> (i32, i32) {
    %c0_i32 = arith.constant 0 : i32
    %c0_i32_0 = arith.constant 0 : i32
    %c0_i32_1 = arith.constant 0 : i32
    return %c0_i32, %c0_i32_0 : i32, i32
  }
  func.func @transform_3(%arg0: i32) -> (i32, i32) {
    %c0_i32 = arith.constant 0 : i32
    %c0_i32_0 = arith.constant 0 : i32
    return %arg0, %c0_i32 : i32, i32
  }
}

module attributes {stable_mosaic.version = 11 : i64} {
  func.func @_affine_act_kernel(%arg0: i32, %arg1: memref<16x128xbf16, #tpu.memory_space<vmem>>, %arg2: memref<1x128xf32, #tpu.memory_space<vmem>>, %arg3: memref<1x128xf32, #tpu.memory_space<vmem>>, %arg4: memref<16x128xbf16, #tpu.memory_space<vmem>>) attributes {dimension_semantics = [#tpu.dimension_semantics<parallel>], iteration_bounds = array<i64: 2>, scalar_prefetch = 0 : i64, scratch_operands = 0 : i64, tpu.core_type = #tpu.core_type<tc>, window_params = [{transform_indices = @transform_0, window_bounds = array<i64: 16, 128>}, {pipeline_mode = #tpu.pipeline_mode<synchronous>, transform_indices = @transform_1, window_bounds = array<i64: 1, 128>}, {pipeline_mode = #tpu.pipeline_mode<synchronous>, transform_indices = @transform_2, window_bounds = array<i64: 1, 128>}, {transform_indices = @transform_3, window_bounds = array<i64: 16, 128>}]} {
    %c0 = arith.constant 0 : index
    %c0_0 = arith.constant 0 : index
    %0 = vector.load %arg1[%c0, %c0_0] : memref<16x128xbf16, #tpu.memory_space<vmem>>, vector<16x128xbf16>
    %1 = arith.extf %0 : vector<16x128xbf16> to vector<16x128xf32>
    %c0_1 = arith.constant 0 : index
    %c0_2 = arith.constant 0 : index
    %2 = vector.load %arg2[%c0_1, %c0_2] : memref<1x128xf32, #tpu.memory_space<vmem>>, vector<1x128xf32>
    %3 = vector.broadcast %2 : vector<1x128xf32> to vector<16x128xf32>
    %4 = arith.mulf %1, %3 : vector<16x128xf32>
    %c0_3 = arith.constant 0 : index
    %c0_4 = arith.constant 0 : index
    %5 = vector.load %arg3[%c0_3, %c0_4] : memref<1x128xf32, #tpu.memory_space<vmem>>, vector<1x128xf32>
    %6 = vector.broadcast %5 : vector<1x128xf32> to vector<16x128xf32>
    %7 = arith.addf %4, %6 : vector<16x128xf32>
    %cst = arith.constant 0.000000e+00 : f32
    %8 = vector.broadcast %cst : f32 to vector<16x128xf32>
    %9 = arith.cmpf ogt, %7, %8 : vector<16x128xf32>
    %cst_5 = arith.constant 2.000000e-01 : f32
    %10 = vector.broadcast %cst_5 : f32 to vector<16x128xf32>
    %11 = arith.mulf %10, %7 : vector<16x128xf32>
    %12 = arith.select %9, %7, %11 : vector<16x128xi1>, vector<16x128xf32>
    %13 = arith.truncf %12 : vector<16x128xf32> to vector<16x128xbf16>
    %c0_6 = arith.constant 0 : index
    %c0_7 = arith.constant 0 : index
    %14 = vector.load %arg4[%c0_6, %c0_7] : memref<16x128xbf16, #tpu.memory_space<vmem>>, vector<16x128xbf16>
    tpu.vector_store %arg4[%c0_6, %c0_7], %13 {strides = array<i32>} : memref<16x128xbf16, #tpu.memory_space<vmem>>, vector<16x128xbf16>,
    return
  }
  func.func @transform_0(%arg0: i32) -> (i32, i32) {
    %c0_i32 = arith.constant 0 : i32
    %c0_i32_0 = arith.constant 0 : i32
    return %arg0, %c0_i32 : i32, i32
  }
  func.func @transform_1(%arg0: i32) -> (i32, i32) {
    %c0_i32 = arith.constant 0 : i32
    %c0_i32_0 = arith.constant 0 : i32
    %c0_i32_1 = arith.constant 0 : i32
    return %c0_i32, %c0_i32_0 : i32, i32
  }
  func.func @transform_2(%arg0: i32) -> (i32, i32) {
    %c0_i32 = arith.constant 0 : i32
    %c0_i32_0 = arith.constant 0 : i32
    %c0_i32_1 = arith.constant 0 : i32
    return %c0_i32, %c0_i32_0 : i32, i32
  }
  func.func @transform_3(%arg0: i32) -> (i32, i32) {
    %c0_i32 = arith.constant 0 : i32
    %c0_i32_0 = arith.constant 0 : i32
    return %arg0, %c0_i32 : i32, i32
  }
}

module attributes {stable_mosaic.version = 11 : i64} {
  func.func @_matmul_stats_kernel(%arg0: i32, %arg1: memref<16x512xbf16, #tpu.memory_space<vmem>>, %arg2: memref<512x128xbf16, #tpu.memory_space<vmem>>, %arg3: memref<16x128xbf16, #tpu.memory_space<vmem>>, %arg4: memref<1x1x128xf32, #tpu.memory_space<vmem>>, %arg5: memref<1x1x128xf32, #tpu.memory_space<vmem>>) attributes {dimension_semantics = [#tpu.dimension_semantics<parallel>], iteration_bounds = array<i64: 2>, scalar_prefetch = 0 : i64, scratch_operands = 0 : i64, tpu.core_type = #tpu.core_type<tc>, window_params = [{transform_indices = @transform_0, window_bounds = array<i64: 16, 512>}, {pipeline_mode = #tpu.pipeline_mode<synchronous>, transform_indices = @transform_1, window_bounds = array<i64: 512, 128>}, {transform_indices = @transform_2, window_bounds = array<i64: 16, 128>}, {transform_indices = @transform_3, window_bounds = array<i64: 1, 1, 128>}, {transform_indices = @transform_4, window_bounds = array<i64: 1, 1, 128>}]} {
    %c0 = arith.constant 0 : index
    %c0_0 = arith.constant 0 : index
    %0 = vector.load %arg1[%c0, %c0_0] : memref<16x512xbf16, #tpu.memory_space<vmem>>, vector<16x512xbf16>
    %c0_1 = arith.constant 0 : index
    %c0_2 = arith.constant 0 : index
    %1 = vector.load %arg2[%c0_1, %c0_2] : memref<512x128xbf16, #tpu.memory_space<vmem>>, vector<512x128xbf16>
    %cst = arith.constant dense<0.000000e+00> : vector<16x128xf32>
    %2 = tpu.matmul %0, %1, %cst {dimension_numbers = #tpu.dot_dimension_numbers<[1], [0], [0], [1], [0, 0, 1, 1], [], []>} : vector<16x512xbf16>, vector<512x128xbf16>, vector<16x128xf32> -> vector<16x128xf32>
    %3 = arith.truncf %2 : vector<16x128xf32> to vector<16x128xbf16>
    %c0_3 = arith.constant 0 : index
    %c0_4 = arith.constant 0 : index
    %4 = vector.load %arg3[%c0_3, %c0_4] : memref<16x128xbf16, #tpu.memory_space<vmem>>, vector<16x128xbf16>
    tpu.vector_store %arg3[%c0_3, %c0_4], %3 {strides = array<i32>} : memref<16x128xbf16, #tpu.memory_space<vmem>>, vector<16x128xbf16>,
    %cst_5 = arith.constant dense<0.000000e+00> : vector<128xf32>
    %5 = vector.multi_reduction <add>, %2, %cst_5 [0] : vector<16x128xf32> to vector<128xf32>
    %6 = vector.shape_cast %5 : vector<128xf32> to vector<1x128xf32>
    %7 = vector.shape_cast %6 : vector<1x128xf32> to vector<1x1x128xf32>
    %c0_6 = arith.constant 0 : index
    %c0_7 = arith.constant 0 : index
    %c0_8 = arith.constant 0 : index
    %8 = vector.load %arg4[%c0_6, %c0_7, %c0_8] : memref<1x1x128xf32, #tpu.memory_space<vmem>>, vector<1x1x128xf32>
    tpu.vector_store %arg4[%c0_6, %c0_7, %c0_8], %7 {strides = array<i32>} : memref<1x1x128xf32, #tpu.memory_space<vmem>>, vector<1x1x128xf32>,
    %9 = arith.mulf %2, %2 : vector<16x128xf32>
    %cst_9 = arith.constant dense<0.000000e+00> : vector<128xf32>
    %10 = vector.multi_reduction <add>, %9, %cst_9 [0] : vector<16x128xf32> to vector<128xf32>
    %11 = vector.shape_cast %10 : vector<128xf32> to vector<1x128xf32>
    %12 = vector.shape_cast %11 : vector<1x128xf32> to vector<1x1x128xf32>
    %c0_10 = arith.constant 0 : index
    %c0_11 = arith.constant 0 : index
    %c0_12 = arith.constant 0 : index
    %13 = vector.load %arg5[%c0_10, %c0_11, %c0_12] : memref<1x1x128xf32, #tpu.memory_space<vmem>>, vector<1x1x128xf32>
    tpu.vector_store %arg5[%c0_10, %c0_11, %c0_12], %12 {strides = array<i32>} : memref<1x1x128xf32, #tpu.memory_space<vmem>>, vector<1x1x128xf32>,
    return
  }
  func.func @transform_0(%arg0: i32) -> (i32, i32) {
    %c0_i32 = arith.constant 0 : i32
    %c0_i32_0 = arith.constant 0 : i32
    return %arg0, %c0_i32 : i32, i32
  }
  func.func @transform_1(%arg0: i32) -> (i32, i32) {
    %c0_i32 = arith.constant 0 : i32
    %c0_i32_0 = arith.constant 0 : i32
    %c0_i32_1 = arith.constant 0 : i32
    return %c0_i32, %c0_i32_0 : i32, i32
  }
  func.func @transform_2(%arg0: i32) -> (i32, i32) {
    %c0_i32 = arith.constant 0 : i32
    %c0_i32_0 = arith.constant 0 : i32
    return %arg0, %c0_i32 : i32, i32
  }
  func.func @transform_3(%arg0: i32) -> (i32, i32, i32) {
    %c0_i32 = arith.constant 0 : i32
    %c0_i32_0 = arith.constant 0 : i32
    %c0_i32_1 = arith.constant 0 : i32
    return %arg0, %c0_i32, %c0_i32_0 : i32, i32, i32
  }
  func.func @transform_4(%arg0: i32) -> (i32, i32, i32) {
    %c0_i32 = arith.constant 0 : i32
    %c0_i32_0 = arith.constant 0 : i32
    %c0_i32_1 = arith.constant 0 : i32
    return %arg0, %c0_i32, %c0_i32_0 : i32, i32, i32
  }
}

</mosaic_0001>

<bundles_post_ra>
// kernel: discriminator_forward.7
= control target key start
LH: loop header
LB: loop body
LE: loop exit
PB: predicated region body
PF: predicated region fallthrough
CT: control target
= control target key end

     0   :  { %s3524_s9 = smov 0   ;;  %s3768_s0 = inlined_call_operand.vmem [shape: bf16[2048,48], index: 0, kind: input, shape index: {}]   ;;  %s3769_s1 = inlined_call_operand.vmem [shape: bf16[48,128], index: 1, kind: input, shape index: {}]   ;;  %s3770_s2 = inlined_call_operand.vmem [shape: bf16[2048,128], index: 2, kind: output, shape index: {}]  }
   0x1 LB: > { %s2438_s10 = sadd.s32 4294967295, %s3507_s9   ;;  %p2442_p0 = scmp.ge.s32.totalorder %s3507_s9, 1  ;;  %s3507_s9 = sphi %s3524_s9, %s12_s9  }
   0x2   : > { %p113_p1 = scmp.lt.s32.totalorder %s3507_s9, 3 }
   0x4   : > { %p114_p2 = pnand %p2442_p0, %p113_p1 }
   0x5   : > { %v3434_v0 = vld [vmem:[%s3769_s1] sm:$0xff] (!%p114_p2)   ;;  %s2443_s13 = sshll.u32 (!%p114_p2), %s2438_s10, 7  ;;  %v3435_v1 = vld [vmem:[%s3769_s1 + $0x8] sm:$0xff] (!%p114_p2)   ;;  %v3436_v2 = vld [vmem:[%s3769_s1 + $0x10] sm:$0xff] (!%p114_p2)   ;;  %vm620_vm0 = vcmask (!%p114_p2), 392192  }
   0x6   : > { %117 = sbr.rel (%p114_p2) target bundleno = 361 (0x169), region = 28  ;;  %p136_p3 = scmp.lt.s32.totalorder (!%p114_p2), %s2443_s13, 255  ;;  %3286 = vmatprep.subr.bf16.mxu0 (!%p114_p2), %v3434_v0  ;;  %3420 = vmatprep.subr.bf16.mxu1 (!%p114_p2), %v3434_v0 }
   0x7   : > { %3287 = vmatpush3.bf16.msra.mxu0 (!%p114_p2), %v3434_v0  ;;  %3423 = vmatpush3.bf16.msra.mxu1 (!%p114_p2), %v3434_v0 }
   0x8   : > { %3288 = vmatprep.subr.bf16.mxu0 (!%p114_p2), %v3435_v1  ;;  %3421 = vmatprep.subr.bf16.mxu1 (!%p114_p2), %v3435_v1 }
   0xb   : > { %3289 = vmatpush3.bf16.msra.mxu0 (!%p114_p2), %v3435_v1  ;;  %3424 = vmatpush3.bf16.msra.mxu1 (!%p114_p2), %v3435_v1 }
   0xc   : > { %3290 = vmatprep.subr.bf16.mxu0 (!%p114_p2), %v3436_v2  ;;  %3422 = vmatprep.subr.bf16.mxu1 (!%p114_p2), %v3436_v2 }
   0xd   : > { %s3772_s13 = smov (!%p136_p3, %s2443_s13), 255 }
   0xe   : > { %s2444_s18 = sshll.u32 %s3772_s13, 2 }
   0xf   : > { %s3549_s21 = scalar_lea.vmem %s3768_s0, %s2444_s18  ;;  %3291 = vmatpush3.bf16.msra.mxu0 %v3436_v2  ;;  %3425 = vmatpush3.bf16.msra.mxu1 %v3436_v2  ;;  %s3684_s24 = scalar_lea.vmem %s3770_s2, %s2444_s18 }
  0x10   : > { %v3437_v3 = vld [vmem:[%s3549_s21] sm:$0xff]   ;;  %v3439_v5 = vld [vmem:[%s3549_s21 + $0x8] sm:$0xff]   ;;  %v3441_v7 = vld [vmem:[%s3549_s21 + $0x10] sm:$0xff]  }
  0x11   : > { %v3438_v4 = vld [vmem:[%s3549_s21 + $0x100] sm:$0xff]   ;;  %3292 = vmatprep.mubr.msk.bf16.mxu0 %vm620_vm0, %v3437_v3  ;;  %v3440_v6 = vld [vmem:[%s3549_s21 + $0x108] sm:$0xff]   ;;  %v3442_v8 = vld [vmem:[%s3549_s21 + $0x110] sm:$0xff]  }
  0x12   : > { %3356 = vmatprep.mubr.msk.bf16.mxu1 %vm620_vm0, %v3438_v4  ;;  %3293 = vmatmul.mubr.msk.bf16.vlgmr.msra.gmra.mrb[0].mxu0 %vm620_vm0, %v3439_v5  ;;  %v3443_v9 = vld [vmem:[%s3549_s21 + $0x18] sm:$0xff]   ;;  %v3445_v11 = vld [vmem:[%s3549_s21 + $0x20] sm:$0xff]   ;;  %v3447_v13 = vld [vmem:[%s3549_s21 + $0x28] sm:$0xff]  }
  0x13   : > { %3357 = vmatmul.mubr.msk.bf16.vlgmr.msra.gmra.mrb[0].mxu1 %vm620_vm0, %v3440_v6  ;;  %3296 = vmatprep.mubr.msk.bf16.mxu0 %vm620_vm0, %v3441_v7  ;;  %v3444_v10 = vld [vmem:[%s3549_s21 + $0x118] sm:$0xff]   ;;  %v3446_v12 = vld [vmem:[%s3549_s21 + $0x120] sm:$0xff]   ;;  %v3448_v14 = vld [vmem:[%s3549_s21 + $0x128] sm:$0xff]  }
  0x14   : > { %3360 = vmatprep.mubr.msk.bf16.mxu1 %vm620_vm0, %v3442_v8  ;;  %v3449_v15 = vld [vmem:[%s3549_s21 + $0x30] sm:$0xff]   ;;  %v3451_v17 = vld [vmem:[%s3549_s21 + $0x38] sm:$0xff]   ;;  %v3453_v19 = vld [vmem:[%s3549_s21 + $0x40] sm:$0xff]  }
  0x15   : > { %v3450_v16 = vld [vmem:[%s3549_s21 + $0x130] sm:$0xff]   ;;  %v3452_v18 = vld [vmem:[%s3549_s21 + $0x138] sm:$0xff]   ;;  %v3454_v20 = vld [vmem:[%s3549_s21 + $0x140] sm:$0xff]  }
  0x16   : > { %v3455_v21 = vld [vmem:[%s3549_s21 + $0x48] sm:$0xff]   ;;  %v3457_v23 = vld [vmem:[%s3549_s21 + $0x50] sm:$0xff]   ;;  %v3459_v25 = vld [vmem:[%s3549_s21 + $0x58] sm:$0xff]  }
  0x17   : > { %v3456_v22 = vld [vmem:[%s3549_s21 + $0x148] sm:$0xff]   ;;  %v3458_v24 = vld [vmem:[%s3549_s21 + $0x150] sm:$0xff]   ;;  %v3460_v26 = vld [vmem:[%s3549_s21 + $0x158] sm:$0xff]  }
  0x18   : > { %v3461_v27 = vld [vmem:[%s3549_s21 + $0x60] sm:$0xff]   ;;  %v3463_v29 = vld [vmem:[%s3549_s21 + $0x68] sm:$0xff]   ;;  %v3465_v31 = vld [vmem:[%s3549_s21 + $0x70] sm:$0xff]  }
  0x19   : > { %v3462_v28 = vld [vmem:[%s3549_s21 + $0x160] sm:$0xff]   ;;  %v3464_v30 = vld [vmem:[%s3549_s21 + $0x168] sm:$0xff]   ;;  %v3466_v32 = vld [vmem:[%s3549_s21 + $0x170] sm:$0xff]  }
  0x1a   : > { %3297 = vmatmul.mubr.msk.bf16.gmra.mrb[4].mxu0 %vm620_vm0, %v3443_v9  ;;  %v3467_v33 = vld [vmem:[%s3549_s21 + $0x78] sm:$0xff]   ;;  %v3469_v35 = vld [vmem:[%s3549_s21 + $0x80] sm:$0xff]   ;;  %v3471_v37 = vld [vmem:[%s3549_s21 + $0x88] sm:$0xff]  }
  0x1b   : > { %3361 = vmatmul.mubr.msk.bf16.gmra.mrb[4].mxu1 %vm620_vm0, %v3444_v10  ;;  %3300 = vmatprep.mubr.msk.bf16.mxu0 %vm620_vm0, %v3445_v11  ;;  %v3468_v34 = vld [vmem:[%s3549_s21 + $0x178] sm:$0xff]   ;;  %v3470_v36 = vld [vmem:[%s3549_s21 + $0x180] sm:$0xff]   ;;  %v3472_v38 = vld [vmem:[%s3549_s21 + $0x188] sm:$0xff]  }
  0x1c   : > { %3364 = vmatprep.mubr.msk.bf16.mxu1 %vm620_vm0, %v3446_v12  ;;  %v3473_v39 = vld [vmem:[%s3549_s21 + $0x90] sm:$0xff]   ;;  %v3475_v41 = vld [vmem:[%s3549_s21 + $0x98] sm:$0xff]   ;;  %v3477_v43 = vld [vmem:[%s3549_s21 + $0xa0] sm:$0xff]  }
  0x1d   : > { %v3474_v40 = vld [vmem:[%s3549_s21 + $0x190] sm:$0xff]   ;;  %v3476_v42 = vld [vmem:[%s3549_s21 + $0x198] sm:$0xff]   ;;  %v3478_v44 = vld [vmem:[%s3549_s21 + $0x1a0] sm:$0xff]  }
  0x1e   : > { %v3479_v45 = vld [vmem:[%s3549_s21 + $0xa8] sm:$0xff]   ;;  %v3481_v47 = vld [vmem:[%s3549_s21 + $0xb0] sm:$0xff]   ;;  %v3483_v49 = vld [vmem:[%s3549_s21 + $0xb8] sm:$0xff]  }
  0x1f   : > { %v3480_v46 = vld [vmem:[%s3549_s21 + $0x1a8] sm:$0xff]   ;;  %v3482_v48 = vld [vmem:[%s3549_s21 + $0x1b0] sm:$0xff]   ;;  %v3484_v50 = vld [vmem:[%s3549_s21 + $0x1b8] sm:$0xff]  }
  0x20   : > { %v3485_v51 = vld [vmem:[%s3549_s21 + $0xc0] sm:$0xff]   ;;  %v3487_v53 = vld [vmem:[%s3549_s21 + $0xc8] sm:$0xff]   ;;  %v3489_v55 = vld [vmem:[%s3549_s21 + $0xd0] sm:$0xff]  }
  0x21   : > { %v3486_v52 = vld [vmem:[%s3549_s21 + $0x1c0] sm:$0xff]   ;;  %v3488_v54 = vld [vmem:[%s3549_s21 + $0x1c8] sm:$0xff]   ;;  %v3490_v56 = vld [vmem:[%s3549_s21 + $0x1d0] sm:$0xff]  }
  0x22   : > { %3301 = vmatmul.mubr.msk.bf16.gmra.mrb[8].mxu0 %vm620_vm0, %v3447_v13  ;;  %v3491_v57 = vld [vmem:[%s3549_s21 + $0xd8] sm:$0xff]   ;;  %v3493_v59 = vld [vmem:[%s3549_s21 + $0xe0] sm:$0xff]   ;;  %v3495_v61 = vld [vmem:[%s3549_s21 + $0xe8] sm:$0xff]  }
  0x23   : > { %3365 = vmatmul.mubr.msk.bf16.gmra.mrb[8].mxu1 %vm620_vm0, %v3448_v14  ;;  %3304 = vmatprep.mubr.msk.bf16.mxu0 %vm620_vm0, %v3449_v15  ;;  %v3492_v58 = vld [vmem:[%s3549_s21 + $0x1d8] sm:$0xff]   ;;  %v3494_v60 = vld [vmem:[%s3549_s21 + $0x1e0] sm:$0xff]   ;;  %v3496_v62 = vld [vmem:[%s3549_s21 + $0x1e8] sm:$0xff]  }
  0x24   : > { %3368 = vmatprep.mubr.msk.bf16.mxu1 %vm620_vm0, %v3450_v16  ;;  %v3497_v63 = vld [vmem:[%s3549_s21 + $0xf0] sm:$0xff]   ;;  %v3499_v1 = vld [vmem:[%s3549_s21 + $0xf8] sm:$0xff]  }
  0x25   : > { %v3498_v0 = vld [vmem:[%s3549_s21 + $0x1f0] sm:$0xff]   ;;  %v3500_v2 = vld [vmem:[%s3549_s21 + $0x1f8] sm:$0xff]  }
  0x2a   : > { %3305 = vmatmul.mubr.msk.bf16.gmra.mrb[12].mxu0 %vm620_vm0, %v3451_v17 }
  0x2b   : > { %3369 = vmatmul.mubr.msk.bf16.gmra.mrb[12].mxu1 %vm620_vm0, %v3452_v18  ;;  %3308 = vmatprep.mubr.msk.bf16.mxu0 %vm620_vm0, %v3453_v19 }
  0x2c   : > { %3372 = vmatprep.mubr.msk.bf16.mxu1 %vm620_vm0, %v3454_v20 }
  0x32   : > { %3309 = vmatmul.mubr.msk.bf16.gmra.mrb[16].mxu0 %vm620_vm0, %v3455_v21 }
  0x33   : > { %3373 = vmatmul.mubr.msk.bf16.gmra.mrb[16].mxu1 %vm620_vm0, %v3456_v22  ;;  %3312 = vmatprep.mubr.msk.bf16.mxu0 %vm620_vm0, %v3457_v23 }
  0x34   : > { %3376 = vmatprep.mubr.msk.bf16.mxu1 %vm620_vm0, %v3458_v24 }
  0x3a   : > { %3313 = vmatmul.mubr.msk.bf16.gmra.mrb[20].mxu0 %vm620_vm0, %v3459_v25 }
  0x3b   : > { %3377 = vmatmul.mubr.msk.bf16.gmra.mrb[20].mxu1 %vm620_vm0, %v3460_v26  ;;  %3316 = vmatprep.mubr.msk.bf16.mxu0 %vm620_vm0, %v3461_v27 }
  0x3c   : > { %3380 = vmatprep.mubr.msk.bf16.mxu1 %vm620_vm0, %v3462_v28 }
  0x42   : > { %3317 = vmatmul.mubr.msk.bf16.gmra.mrb[24].mxu0 %vm620_vm0, %v3463_v29 }
  0x43   : > { %3381 = vmatmul.mubr.msk.bf16.gmra.mrb[24].mxu1 %vm620_vm0, %v3464_v30  ;;  %3320 = vmatprep.mubr.msk.bf16.mxu0 %vm620_vm0, %v3465_v31 }
  0x44   : > { %3384 = vmatprep.mubr.msk.bf16.mxu1 %vm620_vm0, %v3466_v32 }
  0x4a   : > { %3321 = vmatmul.mubr.msk.bf16.gmra.mrb[28].mxu0 %vm620_vm0, %v3467_v33 }
  0x4b   : > { %3385 = vmatmul.mubr.msk.bf16.gmra.mrb[28].mxu1 %vm620_vm0, %v3468_v34  ;;  %3324 = vmatprep.mubr.msk.bf16.mxu0 %vm620_vm0, %v3469_v35 }
  0x4c   : > { %3388 = vmatprep.mubr.msk.bf16.mxu1 %vm620_vm0, %v3470_v36 }
  0x52   : > { %3325 = vmatmul.mubr.msk.bf16.gmra.mrb[32].mxu0 %vm620_vm0, %v3471_v37 }
  0x53   : > { %3389 = vmatmul.mubr.msk.bf16.gmra.mrb[32].mxu1 %vm620_vm0, %v3472_v38  ;;  %3328 = vmatprep.mubr.msk.bf16.mxu0 %vm620_vm0, %v3473_v39 }
  0x54   : > { %3392 = vmatprep.mubr.msk.bf16.mxu1 %vm620_vm0, %v3474_v40 }
  0x5a   : > { %3329 = vmatmul.mubr.msk.bf16.gmra.mrb[36].mxu0 %vm620_vm0, %v3475_v41 }
  0x5b   : > { %3393 = vmatmul.mubr.msk.bf16.gmra.mrb[36].mxu1 %vm620_vm0, %v3476_v42  ;;  %3332 = vmatprep.mubr.msk.bf16.mxu0 %vm620_vm0, %v3477_v43 }
  0x5c   : > { %3396 = vmatprep.mubr.msk.bf16.mxu1 %vm620_vm0, %v3478_v44 }
  0x62   : > { %3333 = vmatmul.mubr.msk.bf16.gmra.mrb[40].mxu0 %vm620_vm0, %v3479_v45 }
  0x63   : > { %3397 = vmatmul.mubr.msk.bf16.gmra.mrb[40].mxu1 %vm620_vm0, %v3480_v46  ;;  %3336 = vmatprep.mubr.msk.bf16.mxu0 %vm620_vm0, %v3481_v47 }
  0x64   : > { %3400 = vmatprep.mubr.msk.bf16.mxu1 %vm620_vm0, %v3482_v48 }
  0x6a   : > { %3337 = vmatmul.mubr.msk.bf16.gmra.mrb[44].mxu0 %vm620_vm0, %v3483_v49 }
  0x6b   : > { %3401 = vmatmul.mubr.msk.bf16.gmra.mrb[44].mxu1 %vm620_vm0, %v3484_v50  ;;  %3340 = vmatprep.mubr.msk.bf16.mxu0 %vm620_vm0, %v3485_v51 }
  0x6c   : > { %3404 = vmatprep.mubr.msk.bf16.mxu1 %vm620_vm0, %v3486_v52 }
  0x72   : > { %3341 = vmatmul.mubr.msk.bf16.gmra.mrb[48].mxu0 %vm620_vm0, %v3487_v53 }
  0x73   : > { %3405 = vmatmul.mubr.msk.bf16.gmra.mrb[48].mxu1 %vm620_vm0, %v3488_v54  ;;  %3344 = vmatprep.mubr.msk.bf16.mxu0 %vm620_vm0, %v3489_v55 }
  0x74   : > { %3408 = vmatprep.mubr.msk.bf16.mxu1 %vm620_vm0, %v3490_v56 }
  0x7a   : > { %3345 = vmatmul.mubr.msk.bf16.gmra.mrb[52].mxu0 %vm620_vm0, %v3491_v57 }
  0x7b   : > { %3409 = vmatmul.mubr.msk.bf16.gmra.mrb[52].mxu1 %vm620_vm0, %v3492_v58  ;;  %3348 = vmatprep.mubr.msk.bf16.mxu0 %vm620_vm0, %v3493_v59 }
  0x7c   : > { %3412 = vmatprep.mubr.msk.bf16.mxu1 %vm620_vm0, %v3494_v60 }
  0x82   : > { %3349 = vmatmul.mubr.msk.bf16.gmra.mrb[56].mxu0 %vm620_vm0, %v3495_v61 }
  0x83   : > { %3413 = vmatmul.mubr.msk.bf16.gmra.mrb[56].mxu1 %vm620_vm0, %v3496_v62  ;;  %3352 = vmatprep.mubr.msk.bf16.mxu0 %vm620_vm0, %v3497_v63 }
  0x84   : > { %3416 = vmatprep.mubr.msk.bf16.mxu1 %vm620_vm0, %v3498_v0 }
  0x8a   : > { %3353 = vmatmul.mubr.msk.bf16.gmra.mrb[60].mxu0 %vm620_vm0, %v3499_v1 }
  0x8b   : > { %3417 = vmatmul.mubr.msk.bf16.gmra.mrb[60].mxu1 %vm620_vm0, %v3500_v2 }
  0xe5   : > { %v3294_v3 = vpop.f32.mrb[0].mxu0 }
  0xe6   : > { %v3358_v4 = vpop.f32.mrb[0].mxu1  ;;  %vm1360_vm1 = vcmp.gt.f32.partialorder %v3294_v3, 0.0  ;;  %v1488_v5 = vmul.f32 0.2, %v3294_v3  ;;  %v847_v7 = vpop.f32.mrb[1].mxu0 }
  0xe7   : > { %v1552_v6 = vmul.f32 0.2, %v3358_v4  ;;  %vm1424_vm2 = vcmp.gt.f32.partialorder %v3358_v4, 0.0  ;;  %v1103_v8 = vpop.f32.mrb[1].mxu1  ;;  %v1486_v9 = vmul.f32 0.2, %v847_v7 }
  0xe8   : > { %v3295_v10 = vpop.f32.mrb[2].mxu0  ;;  %v3359_v11 = vpop.f32.mrb[2].mxu1  ;;  %v1616_v12 = vsel %vm1360_vm1, %v3294_v3, %v1488_v5  ;;  %v1550_v13 = vmul.f32 0.2, %v1103_v8  ;;  %vm1358_vm4 = vcmp.gt.f32.partialorder %v847_v7, 0.0  ;;  %vm1422_vm6 = vcmp.gt.f32.partialorder %v1103_v8, 0.0 }
  0xe9   : > { %vm1361_vm3 = vcmp.gt.f32.partialorder %v3295_v10, 0.0  ;;  %v1489_v14 = vmul.f32 0.2, %v3295_v10  ;;  %v1680_v15 = vsel %vm1424_vm2, %v3358_v4, %v1552_v6  ;;  %vm1425_vm5 = vcmp.gt.f32.partialorder %v3359_v11, 0.0  ;;  %v850_v17 = vpop.f32.mrb[3].mxu0  ;;  %v1106_v18 = vpop.f32.mrb[3].mxu1 }
  0xea   : > { %v1553_v16 = vmul.f32 0.2, %v3359_v11  ;;  %vm1359_vm7 = vcmp.gt.f32.partialorder %v850_v17, 0.0  ;;  %v1487_v20 = vmul.f32 0.2, %v850_v17  ;;  %vm1423_vm8 = vcmp.gt.f32.partialorder %v1106_v18, 0.0 }
  0xeb   : > { %v1617_v19 = vsel %vm1361_vm3, %v3295_v10, %v1489_v14  ;;  %v1551_v23 = vmul.f32 0.2, %v1106_v18  ;;  %v1614_v24 = vsel %vm1358_vm4, %v847_v7, %v1486_v9  ;;  %v1678_v29 = vsel %vm1422_vm6, %v1103_v8, %v1550_v13 }
  0xec   : > { %v2844_v21 = vpack.c.bf16 %v1617_v19, %v1616_v12  ;;  %v1681_v22 = vsel %vm1425_vm5, %v3359_v11, %v1553_v16  ;;  %v1615_v26 = vsel %vm1359_vm7, %v850_v17, %v1487_v20 }
  0xed   : > { %v3004_v25 = vpack.c.bf16 %v1681_v22, %v1680_v15  ;;  %v3298_v27 = vpop.f32.mrb[4].mxu0  ;;  %v2839_v30 = vpack.c.bf16 %v1615_v26, %v1614_v24  ;;  %v1679_v31 = vsel %vm1423_vm8, %v1106_v18, %v1551_v23 }
  0xee   : > { %v3362_v28 = vpop.f32.mrb[4].mxu1  ;;  %3156 = vst [vmem:[%s3684_s24 + $0x8] sm:$0xff] %v2844_v21   ;;  %v1492_v32 = vmul.f32 0.2, %v3298_v27  ;;  %v863_v33 = vpop.f32.mrb[5].mxu0  ;;  %v2999_v35 = vpack.c.bf16 %v1679_v31, %v1678_v29  ;;  %vm1364_vm9 = vcmp.gt.f32.partialorder %v3298_v27, 0.0 }
  0xef   : > { %v1119_v34 = vpop.f32.mrb[5].mxu1  ;;  %3188 = vst [vmem:[%s3684_s24 + $0x108] sm:$0xff] %v3004_v25   ;;  %v1556_v36 = vmul.f32 0.2, %v3362_v28  ;;  %v3299_v37 = vpop.f32.mrb[6].mxu0  ;;  %2840 = vst [vmem:[%s3684_s24] sm:$0xff] %v2839_v30   ;;  %vm1428_vm10 = vcmp.gt.f32.partialorder %v3362_v28, 0.0 }
  0xf0   : > { %v3363_v38 = vpop.f32.mrb[6].mxu1  ;;  %v1490_v39 = vmul.f32 0.2, %v863_v33  ;;  %v1554_v40 = vmul.f32 0.2, %v1119_v34  ;;  %v866_v41 = vpop.f32.mrb[7].mxu0  ;;  %v1620_v44 = vsel %vm1364_vm9, %v3298_v27, %v1492_v32 }
  0xf1   : > { %3187 = vst [vmem:[%s3684_s24 + $0x100] sm:$0xff] %v2999_v35   ;;  %vm1362_vm11 = vcmp.gt.f32.partialorder %v863_v33, 0.0  ;;  %vm1365_vm12 = vcmp.gt.f32.partialorder %v3299_v37, 0.0  ;;  %v1493_v42 = vmul.f32 0.2, %v3299_v37  ;;  %vm1429_vm13 = vcmp.gt.f32.partialorder %v3363_v38, 0.0 }
  0xf2   : > { %v1122_v43 = vpop.f32.mrb[7].mxu1  ;;  %vm1426_vm14 = vcmp.gt.f32.partialorder %v1119_v34, 0.0  ;;  %v1557_v45 = vmul.f32 0.2, %v3363_v38  ;;  %vm1363_vm15 = vcmp.gt.f32.partialorder %v866_v41, 0.0  ;;  %v1684_v49 = vsel %vm1428_vm10, %v3362_v28, %v1556_v36 }
  0xf3   : > { %v1621_v46 = vsel %vm1365_vm12, %v3299_v37, %v1493_v42  ;;  %v1491_v47 = vmul.f32 0.2, %v866_v41  ;;  %vm1427_vm0 = vcmp.gt.f32.partialorder %v1122_v43, 0.0  ;;  %v1555_v48 = vmul.f32 0.2, %v1122_v43 }
  0xf4   : > { %v1618_v50 = vsel %vm1362_vm11, %v863_v33, %v1490_v39  ;;  %v2854_v51 = vpack.c.bf16 %v1621_v46, %v1620_v44  ;;  %v1685_v52 = vsel %vm1429_vm13, %v3363_v38, %v1557_v45  ;;  %v1682_v53 = vsel %vm1426_vm14, %v1119_v34, %v1554_v40 }
  0xf5   : > { %v3014_v54 = vpack.c.bf16 %v1685_v52, %v1684_v49  ;;  %v1619_v55 = vsel %vm1363_vm15, %v866_v41, %v1491_v47  ;;  %v1683_v56 = vsel %vm1427_vm0, %v1122_v43, %v1555_v48  ;;  %v3302_v57 = vpop.f32.mrb[8].mxu0 }
  0xf6   : > { %v3366_v58 = vpop.f32.mrb[8].mxu1  ;;  %3158 = vst [vmem:[%s3684_s24 + $0x18] sm:$0xff] %v2854_v51   ;;  %v2849_v59 = vpack.c.bf16 %v1619_v55, %v1618_v50  ;;  %v3009_v60 = vpack.c.bf16 %v1683_v56, %v1682_v53  ;;  %vm1368_vm1 = vcmp.gt.f32.partialorder %v3302_v57, 0.0  ;;  %v1496_v61 = vmul.f32 0.2, %v3302_v57  ;;  %v879_v62 = vpop.f32.mrb[9].mxu0 }
  0xf7   : > { %v1135_v63 = vpop.f32.mrb[9].mxu1  ;;  %3190 = vst [vmem:[%s3684_s24 + $0x118] sm:$0xff] %v3014_v54   ;;  %vm1432_vm2 = vcmp.gt.f32.partialorder %v3366_v58, 0.0  ;;  %v1560_v0 = vmul.f32 0.2, %v3366_v58  ;;  %v3303_v3 = vpop.f32.mrb[10].mxu0 }
  0xf8   : > { %3157 = vst [vmem:[%s3684_s24 + $0x10] sm:$0xff] %v2849_v59   ;;  %3189 = vst [vmem:[%s3684_s24 + $0x110] sm:$0xff] %v3009_v60   ;;  %v1494_v1 = vmul.f32 0.2, %v879_v62  ;;  %v1558_v2 = vmul.f32 0.2, %v1135_v63  ;;  %v1624_v5 = vsel %vm1368_vm1, %v3302_v57, %v1496_v61 }
  0xf9   : > { %v3367_v4 = vpop.f32.mrb[10].mxu1  ;;  %vm1366_vm3 = vcmp.gt.f32.partialorder %v879_v62, 0.0  ;;  %vm1369_vm4 = vcmp.gt.f32.partialorder %v3303_v3, 0.0  ;;  %v1497_v6 = vmul.f32 0.2, %v3303_v3  ;;  %v882_v7 = vpop.f32.mrb[11].mxu0  ;;  %v1688_v13 = vsel %vm1432_vm2, %v3366_v58, %v1560_v0 }
  0xfa   : > { %v1138_v8 = vpop.f32.mrb[11].mxu1  ;;  %vm1430_vm5 = vcmp.gt.f32.partialorder %v1135_v63, 0.0  ;;  %vm1433_vm6 = vcmp.gt.f32.partialorder %v3367_v4, 0.0  ;;  %v1561_v9 = vmul.f32 0.2, %v3367_v4  ;;  %vm1367_vm7 = vcmp.gt.f32.partialorder %v882_v7, 0.0 }
  0xfb   : > { %v1625_v10 = vsel %vm1369_vm4, %v3303_v3, %v1497_v6  ;;  %v1495_v11 = vmul.f32 0.2, %v882_v7  ;;  %vm1431_vm8 = vcmp.gt.f32.partialorder %v1138_v8, 0.0  ;;  %v1559_v12 = vmul.f32 0.2, %v1138_v8 }
  0xfc   : > { %v1622_v14 = vsel %vm1366_vm3, %v879_v62, %v1494_v1  ;;  %v2864_v15 = vpack.c.bf16 %v1625_v10, %v1624_v5  ;;  %v1689_v16 = vsel %vm1433_vm6, %v3367_v4, %v1561_v9  ;;  %v1686_v17 = vsel %vm1430_vm5, %v1135_v63, %v1558_v2 }
  0xfd   : > { %v3024_v18 = vpack.c.bf16 %v1689_v16, %v1688_v13  ;;  %v1623_v19 = vsel %vm1367_vm7, %v882_v7, %v1495_v11  ;;  %v1687_v20 = vsel %vm1431_vm8, %v1138_v8, %v1559_v12  ;;  %v3306_v21 = vpop.f32.mrb[12].mxu0 }
  0xfe   : > { %v3370_v22 = vpop.f32.mrb[12].mxu1  ;;  %3160 = vst [vmem:[%s3684_s24 + $0x28] sm:$0xff] %v2864_v15   ;;  %v2859_v23 = vpack.c.bf16 %v1623_v19, %v1622_v14  ;;  %v3019_v24 = vpack.c.bf16 %v1687_v20, %v1686_v17  ;;  %vm1372_vm9 = vcmp.gt.f32.partialorder %v3306_v21, 0.0  ;;  %v1500_v25 = vmul.f32 0.2, %v3306_v21  ;;  %v895_v26 = vpop.f32.mrb[13].mxu0 }
  0xff   : > { %v1151_v27 = vpop.f32.mrb[13].mxu1  ;;  %3192 = vst [vmem:[%s3684_s24 + $0x128] sm:$0xff] %v3024_v18   ;;  %vm1436_vm10 = vcmp.gt.f32.partialorder %v3370_v22, 0.0  ;;  %v1564_v28 = vmul.f32 0.2, %v3370_v22  ;;  %v3307_v31 = vpop.f32.mrb[14].mxu0 }
 0x100   : > { %3159 = vst [vmem:[%s3684_s24 + $0x20] sm:$0xff] %v2859_v23   ;;  %3191 = vst [vmem:[%s3684_s24 + $0x120] sm:$0xff] %v3019_v24   ;;  %v1498_v29 = vmul.f32 0.2, %v895_v26  ;;  %v1562_v30 = vmul.f32 0.2, %v1151_v27  ;;  %v1628_v33 = vsel %vm1372_vm9, %v3306_v21, %v1500_v25 }
 0x101   : > { %v3371_v32 = vpop.f32.mrb[14].mxu1  ;;  %vm1370_vm11 = vcmp.gt.f32.partialorder %v895_v26, 0.0  ;;  %vm1373_vm12 = vcmp.gt.f32.partialorder %v3307_v31, 0.0  ;;  %v1501_v34 = vmul.f32 0.2, %v3307_v31  ;;  %v898_v35 = vpop.f32.mrb[15].mxu0  ;;  %v1692_v41 = vsel %vm1436_vm10, %v3370_v22, %v1564_v28 }
 0x102   : > { %v1154_v36 = vpop.f32.mrb[15].mxu1  ;;  %vm1434_vm13 = vcmp.gt.f32.partialorder %v1151_v27, 0.0  ;;  %vm1437_vm14 = vcmp.gt.f32.partialorder %v3371_v32, 0.0  ;;  %v1565_v37 = vmul.f32 0.2, %v3371_v32  ;;  %vm1371_vm15 = vcmp.gt.f32.partialorder %v898_v35, 0.0 }
 0x103   : > { %v1629_v38 = vsel %vm1373_vm12, %v3307_v31, %v1501_v34  ;;  %v1499_v39 = vmul.f32 0.2, %v898_v35  ;;  %vm1435_vm0 = vcmp.gt.f32.partialorder %v1154_v36, 0.0  ;;  %v1563_v40 = vmul.f32 0.2, %v1154_v36 }
 0x104   : > { %v1626_v42 = vsel %vm1370_vm11, %v895_v26, %v1498_v29  ;;  %v2874_v43 = vpack.c.bf16 %v1629_v38, %v1628_v33  ;;  %v1693_v44 = vsel %vm1437_vm14, %v3371_v32, %v1565_v37  ;;  %v1690_v45 = vsel %vm1434_vm13, %v1151_v27, %v1562_v30 }
 0x105   : > { %v3034_v46 = vpack.c.bf16 %v1693_v44, %v1692_v41  ;;  %v1627_v47 = vsel %vm1371_vm15, %v898_v35, %v1499_v39  ;;  %v1691_v48 = vsel %vm1435_vm0, %v1154_v36, %v1563_v40  ;;  %v3310_v49 = vpop.f32.mrb[16].mxu0 }
 0x106   : > { %v3374_v50 = vpop.f32.mrb[16].mxu1  ;;  %3162 = vst [vmem:[%s3684_s24 + $0x38] sm:$0xff] %v2874_v43   ;;  %v2869_v51 = vpack.c.bf16 %v1627_v47, %v1626_v42  ;;  %v3029_v52 = vpack.c.bf16 %v1691_v48, %v1690_v45  ;;  %vm1376_vm1 = vcmp.gt.f32.partialorder %v3310_v49, 0.0  ;;  %v1504_v53 = vmul.f32 0.2, %v3310_v49  ;;  %v911_v54 = vpop.f32.mrb[17].mxu0 }
 0x107   : > { %v1167_v55 = vpop.f32.mrb[17].mxu1  ;;  %3194 = vst [vmem:[%s3684_s24 + $0x138] sm:$0xff] %v3034_v46   ;;  %vm1440_vm2 = vcmp.gt.f32.partialorder %v3374_v50, 0.0  ;;  %v1568_v56 = vmul.f32 0.2, %v3374_v50  ;;  %v3311_v59 = vpop.f32.mrb[18].mxu0 }
 0x108   : > { %3161 = vst [vmem:[%s3684_s24 + $0x30] sm:$0xff] %v2869_v51   ;;  %3193 = vst [vmem:[%s3684_s24 + $0x130] sm:$0xff] %v3029_v52   ;;  %v1502_v57 = vmul.f32 0.2, %v911_v54  ;;  %v1566_v58 = vmul.f32 0.2, %v1167_v55  ;;  %v1632_v61 = vsel %vm1376_vm1, %v3310_v49, %v1504_v53 }
 0x109   : > { %v3375_v60 = vpop.f32.mrb[18].mxu1  ;;  %vm1374_vm3 = vcmp.gt.f32.partialorder %v911_v54, 0.0  ;;  %vm1377_vm4 = vcmp.gt.f32.partialorder %v3311_v59, 0.0  ;;  %v1505_v62 = vmul.f32 0.2, %v3311_v59  ;;  %v914_v63 = vpop.f32.mrb[19].mxu0  ;;  %v1696_v5 = vsel %vm1440_vm2, %v3374_v50, %v1568_v56 }
 0x10a   : > { %v1170_v0 = vpop.f32.mrb[19].mxu1  ;;  %vm1438_vm5 = vcmp.gt.f32.partialorder %v1167_v55, 0.0  ;;  %vm1441_vm6 = vcmp.gt.f32.partialorder %v3375_v60, 0.0  ;;  %v1569_v1 = vmul.f32 0.2, %v3375_v60  ;;  %vm1375_vm7 = vcmp.gt.f32.partialorder %v914_v63, 0.0 }
 0x10b   : > { %v1633_v2 = vsel %vm1377_vm4, %v3311_v59, %v1505_v62  ;;  %v1503_v3 = vmul.f32 0.2, %v914_v63  ;;  %vm1439_vm8 = vcmp.gt.f32.partialorder %v1170_v0, 0.0  ;;  %v1567_v4 = vmul.f32 0.2, %v1170_v0 }
 0x10c   : > { %v1630_v6 = vsel %vm1374_vm3, %v911_v54, %v1502_v57  ;;  %v2884_v7 = vpack.c.bf16 %v1633_v2, %v1632_v61  ;;  %v1697_v8 = vsel %vm1441_vm6, %v3375_v60, %v1569_v1  ;;  %v1694_v9 = vsel %vm1438_vm5, %v1167_v55, %v1566_v58 }
 0x10d   : > { %v3044_v10 = vpack.c.bf16 %v1697_v8, %v1696_v5  ;;  %v1631_v11 = vsel %vm1375_vm7, %v914_v63, %v1503_v3  ;;  %v1695_v12 = vsel %vm1439_vm8, %v1170_v0, %v1567_v4  ;;  %v3314_v13 = vpop.f32.mrb[20].mxu0 }
 0x10e   : > { %v3378_v14 = vpop.f32.mrb[20].mxu1  ;;  %3164 = vst [vmem:[%s3684_s24 + $0x48] sm:$0xff] %v2884_v7   ;;  %v2879_v15 = vpack.c.bf16 %v1631_v11, %v1630_v6  ;;  %v3039_v16 = vpack.c.bf16 %v1695_v12, %v1694_v9  ;;  %vm1380_vm9 = vcmp.gt.f32.partialorder %v3314_v13, 0.0  ;;  %v1508_v17 = vmul.f32 0.2, %v3314_v13  ;;  %v927_v18 = vpop.f32.mrb[21].mxu0 }
 0x10f   : > { %v1183_v19 = vpop.f32.mrb[21].mxu1  ;;  %3196 = vst [vmem:[%s3684_s24 + $0x148] sm:$0xff] %v3044_v10   ;;  %vm1444_vm10 = vcmp.gt.f32.partialorder %v3378_v14, 0.0  ;;  %v1572_v20 = vmul.f32 0.2, %v3378_v14  ;;  %v3315_v23 = vpop.f32.mrb[22].mxu0 }
 0x110   : > { %3163 = vst [vmem:[%s3684_s24 + $0x40] sm:$0xff] %v2879_v15   ;;  %3195 = vst [vmem:[%s3684_s24 + $0x140] sm:$0xff] %v3039_v16   ;;  %v1506_v21 = vmul.f32 0.2, %v927_v18  ;;  %v1570_v22 = vmul.f32 0.2, %v1183_v19  ;;  %v1636_v25 = vsel %vm1380_vm9, %v3314_v13, %v1508_v17 }
 0x111   : > { %v3379_v24 = vpop.f32.mrb[22].mxu1  ;;  %vm1378_vm11 = vcmp.gt.f32.partialorder %v927_v18, 0.0  ;;  %vm1381_vm12 = vcmp.gt.f32.partialorder %v3315_v23, 0.0  ;;  %v1509_v26 = vmul.f32 0.2, %v3315_v23  ;;  %v930_v27 = vpop.f32.mrb[23].mxu0  ;;  %v1700_v33 = vsel %vm1444_vm10, %v3378_v14, %v1572_v20 }
 0x112   : > { %v1186_v28 = vpop.f32.mrb[23].mxu1  ;;  %vm1442_vm13 = vcmp.gt.f32.partialorder %v1183_v19, 0.0  ;;  %vm1445_vm14 = vcmp.gt.f32.partialorder %v3379_v24, 0.0  ;;  %v1573_v29 = vmul.f32 0.2, %v3379_v24  ;;  %vm1379_vm15 = vcmp.gt.f32.partialorder %v930_v27, 0.0 }
 0x113   : > { %v1637_v30 = vsel %vm1381_vm12, %v3315_v23, %v1509_v26  ;;  %v1507_v31 = vmul.f32 0.2, %v930_v27  ;;  %vm1443_vm0 = vcmp.gt.f32.partialorder %v1186_v28, 0.0  ;;  %v1571_v32 = vmul.f32 0.2, %v1186_v28 }
 0x114   : > { %v1634_v34 = vsel %vm1378_vm11, %v927_v18, %v1506_v21  ;;  %v2894_v35 = vpack.c.bf16 %v1637_v30, %v1636_v25  ;;  %v1701_v36 = vsel %vm1445_vm14, %v3379_v24, %v1573_v29  ;;  %v1698_v37 = vsel %vm1442_vm13, %v1183_v19, %v1570_v22 }
 0x115   : > { %v3054_v38 = vpack.c.bf16 %v1701_v36, %v1700_v33  ;;  %v1635_v39 = vsel %vm1379_vm15, %v930_v27, %v1507_v31  ;;  %v1699_v40 = vsel %vm1443_vm0, %v1186_v28, %v1571_v32  ;;  %v3318_v41 = vpop.f32.mrb[24].mxu0 }
 0x116   : > { %v3382_v42 = vpop.f32.mrb[24].mxu1  ;;  %3166 = vst [vmem:[%s3684_s24 + $0x58] sm:$0xff] %v2894_v35   ;;  %v2889_v43 = vpack.c.bf16 %v1635_v39, %v1634_v34  ;;  %v3049_v44 = vpack.c.bf16 %v1699_v40, %v1698_v37  ;;  %vm1384_vm1 = vcmp.gt.f32.partialorder %v3318_v41, 0.0  ;;  %v1512_v45 = vmul.f32 0.2, %v3318_v41  ;;  %v943_v46 = vpop.f32.mrb[25].mxu0 }
 0x117   : > { %v1199_v47 = vpop.f32.mrb[25].mxu1  ;;  %3198 = vst [vmem:[%s3684_s24 + $0x158] sm:$0xff] %v3054_v38   ;;  %vm1448_vm2 = vcmp.gt.f32.partialorder %v3382_v42, 0.0  ;;  %v1576_v48 = vmul.f32 0.2, %v3382_v42  ;;  %v3319_v51 = vpop.f32.mrb[26].mxu0 }
 0x118   : > { %3165 = vst [vmem:[%s3684_s24 + $0x50] sm:$0xff] %v2889_v43   ;;  %3197 = vst [vmem:[%s3684_s24 + $0x150] sm:$0xff] %v3049_v44   ;;  %v1510_v49 = vmul.f32 0.2, %v943_v46  ;;  %v1574_v50 = vmul.f32 0.2, %v1199_v47  ;;  %v1640_v53 = vsel %vm1384_vm1, %v3318_v41, %v1512_v45 }
 0x119   : > { %v3383_v52 = vpop.f32.mrb[26].mxu1  ;;  %vm1382_vm3 = vcmp.gt.f32.partialorder %v943_v46, 0.0  ;;  %vm1385_vm4 = vcmp.gt.f32.partialorder %v3319_v51, 0.0  ;;  %v1513_v54 = vmul.f32 0.2, %v3319_v51  ;;  %v946_v55 = vpop.f32.mrb[27].mxu0  ;;  %v1704_v61 = vsel %vm1448_vm2, %v3382_v42, %v1576_v48 }
 0x11a   : > { %v1202_v56 = vpop.f32.mrb[27].mxu1  ;;  %vm1446_vm5 = vcmp.gt.f32.partialorder %v1199_v47, 0.0  ;;  %vm1449_vm6 = vcmp.gt.f32.partialorder %v3383_v52, 0.0  ;;  %v1577_v57 = vmul.f32 0.2, %v3383_v52  ;;  %vm1383_vm7 = vcmp.gt.f32.partialorder %v946_v55, 0.0 }
 0x11b   : > { %v1641_v58 = vsel %vm1385_vm4, %v3319_v51, %v1513_v54  ;;  %v1511_v59 = vmul.f32 0.2, %v946_v55  ;;  %vm1447_vm8 = vcmp.gt.f32.partialorder %v1202_v56, 0.0  ;;  %v1575_v60 = vmul.f32 0.2, %v1202_v56 }
 0x11c   : > { %v1638_v62 = vsel %vm1382_vm3, %v943_v46, %v1510_v49  ;;  %v2904_v63 = vpack.c.bf16 %v1641_v58, %v1640_v53  ;;  %v1705_v0 = vsel %vm1449_vm6, %v3383_v52, %v1577_v57  ;;  %v1702_v1 = vsel %vm1446_vm5, %v1199_v47, %v1574_v50 }
 0x11d   : > { %v3064_v2 = vpack.c.bf16 %v1705_v0, %v1704_v61  ;;  %v1639_v3 = vsel %vm1383_vm7, %v946_v55, %v1511_v59  ;;  %v1703_v4 = vsel %vm1447_vm8, %v1202_v56, %v1575_v60  ;;  %v3322_v5 = vpop.f32.mrb[28].mxu0 }
 0x11e   : > { %v3386_v6 = vpop.f32.mrb[28].mxu1  ;;  %3168 = vst [vmem:[%s3684_s24 + $0x68] sm:$0xff] %v2904_v63   ;;  %v2899_v7 = vpack.c.bf16 %v1639_v3, %v1638_v62  ;;  %v3059_v8 = vpack.c.bf16 %v1703_v4, %v1702_v1  ;;  %vm1388_vm9 = vcmp.gt.f32.partialorder %v3322_v5, 0.0  ;;  %v1516_v9 = vmul.f32 0.2, %v3322_v5  ;;  %v959_v10 = vpop.f32.mrb[29].mxu0 }
 0x11f   : > { %v1215_v11 = vpop.f32.mrb[29].mxu1  ;;  %3200 = vst [vmem:[%s3684_s24 + $0x168] sm:$0xff] %v3064_v2   ;;  %vm1452_vm10 = vcmp.gt.f32.partialorder %v3386_v6, 0.0  ;;  %v1580_v12 = vmul.f32 0.2, %v3386_v6  ;;  %v3323_v15 = vpop.f32.mrb[30].mxu0 }
 0x120   : > { %3167 = vst [vmem:[%s3684_s24 + $0x60] sm:$0xff] %v2899_v7   ;;  %3199 = vst [vmem:[%s3684_s24 + $0x160] sm:$0xff] %v3059_v8   ;;  %v1514_v13 = vmul.f32 0.2, %v959_v10  ;;  %v1578_v14 = vmul.f32 0.2, %v1215_v11  ;;  %v1644_v17 = vsel %vm1388_vm9, %v3322_v5, %v1516_v9 }
 0x121   : > { %v3387_v16 = vpop.f32.mrb[30].mxu1  ;;  %vm1386_vm11 = vcmp.gt.f32.partialorder %v959_v10, 0.0  ;;  %vm1389_vm12 = vcmp.gt.f32.partialorder %v3323_v15, 0.0  ;;  %v1517_v18 = vmul.f32 0.2, %v3323_v15  ;;  %v962_v19 = vpop.f32.mrb[31].mxu0  ;;  %v1708_v25 = vsel %vm1452_vm10, %v3386_v6, %v1580_v12 }
 0x122   : > { %v1218_v20 = vpop.f32.mrb[31].mxu1  ;;  %vm1450_vm13 = vcmp.gt.f32.partialorder %v1215_v11, 0.0  ;;  %vm1453_vm14 = vcmp.gt.f32.partialorder %v3387_v16, 0.0  ;;  %v1581_v21 = vmul.f32 0.2, %v3387_v16  ;;  %vm1387_vm15 = vcmp.gt.f32.partialorder %v962_v19, 0.0 }
 0x123   : > { %v1645_v22 = vsel %vm1389_vm12, %v3323_v15, %v1517_v18  ;;  %v1515_v23 = vmul.f32 0.2, %v962_v19  ;;  %vm1451_vm0 = vcmp.gt.f32.partialorder %v1218_v20, 0.0  ;;  %v1579_v24 = vmul.f32 0.2, %v1218_v20 }
 0x124   : > { %v1642_v26 = vsel %vm1386_vm11, %v959_v10, %v1514_v13  ;;  %v2914_v27 = vpack.c.bf16 %v1645_v22, %v1644_v17  ;;  %v1709_v28 = vsel %vm1453_vm14, %v3387_v16, %v1581_v21  ;;  %v1706_v29 = vsel %vm1450_vm13, %v1215_v11, %v1578_v14 }
 0x125   : > { %v3074_v30 = vpack.c.bf16 %v1709_v28, %v1708_v25  ;;  %v1643_v31 = vsel %vm1387_vm15, %v962_v19, %v1515_v23  ;;  %v1707_v32 = vsel %vm1451_vm0, %v1218_v20, %v1579_v24  ;;  %v3326_v33 = vpop.f32.mrb[32].mxu0 }
 0x126   : > { %v3390_v34 = vpop.f32.mrb[32].mxu1  ;;  %3170 = vst [vmem:[%s3684_s24 + $0x78] sm:$0xff] %v2914_v27   ;;  %v2909_v35 = vpack.c.bf16 %v1643_v31, %v1642_v26  ;;  %v3069_v36 = vpack.c.bf16 %v1707_v32, %v1706_v29  ;;  %vm1392_vm1 = vcmp.gt.f32.partialorder %v3326_v33, 0.0  ;;  %v1520_v37 = vmul.f32 0.2, %v3326_v33  ;;  %v975_v38 = vpop.f32.mrb[33].mxu0 }
 0x127   : > { %v1231_v39 = vpop.f32.mrb[33].mxu1  ;;  %3202 = vst [vmem:[%s3684_s24 + $0x178] sm:$0xff] %v3074_v30   ;;  %vm1456_vm2 = vcmp.gt.f32.partialorder %v3390_v34, 0.0  ;;  %v1584_v40 = vmul.f32 0.2, %v3390_v34  ;;  %v3327_v43 = vpop.f32.mrb[34].mxu0 }
 0x128   : > { %3169 = vst [vmem:[%s3684_s24 + $0x70] sm:$0xff] %v2909_v35   ;;  %3201 = vst [vmem:[%s3684_s24 + $0x170] sm:$0xff] %v3069_v36   ;;  %v1518_v41 = vmul.f32 0.2, %v975_v38  ;;  %v1582_v42 = vmul.f32 0.2, %v1231_v39  ;;  %v1648_v45 = vsel %vm1392_vm1, %v3326_v33, %v1520_v37 }
 0x129   : > { %v3391_v44 = vpop.f32.mrb[34].mxu1  ;;  %vm1390_vm3 = vcmp.gt.f32.partialorder %v975_v38, 0.0  ;;  %vm1393_vm4 = vcmp.gt.f32.partialorder %v3327_v43, 0.0  ;;  %v1521_v46 = vmul.f32 0.2, %v3327_v43  ;;  %v978_v47 = vpop.f32.mrb[35].mxu0  ;;  %v1712_v53 = vsel %vm1456_vm2, %v3390_v34, %v1584_v40 }
 0x12a   : > { %v1234_v48 = vpop.f32.mrb[35].mxu1  ;;  %vm1454_vm5 = vcmp.gt.f32.partialorder %v1231_v39, 0.0  ;;  %vm1457_vm6 = vcmp.gt.f32.partialorder %v3391_v44, 0.0  ;;  %v1585_v49 = vmul.f32 0.2, %v3391_v44  ;;  %vm1391_vm7 = vcmp.gt.f32.partialorder %v978_v47, 0.0 }
 0x12b   : > { %v1649_v50 = vsel %vm1393_vm4, %v3327_v43, %v1521_v46  ;;  %v1519_v51 = vmul.f32 0.2, %v978_v47  ;;  %vm1455_vm8 = vcmp.gt.f32.partialorder %v1234_v48, 0.0  ;;  %v1583_v52 = vmul.f32 0.2, %v1234_v48 }
 0x12c   : > { %v1646_v54 = vsel %vm1390_vm3, %v975_v38, %v1518_v41  ;;  %v2924_v55 = vpack.c.bf16 %v1649_v50, %v1648_v45  ;;  %v1713_v56 = vsel %vm1457_vm6, %v3391_v44, %v1585_v49  ;;  %v1710_v57 = vsel %vm1454_vm5, %v1231_v39, %v1582_v42 }
 0x12d   : > { %v3084_v58 = vpack.c.bf16 %v1713_v56, %v1712_v53  ;;  %v1647_v59 = vsel %vm1391_vm7, %v978_v47, %v1519_v51  ;;  %v1711_v60 = vsel %vm1455_vm8, %v1234_v48, %v1583_v52  ;;  %v3330_v61 = vpop.f32.mrb[36].mxu0 }
 0x12e   : > { %v3394_v62 = vpop.f32.mrb[36].mxu1  ;;  %3172 = vst [vmem:[%s3684_s24 + $0x88] sm:$0xff] %v2924_v55   ;;  %v2919_v63 = vpack.c.bf16 %v1647_v59, %v1646_v54  ;;  %v3079_v0 = vpack.c.bf16 %v1711_v60, %v1710_v57  ;;  %vm1396_vm9 = vcmp.gt.f32.partialorder %v3330_v61, 0.0  ;;  %v1524_v1 = vmul.f32 0.2, %v3330_v61  ;;  %v991_v2 = vpop.f32.mrb[37].mxu0 }
 0x12f   : > { %v1247_v3 = vpop.f32.mrb[37].mxu1  ;;  %3204 = vst [vmem:[%s3684_s24 + $0x188] sm:$0xff] %v3084_v58   ;;  %vm1460_vm10 = vcmp.gt.f32.partialorder %v3394_v62, 0.0  ;;  %v1588_v4 = vmul.f32 0.2, %v3394_v62  ;;  %v3331_v7 = vpop.f32.mrb[38].mxu0 }
 0x130   : > { %3171 = vst [vmem:[%s3684_s24 + $0x80] sm:$0xff] %v2919_v63   ;;  %3203 = vst [vmem:[%s3684_s24 + $0x180] sm:$0xff] %v3079_v0   ;;  %v1522_v5 = vmul.f32 0.2, %v991_v2  ;;  %v1586_v6 = vmul.f32 0.2, %v1247_v3  ;;  %v1652_v9 = vsel %vm1396_vm9, %v3330_v61, %v1524_v1 }
 0x131   : > { %v3395_v8 = vpop.f32.mrb[38].mxu1  ;;  %vm1394_vm11 = vcmp.gt.f32.partialorder %v991_v2, 0.0  ;;  %vm1397_vm12 = vcmp.gt.f32.partialorder %v3331_v7, 0.0  ;;  %v1525_v10 = vmul.f32 0.2, %v3331_v7  ;;  %v994_v11 = vpop.f32.mrb[39].mxu0  ;;  %v1716_v17 = vsel %vm1460_vm10, %v3394_v62, %v1588_v4 }
 0x132   : > { %v1250_v12 = vpop.f32.mrb[39].mxu1  ;;  %vm1458_vm13 = vcmp.gt.f32.partialorder %v1247_v3, 0.0  ;;  %vm1461_vm14 = vcmp.gt.f32.partialorder %v3395_v8, 0.0  ;;  %v1589_v13 = vmul.f32 0.2, %v3395_v8  ;;  %vm1395_vm15 = vcmp.gt.f32.partialorder %v994_v11, 0.0 }
 0x133   : > { %v1653_v14 = vsel %vm1397_vm12, %v3331_v7, %v1525_v10  ;;  %v1523_v15 = vmul.f32 0.2, %v994_v11  ;;  %vm1459_vm0 = vcmp.gt.f32.partialorder %v1250_v12, 0.0  ;;  %v1587_v16 = vmul.f32 0.2, %v1250_v12 }
 0x134   : > { %v1650_v18 = vsel %vm1394_vm11, %v991_v2, %v1522_v5  ;;  %v2934_v19 = vpack.c.bf16 %v1653_v14, %v1652_v9  ;;  %v1717_v20 = vsel %vm1461_vm14, %v3395_v8, %v1589_v13  ;;  %v1714_v21 = vsel %vm1458_vm13, %v1247_v3, %v1586_v6 }
 0x135   : > { %v3094_v22 = vpack.c.bf16 %v1717_v20, %v1716_v17  ;;  %v1651_v23 = vsel %vm1395_vm15, %v994_v11, %v1523_v15  ;;  %v1715_v24 = vsel %vm1459_vm0, %v1250_v12, %v1587_v16  ;;  %v3334_v25 = vpop.f32.mrb[40].mxu0 }
 0x136   : > { %v3398_v26 = vpop.f32.mrb[40].mxu1  ;;  %3174 = vst [vmem:[%s3684_s24 + $0x98] sm:$0xff] %v2934_v19   ;;  %v2929_v27 = vpack.c.bf16 %v1651_v23, %v1650_v18  ;;  %v3089_v28 = vpack.c.bf16 %v1715_v24, %v1714_v21  ;;  %vm1400_vm1 = vcmp.gt.f32.partialorder %v3334_v25, 0.0  ;;  %v1528_v29 = vmul.f32 0.2, %v3334_v25  ;;  %v1007_v30 = vpop.f32.mrb[41].mxu0 }
 0x137   : > { %v1263_v31 = vpop.f32.mrb[41].mxu1  ;;  %3206 = vst [vmem:[%s3684_s24 + $0x198] sm:$0xff] %v3094_v22   ;;  %vm1464_vm2 = vcmp.gt.f32.partialorder %v3398_v26, 0.0  ;;  %v1592_v32 = vmul.f32 0.2, %v3398_v26  ;;  %v3335_v35 = vpop.f32.mrb[42].mxu0 }
 0x138   : > { %3173 = vst [vmem:[%s3684_s24 + $0x90] sm:$0xff] %v2929_v27   ;;  %3205 = vst [vmem:[%s3684_s24 + $0x190] sm:$0xff] %v3089_v28   ;;  %v1526_v33 = vmul.f32 0.2, %v1007_v30  ;;  %v1590_v34 = vmul.f32 0.2, %v1263_v31  ;;  %v1656_v37 = vsel %vm1400_vm1, %v3334_v25, %v1528_v29 }
 0x139   : > { %v3399_v36 = vpop.f32.mrb[42].mxu1  ;;  %vm1398_vm3 = vcmp.gt.f32.partialorder %v1007_v30, 0.0  ;;  %vm1401_vm4 = vcmp.gt.f32.partialorder %v3335_v35, 0.0  ;;  %v1529_v38 = vmul.f32 0.2, %v3335_v35  ;;  %v1010_v39 = vpop.f32.mrb[43].mxu0  ;;  %v1720_v45 = vsel %vm1464_vm2, %v3398_v26, %v1592_v32 }
 0x13a   : > { %v1266_v40 = vpop.f32.mrb[43].mxu1  ;;  %vm1462_vm5 = vcmp.gt.f32.partialorder %v1263_v31, 0.0  ;;  %vm1465_vm6 = vcmp.gt.f32.partialorder %v3399_v36, 0.0  ;;  %v1593_v41 = vmul.f32 0.2, %v3399_v36  ;;  %vm1399_vm7 = vcmp.gt.f32.partialorder %v1010_v39, 0.0 }
 0x13b   : > { %v1657_v42 = vsel %vm1401_vm4, %v3335_v35, %v1529_v38  ;;  %v1527_v43 = vmul.f32 0.2, %v1010_v39  ;;  %vm1463_vm8 = vcmp.gt.f32.partialorder %v1266_v40, 0.0  ;;  %v1591_v44 = vmul.f32 0.2, %v1266_v40 }
 0x13c   : > { %v1654_v46 = vsel %vm1398_vm3, %v1007_v30, %v1526_v33  ;;  %v2944_v47 = vpack.c.bf16 %v1657_v42, %v1656_v37  ;;  %v1721_v48 = vsel %vm1465_vm6, %v3399_v36, %v1593_v41  ;;  %v1718_v49 = vsel %vm1462_vm5, %v1263_v31, %v1590_v34 }
 0x13d   : > { %v3104_v50 = vpack.c.bf16 %v1721_v48, %v1720_v45  ;;  %v1655_v51 = vsel %vm1399_vm7, %v1010_v39, %v1527_v43  ;;  %v1719_v52 = vsel %vm1463_vm8, %v1266_v40, %v1591_v44  ;;  %v3338_v53 = vpop.f32.mrb[44].mxu0 }
 0x13e   : > { %v3402_v54 = vpop.f32.mrb[44].mxu1  ;;  %3176 = vst [vmem:[%s3684_s24 + $0xa8] sm:$0xff] %v2944_v47   ;;  %v2939_v55 = vpack.c.bf16 %v1655_v51, %v1654_v46  ;;  %v3099_v56 = vpack.c.bf16 %v1719_v52, %v1718_v49  ;;  %vm1404_vm9 = vcmp.gt.f32.partialorder %v3338_v53, 0.0  ;;  %v1532_v57 = vmul.f32 0.2, %v3338_v53  ;;  %v1023_v58 = vpop.f32.mrb[45].mxu0 }
 0x13f   : > { %v1279_v59 = vpop.f32.mrb[45].mxu1  ;;  %3208 = vst [vmem:[%s3684_s24 + $0x1a8] sm:$0xff] %v3104_v50   ;;  %vm1468_vm10 = vcmp.gt.f32.partialorder %v3402_v54, 0.0  ;;  %v1596_v60 = vmul.f32 0.2, %v3402_v54  ;;  %v3339_v63 = vpop.f32.mrb[46].mxu0 }
 0x140   : > { %3175 = vst [vmem:[%s3684_s24 + $0xa0] sm:$0xff] %v2939_v55   ;;  %3207 = vst [vmem:[%s3684_s24 + $0x1a0] sm:$0xff] %v3099_v56   ;;  %v1530_v61 = vmul.f32 0.2, %v1023_v58  ;;  %v1594_v62 = vmul.f32 0.2, %v1279_v59  ;;  %v1660_v1 = vsel %vm1404_vm9, %v3338_v53, %v1532_v57 }
 0x141   : > { %v3403_v0 = vpop.f32.mrb[46].mxu1  ;;  %vm1402_vm11 = vcmp.gt.f32.partialorder %v1023_v58, 0.0  ;;  %vm1405_vm12 = vcmp.gt.f32.partialorder %v3339_v63, 0.0  ;;  %v1533_v2 = vmul.f32 0.2, %v3339_v63  ;;  %v1026_v3 = vpop.f32.mrb[47].mxu0  ;;  %v1724_v9 = vsel %vm1468_vm10, %v3402_v54, %v1596_v60 }
 0x142   : > { %v1282_v4 = vpop.f32.mrb[47].mxu1  ;;  %vm1466_vm13 = vcmp.gt.f32.partialorder %v1279_v59, 0.0  ;;  %vm1469_vm14 = vcmp.gt.f32.partialorder %v3403_v0, 0.0  ;;  %v1597_v5 = vmul.f32 0.2, %v3403_v0  ;;  %vm1403_vm15 = vcmp.gt.f32.partialorder %v1026_v3, 0.0 }
 0x143   : > { %v1661_v6 = vsel %vm1405_vm12, %v3339_v63, %v1533_v2  ;;  %v1531_v7 = vmul.f32 0.2, %v1026_v3  ;;  %vm1467_vm0 = vcmp.gt.f32.partialorder %v1282_v4, 0.0  ;;  %v1595_v8 = vmul.f32 0.2, %v1282_v4 }
 0x144   : > { %v1658_v10 = vsel %vm1402_vm11, %v1023_v58, %v1530_v61  ;;  %v2954_v11 = vpack.c.bf16 %v1661_v6, %v1660_v1  ;;  %v1725_v12 = vsel %vm1469_vm14, %v3403_v0, %v1597_v5  ;;  %v1722_v13 = vsel %vm1466_vm13, %v1279_v59, %v1594_v62 }
 0x145   : > { %v3114_v14 = vpack.c.bf16 %v1725_v12, %v1724_v9  ;;  %v1659_v15 = vsel %vm1403_vm15, %v1026_v3, %v1531_v7  ;;  %v1723_v16 = vsel %vm1467_vm0, %v1282_v4, %v1595_v8  ;;  %v3342_v17 = vpop.f32.mrb[48].mxu0 }
 0x146   : > { %v3406_v18 = vpop.f32.mrb[48].mxu1  ;;  %3178 = vst [vmem:[%s3684_s24 + $0xb8] sm:$0xff] %v2954_v11   ;;  %v2949_v19 = vpack.c.bf16 %v1659_v15, %v1658_v10  ;;  %v3109_v20 = vpack.c.bf16 %v1723_v16, %v1722_v13  ;;  %vm1408_vm1 = vcmp.gt.f32.partialorder %v3342_v17, 0.0  ;;  %v1536_v21 = vmul.f32 0.2, %v3342_v17  ;;  %v1039_v22 = vpop.f32.mrb[49].mxu0 }
 0x147   : > { %v1295_v23 = vpop.f32.mrb[49].mxu1  ;;  %3210 = vst [vmem:[%s3684_s24 + $0x1b8] sm:$0xff] %v3114_v14   ;;  %vm1472_vm2 = vcmp.gt.f32.partialorder %v3406_v18, 0.0  ;;  %v1600_v24 = vmul.f32 0.2, %v3406_v18  ;;  %v3343_v27 = vpop.f32.mrb[50].mxu0 }
 0x148   : > { %3177 = vst [vmem:[%s3684_s24 + $0xb0] sm:$0xff] %v2949_v19   ;;  %3209 = vst [vmem:[%s3684_s24 + $0x1b0] sm:$0xff] %v3109_v20   ;;  %v1534_v25 = vmul.f32 0.2, %v1039_v22  ;;  %v1598_v26 = vmul.f32 0.2, %v1295_v23  ;;  %v1664_v29 = vsel %vm1408_vm1, %v3342_v17, %v1536_v21 }
 0x149   : > { %v3407_v28 = vpop.f32.mrb[50].mxu1  ;;  %vm1406_vm3 = vcmp.gt.f32.partialorder %v1039_v22, 0.0  ;;  %vm1409_vm4 = vcmp.gt.f32.partialorder %v3343_v27, 0.0  ;;  %v1537_v30 = vmul.f32 0.2, %v3343_v27  ;;  %v1042_v31 = vpop.f32.mrb[51].mxu0  ;;  %v1728_v37 = vsel %vm1472_vm2, %v3406_v18, %v1600_v24 }
 0x14a   : > { %v1298_v32 = vpop.f32.mrb[51].mxu1  ;;  %vm1470_vm5 = vcmp.gt.f32.partialorder %v1295_v23, 0.0  ;;  %vm1473_vm6 = vcmp.gt.f32.partialorder %v3407_v28, 0.0  ;;  %v1601_v33 = vmul.f32 0.2, %v3407_v28  ;;  %vm1407_vm7 = vcmp.gt.f32.partialorder %v1042_v31, 0.0 }
 0x14b   : > { %v1665_v34 = vsel %vm1409_vm4, %v3343_v27, %v1537_v30  ;;  %v1535_v35 = vmul.f32 0.2, %v1042_v31  ;;  %vm1471_vm8 = vcmp.gt.f32.partialorder %v1298_v32, 0.0  ;;  %v1599_v36 = vmul.f32 0.2, %v1298_v32 }
 0x14c   : > { %v1662_v38 = vsel %vm1406_vm3, %v1039_v22, %v1534_v25  ;;  %v2964_v39 = vpack.c.bf16 %v1665_v34, %v1664_v29  ;;  %v1729_v40 = vsel %vm1473_vm6, %v3407_v28, %v1601_v33  ;;  %v1726_v41 = vsel %vm1470_vm5, %v1295_v23, %v1598_v26 }
 0x14d   : > { %v3124_v42 = vpack.c.bf16 %v1729_v40, %v1728_v37  ;;  %v1663_v43 = vsel %vm1407_vm7, %v1042_v31, %v1535_v35  ;;  %v1727_v44 = vsel %vm1471_vm8, %v1298_v32, %v1599_v36  ;;  %v3346_v45 = vpop.f32.mrb[52].mxu0 }
 0x14e   : > { %v3410_v46 = vpop.f32.mrb[52].mxu1  ;;  %3180 = vst [vmem:[%s3684_s24 + $0xc8] sm:$0xff] %v2964_v39   ;;  %v2959_v47 = vpack.c.bf16 %v1663_v43, %v1662_v38  ;;  %v3119_v48 = vpack.c.bf16 %v1727_v44, %v1726_v41  ;;  %vm1412_vm9 = vcmp.gt.f32.partialorder %v3346_v45, 0.0  ;;  %v1540_v49 = vmul.f32 0.2, %v3346_v45  ;;  %v1055_v50 = vpop.f32.mrb[53].mxu0 }
 0x14f   : > { %v1311_v51 = vpop.f32.mrb[53].mxu1  ;;  %3212 = vst [vmem:[%s3684_s24 + $0x1c8] sm:$0xff] %v3124_v42   ;;  %vm1476_vm10 = vcmp.gt.f32.partialorder %v3410_v46, 0.0  ;;  %v1604_v52 = vmul.f32 0.2, %v3410_v46  ;;  %v3347_v55 = vpop.f32.mrb[54].mxu0 }
 0x150   : > { %3179 = vst [vmem:[%s3684_s24 + $0xc0] sm:$0xff] %v2959_v47   ;;  %3211 = vst [vmem:[%s3684_s24 + $0x1c0] sm:$0xff] %v3119_v48   ;;  %v1538_v53 = vmul.f32 0.2, %v1055_v50  ;;  %v1602_v54 = vmul.f32 0.2, %v1311_v51  ;;  %v1668_v57 = vsel %vm1412_vm9, %v3346_v45, %v1540_v49 }
 0x151   : > { %v3411_v56 = vpop.f32.mrb[54].mxu1  ;;  %vm1410_vm11 = vcmp.gt.f32.partialorder %v1055_v50, 0.0  ;;  %vm1413_vm12 = vcmp.gt.f32.partialorder %v3347_v55, 0.0  ;;  %v1541_v58 = vmul.f32 0.2, %v3347_v55  ;;  %v1058_v59 = vpop.f32.mrb[55].mxu0  ;;  %v1732_v1 = vsel %vm1476_vm10, %v3410_v46, %v1604_v52 }
 0x152   : > { %v1314_v60 = vpop.f32.mrb[55].mxu1  ;;  %vm1474_vm13 = vcmp.gt.f32.partialorder %v1311_v51, 0.0  ;;  %vm1477_vm14 = vcmp.gt.f32.partialorder %v3411_v56, 0.0  ;;  %v1605_v61 = vmul.f32 0.2, %v3411_v56  ;;  %vm1411_vm15 = vcmp.gt.f32.partialorder %v1058_v59, 0.0 }
 0x153   : > { %v1669_v62 = vsel %vm1413_vm12, %v3347_v55, %v1541_v58  ;;  %v1539_v63 = vmul.f32 0.2, %v1058_v59  ;;  %vm1475_vm0 = vcmp.gt.f32.partialorder %v1314_v60, 0.0  ;;  %v1603_v0 = vmul.f32 0.2, %v1314_v60 }
 0x154   : > { %v1666_v2 = vsel %vm1410_vm11, %v1055_v50, %v1538_v53  ;;  %v2974_v3 = vpack.c.bf16 %v1669_v62, %v1668_v57  ;;  %v1733_v4 = vsel %vm1477_vm14, %v3411_v56, %v1605_v61  ;;  %v1730_v5 = vsel %vm1474_vm13, %v1311_v51, %v1602_v54 }
 0x155   : > { %v3134_v6 = vpack.c.bf16 %v1733_v4, %v1732_v1  ;;  %v1667_v7 = vsel %vm1411_vm15, %v1058_v59, %v1539_v63  ;;  %v1731_v8 = vsel %vm1475_vm0, %v1314_v60, %v1603_v0  ;;  %v3350_v9 = vpop.f32.mrb[56].mxu0 }
 0x156   : > { %v3414_v10 = vpop.f32.mrb[56].mxu1  ;;  %3182 = vst [vmem:[%s3684_s24 + $0xd8] sm:$0xff] %v2974_v3   ;;  %v2969_v11 = vpack.c.bf16 %v1667_v7, %v1666_v2  ;;  %v3129_v12 = vpack.c.bf16 %v1731_v8, %v1730_v5  ;;  %vm1416_vm1 = vcmp.gt.f32.partialorder %v3350_v9, 0.0  ;;  %v1544_v13 = vmul.f32 0.2, %v3350_v9  ;;  %v1071_v14 = vpop.f32.mrb[57].mxu0 }
 0x157   : > { %v1327_v15 = vpop.f32.mrb[57].mxu1  ;;  %3214 = vst [vmem:[%s3684_s24 + $0x1d8] sm:$0xff] %v3134_v6   ;;  %vm1480_vm2 = vcmp.gt.f32.partialorder %v3414_v10, 0.0  ;;  %v1608_v16 = vmul.f32 0.2, %v3414_v10  ;;  %v3351_v19 = vpop.f32.mrb[58].mxu0 }
 0x158   : > { %3181 = vst [vmem:[%s3684_s24 + $0xd0] sm:$0xff] %v2969_v11   ;;  %3213 = vst [vmem:[%s3684_s24 + $0x1d0] sm:$0xff] %v3129_v12   ;;  %v1542_v17 = vmul.f32 0.2, %v1071_v14  ;;  %v1606_v18 = vmul.f32 0.2, %v1327_v15  ;;  %v1672_v21 = vsel %vm1416_vm1, %v3350_v9, %v1544_v13 }
 0x159   : > { %v3415_v20 = vpop.f32.mrb[58].mxu1  ;;  %vm1414_vm3 = vcmp.gt.f32.partialorder %v1071_v14, 0.0  ;;  %vm1417_vm4 = vcmp.gt.f32.partialorder %v3351_v19, 0.0  ;;  %v1545_v22 = vmul.f32 0.2, %v3351_v19  ;;  %v1074_v23 = vpop.f32.mrb[59].mxu0  ;;  %v1736_v29 = vsel %vm1480_vm2, %v3414_v10, %v1608_v16 }
 0x15a   : > { %v1330_v24 = vpop.f32.mrb[59].mxu1  ;;  %vm1478_vm5 = vcmp.gt.f32.partialorder %v1327_v15, 0.0  ;;  %vm1481_vm6 = vcmp.gt.f32.partialorder %v3415_v20, 0.0  ;;  %v1609_v25 = vmul.f32 0.2, %v3415_v20  ;;  %vm1415_vm7 = vcmp.gt.f32.partialorder %v1074_v23, 0.0 }
 0x15b   : > { %v1673_v26 = vsel %vm1417_vm4, %v3351_v19, %v1545_v22  ;;  %v1543_v27 = vmul.f32 0.2, %v1074_v23  ;;  %vm1479_vm8 = vcmp.gt.f32.partialorder %v1330_v24, 0.0  ;;  %v1607_v28 = vmul.f32 0.2, %v1330_v24 }
 0x15c   : > { %v1670_v30 = vsel %vm1414_vm3, %v1071_v14, %v1542_v17  ;;  %v2984_v31 = vpack.c.bf16 %v1673_v26, %v1672_v21  ;;  %v1737_v32 = vsel %vm1481_vm6, %v3415_v20, %v1609_v25  ;;  %v1734_v33 = vsel %vm1478_vm5, %v1327_v15, %v1606_v18 }
 0x15d   : > { %v3144_v34 = vpack.c.bf16 %v1737_v32, %v1736_v29  ;;  %v1671_v35 = vsel %vm1415_vm7, %v1074_v23, %v1543_v27  ;;  %v1735_v36 = vsel %vm1479_vm8, %v1330_v24, %v1607_v28  ;;  %v3354_v37 = vpop.f32.mrb[60].mxu0 }
 0x15e   : > { %v3418_v38 = vpop.f32.mrb[60].mxu1  ;;  %3184 = vst [vmem:[%s3684_s24 + $0xe8] sm:$0xff] %v2984_v31   ;;  %v2979_v39 = vpack.c.bf16 %v1671_v35, %v1670_v30  ;;  %v3139_v40 = vpack.c.bf16 %v1735_v36, %v1734_v33  ;;  %vm1420_vm9 = vcmp.gt.f32.partialorder %v3354_v37, 0.0  ;;  %v1548_v41 = vmul.f32 0.2, %v3354_v37  ;;  %v1087_v42 = vpop.f32.mrb[61].mxu0 }
 0x15f   : > { %v1343_v43 = vpop.f32.mrb[61].mxu1  ;;  %3216 = vst [vmem:[%s3684_s24 + $0x1e8] sm:$0xff] %v3144_v34   ;;  %vm1484_vm10 = vcmp.gt.f32.partialorder %v3418_v38, 0.0  ;;  %v1612_v44 = vmul.f32 0.2, %v3418_v38  ;;  %v3355_v47 = vpop.f32.mrb[62].mxu0 }
 0x160   : > { %3183 = vst [vmem:[%s3684_s24 + $0xe0] sm:$0xff] %v2979_v39   ;;  %3215 = vst [vmem:[%s3684_s24 + $0x1e0] sm:$0xff] %v3139_v40   ;;  %v1546_v45 = vmul.f32 0.2, %v1087_v42  ;;  %v1610_v46 = vmul.f32 0.2, %v1343_v43  ;;  %v1676_v49 = vsel %vm1420_vm9, %v3354_v37, %v1548_v41 }
 0x161   : > { %v3419_v48 = vpop.f32.mrb[62].mxu1  ;;  %vm1418_vm11 = vcmp.gt.f32.partialorder %v1087_v42, 0.0  ;;  %vm1421_vm12 = vcmp.gt.f32.partialorder %v3355_v47, 0.0  ;;  %v1549_v50 = vmul.f32 0.2, %v3355_v47  ;;  %v1090_v51 = vpop.f32.mrb[63].mxu0  ;;  %v1740_v57 = vsel %vm1484_vm10, %v3418_v38, %v1612_v44 }
 0x162   : > { %v1346_v52 = vpop.f32.mrb[63].mxu1  ;;  %vm1482_vm13 = vcmp.gt.f32.partialorder %v1343_v43, 0.0  ;;  %vm1485_vm14 = vcmp.gt.f32.partialorder %v3419_v48, 0.0  ;;  %v1613_v53 = vmul.f32 0.2, %v3419_v48  ;;  %vm1419_vm15 = vcmp.gt.f32.partialorder %v1090_v51, 0.0 }
 0x163   : > { %v1677_v54 = vsel %vm1421_vm12, %v3355_v47, %v1549_v50  ;;  %v1547_v55 = vmul.f32 0.2, %v1090_v51  ;;  %vm1483_vm0 = vcmp.gt.f32.partialorder %v1346_v52, 0.0  ;;  %v1611_v56 = vmul.f32 0.2, %v1346_v52 }
 0x164   : > { %v1674_v58 = vsel %vm1418_vm11, %v1087_v42, %v1546_v45  ;;  %v2994_v59 = vpack.c.bf16 %v1677_v54, %v1676_v49  ;;  %v1741_v60 = vsel %vm1485_vm14, %v3419_v48, %v1613_v53  ;;  %v1738_v61 = vsel %vm1482_vm13, %v1343_v43, %v1610_v46 }
 0x165   : > { %v3154_v62 = vpack.c.bf16 %v1741_v60, %v1740_v57  ;;  %v1675_v63 = vsel %vm1419_vm15, %v1090_v51, %v1547_v55  ;;  %v1739_v0 = vsel %vm1483_vm0, %v1346_v52, %v1611_v56 }
 0x166   : > { %3186 = vst [vmem:[%s3684_s24 + $0xf8] sm:$0xff] %v2994_v59   ;;  %v2989_v1 = vpack.c.bf16 %v1675_v63, %v1674_v58  ;;  %v3149_v2 = vpack.c.bf16 %v1739_v0, %v1738_v61 }
 0x167   : > { %3218 = vst [vmem:[%s3684_s24 + $0x1f8] sm:$0xff] %v3154_v62  }
 0x168   : > { %3185 = vst [vmem:[%s3684_s24 + $0xf0] sm:$0xff] %v2989_v1   ;;  %3217 = vst [vmem:[%s3684_s24 + $0x1f0] sm:$0xff] %v3149_v2  }
 0x169 PF: > { %s12_s9 = sadd.s32 1, %s3507_s9  }
 0x16a   : > { %p9_p4 = scmp.ge.s32.totalorder %s12_s9, 4  }
 0x16c   :  { %11 = sbr.rel (!%p9_p4) target bundleno = 1 (0x1), region = 58 }

// kernel: discriminator_forward.8
= control target key start
LH: loop header
LB: loop body
LE: loop exit
PB: predicated region body
PF: predicated region fallthrough
CT: control target
= control target key end

     0   :  { %s1293_s15 = smov 0   ;;  %s1472_s0 = inlined_call_operand.vmem [shape: bf16[512,128], index: 0, kind: input, shape index: {}]   ;;  %s1473_s1 = inlined_call_operand.vmem [shape: bf16[128,128], index: 1, kind: input, shape index: {}]   ;;  %s1474_s2 = inlined_call_operand.vmem [shape: bf16[512,128], index: 2, kind: output, shape index: {0}]   ;;  %s1475_s3 = inlined_call_operand.vmem [shape: f32[2,1,128], index: 3, kind: output, shape index: {1}]   ;;  %s1476_s4 = inlined_call_operand.vmem [shape: f32[2,1,128], index: 4, kind: output, shape index: {2}]  }
   0x1 LB: > { %s1299_s16 = sadd.s32 4294967295, %s1266_s15   ;;  %p950_p0 = scmp.ge.s32.totalorder %s1266_s15, 1  ;;  %s1266_s15 = sphi %s1293_s15, %s15_s15  }
   0x2   : > { %p168_p1 = scmp.lt.s32.totalorder %s1266_s15, 3 }
   0x4   : > { %p169_p2 = pnand %p950_p0, %p168_p1 }
   0x5   : > { %v1236_v0 = vld [vmem:[%s1473_s1] sm:$0xff] (!%p169_p2)   ;;  %s951_s19 = sshll.u32 (!%p169_p2), %s1299_s16, 5  ;;  %v1237_v1 = vld [vmem:[%s1473_s1 + $0x8] sm:$0xff] (!%p169_p2)   ;;  %v1238_v2 = vld [vmem:[%s1473_s1 + $0x10] sm:$0xff] (!%p169_p2)   ;;  %p212_p4 = scmp.lt.s32.totalorder (!%p169_p2), %s1299_s16, 1 }
   0x6   : > { %172 = sbr.rel (%p169_p2) target bundleno = 330 (0x14a), region = 28  ;;  %p201_p3 = scmp.lt.s32.totalorder (!%p169_p2), %s951_s19, 63  ;;  %1164 = vmatprep.subr.bf16.mxu0 (!%p169_p2), %v1236_v0  ;;  %1212 = vmatprep.subr.bf16.mxu1 (!%p169_p2), %v1236_v0  ;;  %v1239_v3 = vld [vmem:[%s1473_s1 + $0x18] sm:$0xff] (!%p169_p2)   ;;  %v1240_v5 = vld [vmem:[%s1473_s1 + $0x20] sm:$0xff] (!%p169_p2)   ;;  %v1241_v6 = vld [vmem:[%s1473_s1 + $0x28] sm:$0xff] (!%p169_p2)  }
   0x7   : > { %1165 = vmatpush3.bf16.msra.mxu0 (!%p169_p2), %v1236_v0  ;;  %1220 = vmatpush3.bf16.msra.mxu1 (!%p169_p2), %v1236_v0  ;;  %v1242_v8 = vld [vmem:[%s1473_s1 + $0x30] sm:$0xff] (!%p169_p2)   ;;  %v1243_v9 = vld [vmem:[%s1473_s1 + $0x38] sm:$0xff] (!%p169_p2)  }
   0x8   : > { %1166 = vmatprep.subr.bf16.mxu0 (!%p169_p2), %v1237_v1  ;;  %1213 = vmatprep.subr.bf16.mxu1 (!%p169_p2), %v1237_v1 }
   0xb   : > { %1167 = vmatpush3.bf16.msra.mxu0 (!%p169_p2), %v1237_v1  ;;  %1221 = vmatpush3.bf16.msra.mxu1 (!%p169_p2), %v1237_v1 }
   0xc   : > { %1168 = vmatprep.subr.bf16.mxu0 (!%p169_p2), %v1238_v2  ;;  %1214 = vmatprep.subr.bf16.mxu1 (!%p169_p2), %v1238_v2 }
   0xd   : > { %s1478_s19 = smov (!%p201_p3, %s951_s19), 63  ;;  %s1480_s16 = smov (!%p212_p4, %s1299_s16), 1 }
   0xe   : > { %s952_s24 = sshll.u32 %s1478_s19, 2  ;;  %s214_s19 = scalar_lea.vmem %s1475_s3, %s1480_s16 }
   0xf   : > { %s1321_s27 = scalar_lea.vmem %s1472_s0, %s952_s24  ;;  %1169 = vmatpush3.bf16.msra.mxu0 %v1238_v2  ;;  %1222 = vmatpush3.bf16.msra.mxu1 %v1238_v2  ;;  %s1363_s14 = scalar_lea.vmem %s1474_s2, %s952_s24 }
  0x10   : > { %v1244_v4 = vld [vmem:[%s1321_s27] sm:$0xff]   ;;  %1170 = vmatprep.subr.bf16.mxu0 %v1239_v3  ;;  %1215 = vmatprep.subr.bf16.mxu1 %v1239_v3  ;;  %v1245_v10 = vld [vmem:[%s1321_s27 + $0x8] sm:$0xff]   ;;  %v1246_v12 = vld [vmem:[%s1321_s27 + $0x10] sm:$0xff]   ;;  %s217_s22 = scalar_lea.vmem %s1476_s4, %s1480_s16 }
  0x11   : > { %1180 = vmatprep.mubr.bf16.mxu0 %v1244_v4  ;;  %v1252_v7 = vld [vmem:[%s1321_s27 + $0x40] sm:$0xff]   ;;  %v1253_v11 = vld [vmem:[%s1321_s27 + $0x48] sm:$0xff]   ;;  %v1254_v13 = vld [vmem:[%s1321_s27 + $0x50] sm:$0xff]  }
  0x12   : > { %1196 = vmatprep.mubr.bf16.mxu1 %v1252_v7  ;;  %v1247_v14 = vld [vmem:[%s1321_s27 + $0x18] sm:$0xff]   ;;  %v1248_v16 = vld [vmem:[%s1321_s27 + $0x20] sm:$0xff]   ;;  %v1249_v18 = vld [vmem:[%s1321_s27 + $0x28] sm:$0xff]  }
  0x13   : > { %1171 = vmatpush3.bf16.msra.mxu0 %v1239_v3  ;;  %1223 = vmatpush3.bf16.msra.mxu1 %v1239_v3  ;;  %v1255_v15 = vld [vmem:[%s1321_s27 + $0x58] sm:$0xff]   ;;  %v1256_v17 = vld [vmem:[%s1321_s27 + $0x60] sm:$0xff]   ;;  %v1257_v19 = vld [vmem:[%s1321_s27 + $0x68] sm:$0xff]  }
  0x14   : > { %1172 = vmatprep.subr.bf16.mxu0 %v1240_v5  ;;  %1216 = vmatprep.subr.bf16.mxu1 %v1240_v5  ;;  %v1250_v20 = vld [vmem:[%s1321_s27 + $0x30] sm:$0xff]   ;;  %v1251_v22 = vld [vmem:[%s1321_s27 + $0x38] sm:$0xff]  }
  0x15   : > { %v1258_v21 = vld [vmem:[%s1321_s27 + $0x70] sm:$0xff]   ;;  %v1259_v23 = vld [vmem:[%s1321_s27 + $0x78] sm:$0xff]  }
  0x17   : > { %1173 = vmatpush3.bf16.msra.mxu0 %v1240_v5  ;;  %1224 = vmatpush3.bf16.msra.mxu1 %v1240_v5 }
  0x18   : > { %1174 = vmatprep.subr.bf16.mxu0 %v1241_v6  ;;  %1217 = vmatprep.subr.bf16.mxu1 %v1241_v6 }
  0x1b   : > { %1175 = vmatpush3.bf16.msra.mxu0 %v1241_v6  ;;  %1225 = vmatpush3.bf16.msra.mxu1 %v1241_v6 }
  0x1c   : > { %1176 = vmatprep.subr.bf16.mxu0 %v1242_v8  ;;  %1218 = vmatprep.subr.bf16.mxu1 %v1242_v8 }
  0x1f   : > { %1177 = vmatpush3.bf16.msra.mxu0 %v1242_v8  ;;  %1226 = vmatpush3.bf16.msra.mxu1 %v1242_v8 }
  0x20   : > { %1178 = vmatprep.subr.bf16.mxu0 %v1243_v9  ;;  %1219 = vmatprep.subr.bf16.mxu1 %v1243_v9 }
  0x23   : > { %1179 = vmatpush3.bf16.msra.mxu0 %v1243_v9  ;;  %1227 = vmatpush3.bf16.msra.mxu1 %v1243_v9 }
  0x26   : > { %1181 = vmatmul.mubr.bf16.vlgmr.msra.gmra.mrb[0].mxu0 %v1245_v10  ;;  %1197 = vmatmul.mubr.bf16.vlgmr.msra.gmra.mrb[0].mxu1 %v1253_v11 }
  0x27   : > { %1184 = vmatprep.mubr.bf16.mxu0 %v1246_v12  ;;  %1200 = vmatprep.mubr.bf16.mxu1 %v1254_v13 }
  0x2e   : > { %1185 = vmatmul.mubr.bf16.gmra.mrb[4].mxu0 %v1247_v14  ;;  %1201 = vmatmul.mubr.bf16.gmra.mrb[4].mxu1 %v1255_v15 }
  0x2f   : > { %1188 = vmatprep.mubr.bf16.mxu0 %v1248_v16  ;;  %1204 = vmatprep.mubr.bf16.mxu1 %v1256_v17 }
  0x36   : > { %1189 = vmatmul.mubr.bf16.gmra.mrb[8].mxu0 %v1249_v18  ;;  %1205 = vmatmul.mubr.bf16.gmra.mrb[8].mxu1 %v1257_v19 }
  0x37   : > { %1192 = vmatprep.mubr.bf16.mxu0 %v1250_v20  ;;  %1208 = vmatprep.mubr.bf16.mxu1 %v1258_v21 }
  0x3e   : > { %1193 = vmatmul.mubr.bf16.gmra.mrb[12].mxu0 %v1251_v22  ;;  %1209 = vmatmul.mubr.bf16.gmra.mrb[12].mxu1 %v1259_v23 }
  0xf9   : > { %v1182_v24 = vpop.f32.mrb[0].mxu0  ;;  %v1354_v25 = vpop.f32.mrb[0].mxu1 }
  0xfa   : > { %v445_v26 = vpop.f32.mrb[1].mxu0  ;;  %v1356_v27 = vpop.f32.mrb[1].mxu1  ;;  %v772_v39 = vmul.f32 %v1182_v24, %v1182_v24 }
  0xfb   : > { %v1183_v28 = vpop.f32.mrb[2].mxu0  ;;  %v1365_v29 = vpop.f32.mrb[2].mxu1  ;;  %v770_v30 = vmul.f32 %v445_v26, %v445_v26 }
  0xfc   : > { %v1053_v31 = vpack.c.bf16 %v1183_v28, %v1182_v24  ;;  %v448_v32 = vpop.f32.mrb[3].mxu0  ;;  %v1093_v33 = vpack.c.bf16 %v1365_v29, %v1354_v25  ;;  %v1369_v34 = vpop.f32.mrb[3].mxu1  ;;  %v773_v42 = vmul.f32 %v1183_v28, %v1183_v28 }
  0xfd   : > { %v1048_v35 = vpack.c.bf16 %v448_v32, %v445_v26  ;;  %v732_v36 = vadd.f32 %v448_v32, %v445_v26  ;;  %v771_v37 = vmul.f32 %v448_v32, %v448_v32  ;;  %v1088_v38 = vpack.c.bf16 %v1369_v34, %v1356_v27 }
  0xfe   : > { %1125 = vst [vmem:[%s1363_s14 + $0x8] sm:$0xff] %v1053_v31   ;;  %1133 = vst [vmem:[%s1363_s14 + $0x48] sm:$0xff] %v1093_v33  }
  0xff   : > { %1049 = vst [vmem:[%s1363_s14] sm:$0xff] %v1048_v35   ;;  %v733_v40 = vadd.f32 %v1182_v24, %v732_v36  ;;  %v802_v41 = vadd.f32 %v771_v37, %v770_v30  ;;  %1132 = vst [vmem:[%s1363_s14 + $0x40] sm:$0xff] %v1088_v38  }
 0x101   : > { %v803_v43 = vadd.f32 %v802_v41, %v772_v39  ;;  %v1186_v44 = vpop.f32.mrb[4].mxu0  ;;  %v734_v45 = vadd.f32 %v1183_v28, %v733_v40  ;;  %v1377_v46 = vpop.f32.mrb[4].mxu1 }
 0x102   : > { %v461_v47 = vpop.f32.mrb[5].mxu0  ;;  %v1379_v48 = vpop.f32.mrb[5].mxu1  ;;  %v776_v63 = vmul.f32 %v1186_v44, %v1186_v44 }
 0x103   : > { %v735_v49 = vadd.f32 %v734_v45, %v461_v47  ;;  %v774_v50 = vmul.f32 %v461_v47, %v461_v47  ;;  %v804_v51 = vadd.f32 %v803_v43, %v773_v42  ;;  %v1187_v52 = vpop.f32.mrb[6].mxu0  ;;  %v1381_v53 = vpop.f32.mrb[6].mxu1 }
 0x104   : > { %v1063_v54 = vpack.c.bf16 %v1187_v52, %v1186_v44  ;;  %v464_v55 = vpop.f32.mrb[7].mxu0  ;;  %v1103_v56 = vpack.c.bf16 %v1381_v53, %v1377_v46  ;;  %v1385_v57 = vpop.f32.mrb[7].mxu1  ;;  %v777_v2 = vmul.f32 %v1187_v52, %v1187_v52 }
 0x105   : > { %v805_v58 = vadd.f32 %v804_v51, %v774_v50  ;;  %v1058_v59 = vpack.c.bf16 %v464_v55, %v461_v47  ;;  %v736_v60 = vadd.f32 %v735_v49, %v464_v55  ;;  %v775_v61 = vmul.f32 %v464_v55, %v464_v55 }
 0x106   : > { %1127 = vst [vmem:[%s1363_s14 + $0x18] sm:$0xff] %v1063_v54   ;;  %1135 = vst [vmem:[%s1363_s14 + $0x58] sm:$0xff] %v1103_v56   ;;  %v1098_v62 = vpack.c.bf16 %v1385_v57, %v1379_v48 }
 0x107   : > { %1126 = vst [vmem:[%s1363_s14 + $0x10] sm:$0xff] %v1058_v59   ;;  %v737_v0 = vadd.f32 %v1186_v44, %v736_v60  ;;  %v806_v1 = vadd.f32 %v805_v58, %v775_v61  ;;  %v786_v61 = vmul.f32 %v1356_v27, %v1356_v27 }
 0x108   : > { %1134 = vst [vmem:[%s1363_s14 + $0x50] sm:$0xff] %v1098_v62  }
 0x109   : > { %v807_v3 = vadd.f32 %v806_v1, %v776_v63  ;;  %v1190_v4 = vpop.f32.mrb[8].mxu0  ;;  %v738_v5 = vadd.f32 %v1187_v52, %v737_v0  ;;  %v1393_v6 = vpop.f32.mrb[8].mxu1 }
 0x10a   : > { %v477_v7 = vpop.f32.mrb[9].mxu0  ;;  %v1395_v8 = vpop.f32.mrb[9].mxu1  ;;  %v780_v23 = vmul.f32 %v1190_v4, %v1190_v4 }
 0x10b   : > { %v739_v9 = vadd.f32 %v738_v5, %v477_v7  ;;  %v778_v10 = vmul.f32 %v477_v7, %v477_v7  ;;  %v808_v11 = vadd.f32 %v807_v3, %v777_v2  ;;  %v1191_v12 = vpop.f32.mrb[10].mxu0  ;;  %v1397_v13 = vpop.f32.mrb[10].mxu1  ;;  %v787_v2 = vmul.f32 %v1369_v34, %v1369_v34 }
 0x10c   : > { %v1073_v14 = vpack.c.bf16 %v1191_v12, %v1190_v4  ;;  %v480_v15 = vpop.f32.mrb[11].mxu0  ;;  %v1113_v16 = vpack.c.bf16 %v1397_v13, %v1393_v6  ;;  %v1401_v17 = vpop.f32.mrb[11].mxu1  ;;  %v781_v28 = vmul.f32 %v1191_v12, %v1191_v12  ;;  %v788_v3 = vmul.f32 %v1354_v25, %v1354_v25 }
 0x10d   : > { %v809_v18 = vadd.f32 %v808_v11, %v778_v10  ;;  %v1068_v19 = vpack.c.bf16 %v480_v15, %v477_v7  ;;  %v740_v20 = vadd.f32 %v739_v9, %v480_v15  ;;  %v779_v21 = vmul.f32 %v480_v15, %v480_v15 }
 0x10e   : > { %1129 = vst [vmem:[%s1363_s14 + $0x28] sm:$0xff] %v1073_v14   ;;  %1137 = vst [vmem:[%s1363_s14 + $0x68] sm:$0xff] %v1113_v16   ;;  %v1108_v22 = vpack.c.bf16 %v1401_v17, %v1395_v8  ;;  %v789_v7 = vmul.f32 %v1365_v29, %v1365_v29  ;;  %v791_v15 = vmul.f32 %v1385_v57, %v1385_v57 }
 0x10f   : > { %1128 = vst [vmem:[%s1363_s14 + $0x20] sm:$0xff] %v1068_v19   ;;  %v741_v24 = vadd.f32 %v1190_v4, %v740_v20  ;;  %v810_v26 = vadd.f32 %v809_v18, %v779_v21 }
 0x110   : > { %1136 = vst [vmem:[%s1363_s14 + $0x60] sm:$0xff] %v1108_v22  }
 0x111   : > { %v811_v30 = vadd.f32 %v810_v26, %v780_v23  ;;  %v1194_v31 = vpop.f32.mrb[12].mxu0  ;;  %v742_v32 = vadd.f32 %v1191_v12, %v741_v24  ;;  %v1409_v33 = vpop.f32.mrb[12].mxu1  ;;  %v795_v24 = vmul.f32 %v1401_v17, %v1401_v17 }
 0x112   : > { %v493_v35 = vpop.f32.mrb[13].mxu0  ;;  %v557_v36 = vpop.f32.mrb[13].mxu1  ;;  %v784_v54 = vmul.f32 %v1194_v31, %v1194_v31 }
 0x113   : > { %v743_v37 = vadd.f32 %v742_v32, %v493_v35  ;;  %v782_v38 = vmul.f32 %v493_v35, %v493_v35  ;;  %v812_v39 = vadd.f32 %v811_v30, %v781_v28  ;;  %v1195_v40 = vpop.f32.mrb[14].mxu0  ;;  %v1411_v41 = vpop.f32.mrb[14].mxu1 }
 0x114   : > { %v1083_v42 = vpack.c.bf16 %v1195_v40, %v1194_v31  ;;  %v496_v43 = vpop.f32.mrb[15].mxu0  ;;  %v1123_v44 = vpack.c.bf16 %v1411_v41, %v1409_v33  ;;  %v560_v45 = vpop.f32.mrb[15].mxu1  ;;  %v785_v58 = vmul.f32 %v1195_v40, %v1195_v40 }
 0x115   : > { %v813_v47 = vadd.f32 %v812_v39, %v782_v38  ;;  %v1078_v49 = vpack.c.bf16 %v496_v43, %v493_v35  ;;  %v744_v50 = vadd.f32 %v743_v37, %v496_v43  ;;  %v783_v51 = vmul.f32 %v496_v43, %v496_v43 }
 0x116   : > { %1131 = vst [vmem:[%s1363_s14 + $0x38] sm:$0xff] %v1083_v42   ;;  %1139 = vst [vmem:[%s1363_s14 + $0x78] sm:$0xff] %v1123_v44   ;;  %v1118_v52 = vpack.c.bf16 %v560_v45, %v557_v36  ;;  %v800_v39 = vmul.f32 %v1409_v33, %v1409_v33  ;;  %v801_v42 = vmul.f32 %v1411_v41, %v1411_v41 }
 0x117   : > { %1130 = vst [vmem:[%s1363_s14 + $0x30] sm:$0xff] %v1078_v49   ;;  %v745_v55 = vadd.f32 %v1194_v31, %v744_v50  ;;  %v814_v56 = vadd.f32 %v813_v47, %v783_v51  ;;  %v798_v31 = vmul.f32 %v557_v36, %v557_v36 }
 0x118   : > { %1138 = vst [vmem:[%s1363_s14 + $0x70] sm:$0xff] %v1118_v52  }
 0x119   : > { %v815_v59 = vadd.f32 %v814_v56, %v784_v54  ;;  %v746_v60 = vadd.f32 %v1195_v40, %v745_v55 }
 0x11b   : > { %v747_v62 = vadd.f32 %v746_v60, %v1356_v27  ;;  %v816_v63 = vadd.f32 %v815_v59, %v785_v58  ;;  %v790_v27 = vmul.f32 %v1379_v48, %v1379_v48 }
 0x11d   : > { %v817_v0 = vadd.f32 %v816_v63, %v786_v61  ;;  %v748_v1 = vadd.f32 %v747_v62, %v1369_v34 }
 0x11f   : > { %v749_v4 = vadd.f32 %v1354_v25, %v748_v1  ;;  %v818_v5 = vadd.f32 %v817_v0, %v787_v2  ;;  %v792_v25 = vmul.f32 %v1377_v46, %v1377_v46 }
 0x121   : > { %v819_v9 = vadd.f32 %v818_v5, %v788_v3  ;;  %v750_v10 = vadd.f32 %v1365_v29, %v749_v4  ;;  %v793_v29 = vmul.f32 %v1381_v53, %v1381_v53 }
 0x123   : > { %v751_v11 = vadd.f32 %v750_v10, %v1379_v48  ;;  %v820_v12 = vadd.f32 %v819_v9, %v789_v7  ;;  %v794_v48 = vmul.f32 %v1395_v8, %v1395_v8 }
 0x125   : > { %v821_v14 = vadd.f32 %v820_v12, %v790_v27  ;;  %v752_v34 = vadd.f32 %v751_v11, %v1385_v57 }
 0x127   : > { %v753_v16 = vadd.f32 %v1377_v46, %v752_v34  ;;  %v822_v18 = vadd.f32 %v821_v14, %v791_v15  ;;  %v796_v46 = vmul.f32 %v1393_v6, %v1393_v6 }
 0x129   : > { %v823_v19 = vadd.f32 %v822_v18, %v792_v25  ;;  %v754_v20 = vadd.f32 %v1381_v53, %v753_v16  ;;  %v797_v53 = vmul.f32 %v1397_v13, %v1397_v13 }
 0x12b   : > { %v755_v21 = vadd.f32 %v754_v20, %v1395_v8  ;;  %v824_v22 = vadd.f32 %v823_v19, %v793_v29 }
 0x12d   : > { %v825_v23 = vadd.f32 %v824_v22, %v794_v48  ;;  %v756_v57 = vadd.f32 %v755_v21, %v1401_v17  ;;  %v799_v17 = vmul.f32 %v560_v45, %v560_v45 }
 0x12f   : > { %v757_v26 = vadd.f32 %v1393_v6, %v756_v57  ;;  %v826_v28 = vadd.f32 %v825_v23, %v795_v24 }
 0x131   : > { %v827_v30 = vadd.f32 %v826_v28, %v796_v46  ;;  %v758_v8 = vadd.f32 %v1397_v13, %v757_v26 }
 0x133   : > { %v759_v32 = vadd.f32 %v758_v8, %v557_v36  ;;  %v828_v35 = vadd.f32 %v827_v30, %v797_v53 }
 0x135   : > { %v829_v37 = vadd.f32 %v828_v35, %v798_v31  ;;  %v760_v38 = vadd.f32 %v759_v32, %v560_v45 }
 0x137   : > { %v761_v6 = vadd.f32 %v1409_v33, %v760_v38  ;;  %v830_v40 = vadd.f32 %v829_v37, %v799_v17 }
 0x139   : > { %v762_v43 = vadd.f32 %v1411_v41, %v761_v6  ;;  %v831_v44 = vadd.f32 %v830_v40, %v800_v39 }
 0x13b   : > { %v763_v13 = vrot.slane %v762_v43, 4  ;;  %v832_v47 = vadd.f32 %v831_v44, %v801_v42 }
 0x13d   : > { %v764_v36 = vadd.f32 %v763_v13, %v762_v43  ;;  %v833_v49 = vrot.slane %v832_v47, 4 }
 0x13f   : > { %v765_v50 = vrot.slane %v764_v36, 2  ;;  %v834_v51 = vadd.f32 %v833_v49, %v832_v47 }
 0x141   : > { %v766_v45 = vadd.f32 %v765_v50, %v764_v36  ;;  %v835_v52 = vrot.slane %v834_v51, 2 }
 0x143   : > { %v767_v54 = vrot.slane %v766_v45, 1  ;;  %v836_v55 = vadd.f32 %v835_v52, %v834_v51 }
 0x145   : > { %v768_v33 = vadd.f32 %v767_v54, %v766_v45  ;;  %v837_v56 = vrot.slane %v836_v55, 1 }
 0x147   : > { %769 = vst [vmem:[%s214_s19] sm:$0x1] %v768_v33  ;;  %v838_v41 = vadd.f32 %v837_v56, %v836_v55 }
 0x149   : > { %839 = vst [vmem:[%s217_s22] sm:$0x1] %v838_v41 }
 0x14a PF: > { %s15_s15 = sadd.s32 1, %s1266_s15  }
 0x14b   : > { %p12_p5 = scmp.ge.s32.totalorder %s15_s15, 4  }
 0x14d   :  { %14 = sbr.rel (!%p12_p5) target bundleno = 1 (0x1), region = 82 }

// kernel: discriminator_forward.9
= control target key start
LH: loop header
LB: loop body
LE: loop exit
PB: predicated region body
PF: predicated region fallthrough
CT: control target
= control target key end

     0   :  { %s915_s12 = smov 0   ;;  %s1050_s0 = inlined_call_operand.vmem [shape: bf16[512,128], index: 0, kind: input, shape index: {}]   ;;  %s1051_s1 = inlined_call_operand.vmem [shape: f32[1,128], index: 1, kind: input, shape index: {}]   ;;  %s1052_s2 = inlined_call_operand.vmem [shape: f32[1,128], index: 2, kind: input, shape index: {}]   ;;  %s1053_s3 = inlined_call_operand.vmem [shape: bf16[512,128], index: 3, kind: output, shape index: {}]  }
   0x1 LB: > { %s628_s13 = sadd.s32 4294967295, %s893_s12   ;;  %p632_p0 = scmp.ge.s32.totalorder %s893_s12, 1  ;;  %s893_s12 = sphi %s915_s12, %s13_s12  }
   0x2   : > { %p138_p1 = scmp.lt.s32.totalorder %s893_s12, 3 }
   0x4   : > { %p139_p2 = pnand %p632_p0, %p138_p1 }
   0x5   : > { %s633_s14 = sshll.u32 (!%p139_p2), %s628_s13, 5  ;;  %v936_v0 = vld [vmem:[%s1051_s1] ss:$0 sm:$0xff] (!%p139_p2) }
   0x6   : > { %142 = sbr.rel (%p139_p2) target bundleno = 76 (0x4c), region = 32  ;;  %p163_p3 = scmp.lt.s32.totalorder (!%p139_p2), %s633_s14, 63  ;;  %v945_v9 = vld [vmem:[%s1052_s2] ss:$0 sm:$0xff] (!%p139_p2) }
   0xd   : > { %s1055_s14 = smov (!%p163_p3, %s633_s14), 63 }
   0xe   : > { %s634_s15 = sshll.u32 %s1055_s14, 2 }
   0xf   : > { %s931_s18 = scalar_lea.vmem %s1050_s0, %s634_s15  ;;  %s968_s25 = scalar_lea.vmem %s1053_s3, %s634_s15 }
  0x10   : > { %v706_v1 = vld [vmem:[%s931_s18] sm:$0xff]   ;;  %v849_v2 = vld [vmem:[%s931_s18 + $0x8] sm:$0xff]   ;;  %v850_v3 = vld [vmem:[%s931_s18 + $0x10] sm:$0xff]  }
  0x11   : > { %v707_v4 = vunpack.c.l.bf16 %v706_v1  ;;  %v708_v5 = vunpack.c.h.bf16 %v706_v1  ;;  %v711_v6 = vunpack.c.l.bf16 %v849_v2  ;;  %v712_v7 = vunpack.c.h.bf16 %v849_v2  ;;  %v851_v8 = vld [vmem:[%s931_s18 + $0x18] sm:$0xff]   ;;  %v852_v36 = vld [vmem:[%s931_s18 + $0x20] sm:$0xff]   ;;  %v853_v41 = vld [vmem:[%s931_s18 + $0x28] sm:$0xff]  }
  0x12   : > { %v715_v10 = vunpack.c.l.bf16 %v850_v3  ;;  %v716_v11 = vunpack.c.h.bf16 %v850_v3  ;;  %v719_v12 = vunpack.c.l.bf16 %v851_v8  ;;  %v720_v13 = vunpack.c.h.bf16 %v851_v8  ;;  %v854_v52 = vld [vmem:[%s931_s18 + $0x30] sm:$0xff]   ;;  %v855_v53 = vld [vmem:[%s931_s18 + $0x38] sm:$0xff]  }
  0x13   : > { %v245_v14 = vmul.f32 %v707_v4, %v936_v0  ;;  %v246_v15 = vmul.f32 %v708_v5, %v936_v0  ;;  %v247_v16 = vmul.f32 %v711_v6, %v936_v0  ;;  %v248_v17 = vmul.f32 %v712_v7, %v936_v0 }
  0x14   : > { %v249_v18 = vmul.f32 %v715_v10, %v936_v0  ;;  %v250_v19 = vmul.f32 %v716_v11, %v936_v0  ;;  %v251_v20 = vmul.f32 %v719_v12, %v936_v0  ;;  %v252_v21 = vmul.f32 %v720_v13, %v936_v0 }
  0x15   : > { %v284_v22 = vadd.f32 %v945_v9, %v245_v14  ;;  %v285_v23 = vadd.f32 %v945_v9, %v246_v15  ;;  %v286_v24 = vadd.f32 %v945_v9, %v247_v16  ;;  %v287_v25 = vadd.f32 %v945_v9, %v248_v17 }
  0x16   : > { %v288_v26 = vadd.f32 %v945_v9, %v249_v18  ;;  %v289_v27 = vadd.f32 %v945_v9, %v250_v19  ;;  %v290_v28 = vadd.f32 %v945_v9, %v251_v20  ;;  %v291_v29 = vadd.f32 %v945_v9, %v252_v21  ;;  %v856_v20 = vld [vmem:[%s931_s18 + $0x40] sm:$0xff]  }
  0x17   : > { %vm316_vm0 = vcmp.gt.f32.partialorder %v284_v22, 0.0  ;;  %vm317_vm1 = vcmp.gt.f32.partialorder %v285_v23, 0.0  ;;  %v348_v30 = vmul.f32 0.2, %v284_v22  ;;  %v349_v31 = vmul.f32 0.2, %v285_v23 }
  0x18   : > { %vm318_vm2 = vcmp.gt.f32.partialorder %v286_v24, 0.0  ;;  %vm319_vm3 = vcmp.gt.f32.partialorder %v287_v25, 0.0  ;;  %v350_v32 = vmul.f32 0.2, %v286_v24  ;;  %v351_v33 = vmul.f32 0.2, %v287_v25 }
  0x19   : > { %v380_v34 = vsel %vm316_vm0, %v284_v22, %v348_v30  ;;  %v381_v35 = vsel %vm317_vm1, %v285_v23, %v349_v31  ;;  %vm320_vm4 = vcmp.gt.f32.partialorder %v288_v26, 0.0  ;;  %vm321_vm5 = vcmp.gt.f32.partialorder %v289_v27, 0.0 }
  0x1a   : > { %v772_v37 = vpack.c.bf16 %v381_v35, %v380_v34  ;;  %v382_v38 = vsel %vm318_vm2, %v286_v24, %v350_v32  ;;  %v383_v39 = vsel %vm319_vm3, %v287_v25, %v351_v33  ;;  %v352_v40 = vmul.f32 0.2, %v288_v26  ;;  %v857_v24 = vld [vmem:[%s931_s18 + $0x48] sm:$0xff]  }
  0x1b   : > { %v777_v42 = vpack.c.bf16 %v383_v39, %v382_v38  ;;  %v353_v43 = vmul.f32 0.2, %v289_v27  ;;  %vm322_vm6 = vcmp.gt.f32.partialorder %v290_v28, 0.0  ;;  %vm323_vm7 = vcmp.gt.f32.partialorder %v291_v29, 0.0 }
  0x1c   : > { %773 = vst [vmem:[%s968_s25] sm:$0xff] %v772_v37   ;;  %v384_v44 = vsel %vm320_vm4, %v288_v26, %v352_v40  ;;  %v354_v45 = vmul.f32 0.2, %v290_v28  ;;  %v355_v46 = vmul.f32 0.2, %v291_v29  ;;  %v723_v47 = vunpack.c.l.bf16 %v852_v36 }
  0x1d   : > { %864 = vst [vmem:[%s968_s25 + $0x8] sm:$0xff] %v777_v42   ;;  %v385_v48 = vsel %vm321_vm5, %v289_v27, %v353_v43  ;;  %v724_v49 = vunpack.c.h.bf16 %v852_v36  ;;  %v727_v50 = vunpack.c.l.bf16 %v853_v41  ;;  %v728_v51 = vunpack.c.h.bf16 %v853_v41  ;;  %v858_v36 = vld [vmem:[%s931_s18 + $0x50] sm:$0xff]  }
  0x1e   : > { %v782_v54 = vpack.c.bf16 %v385_v48, %v384_v44  ;;  %v386_v55 = vsel %vm322_vm6, %v290_v28, %v354_v45  ;;  %v387_v56 = vsel %vm323_vm7, %v291_v29, %v355_v46  ;;  %v253_v57 = vmul.f32 %v723_v47, %v936_v0 }
  0x1f   : > { %v787_v58 = vpack.c.bf16 %v387_v56, %v386_v55  ;;  %v254_v59 = vmul.f32 %v724_v49, %v936_v0  ;;  %v255_v60 = vmul.f32 %v727_v50, %v936_v0  ;;  %v256_v61 = vmul.f32 %v728_v51, %v936_v0  ;;  %v859_v55 = vld [vmem:[%s931_s18 + $0x58] sm:$0xff]  }
  0x20   : > { %865 = vst [vmem:[%s968_s25 + $0x10] sm:$0xff] %v782_v54   ;;  %v292_v62 = vadd.f32 %v945_v9, %v253_v57  ;;  %v731_v63 = vunpack.c.l.bf16 %v854_v52  ;;  %v732_v1 = vunpack.c.h.bf16 %v854_v52  ;;  %v735_v2 = vunpack.c.l.bf16 %v855_v53 }
  0x21   : > { %866 = vst [vmem:[%s968_s25 + $0x18] sm:$0xff] %v787_v58   ;;  %v293_v3 = vadd.f32 %v945_v9, %v254_v59  ;;  %v294_v4 = vadd.f32 %v945_v9, %v255_v60  ;;  %v295_v5 = vadd.f32 %v945_v9, %v256_v61  ;;  %v736_v6 = vunpack.c.h.bf16 %v855_v53 }
  0x22   : > { %vm324_vm8 = vcmp.gt.f32.partialorder %v292_v62, 0.0  ;;  %v356_v7 = vmul.f32 0.2, %v292_v62  ;;  %v257_v8 = vmul.f32 %v731_v63, %v936_v0  ;;  %v258_v10 = vmul.f32 %v732_v1, %v936_v0  ;;  %v860_v1 = vld [vmem:[%s931_s18 + $0x60] sm:$0xff]  }
  0x23   : > { %vm325_vm9 = vcmp.gt.f32.partialorder %v293_v3, 0.0  ;;  %v357_v11 = vmul.f32 0.2, %v293_v3  ;;  %vm326_vm10 = vcmp.gt.f32.partialorder %v294_v4, 0.0  ;;  %vm327_vm11 = vcmp.gt.f32.partialorder %v295_v5, 0.0 }
  0x24   : > { %v388_v12 = vsel %vm324_vm8, %v292_v62, %v356_v7  ;;  %v358_v13 = vmul.f32 0.2, %v294_v4  ;;  %v359_v14 = vmul.f32 0.2, %v295_v5  ;;  %v296_v15 = vadd.f32 %v945_v9, %v257_v8 }
  0x25   : > { %v389_v16 = vsel %vm325_vm9, %v293_v3, %v357_v11  ;;  %v297_v17 = vadd.f32 %v945_v9, %v258_v10  ;;  %v259_v18 = vmul.f32 %v735_v2, %v936_v0  ;;  %v260_v19 = vmul.f32 %v736_v6, %v936_v0  ;;  %v861_v6 = vld [vmem:[%s931_s18 + $0x68] sm:$0xff]  }
  0x26   : > { %v792_v21 = vpack.c.bf16 %v389_v16, %v388_v12  ;;  %v390_v22 = vsel %vm326_vm10, %v294_v4, %v358_v13  ;;  %v391_v23 = vsel %vm327_vm11, %v295_v5, %v359_v14  ;;  %vm328_vm12 = vcmp.gt.f32.partialorder %v296_v15, 0.0 }
  0x27   : > { %v797_v25 = vpack.c.bf16 %v391_v23, %v390_v22  ;;  %vm329_vm13 = vcmp.gt.f32.partialorder %v297_v17, 0.0  ;;  %v360_v26 = vmul.f32 0.2, %v296_v15  ;;  %v361_v27 = vmul.f32 0.2, %v297_v17  ;;  %v862_v22 = vld [vmem:[%s931_s18 + $0x70] sm:$0xff]  }
  0x28   : > { %867 = vst [vmem:[%s968_s25 + $0x20] sm:$0xff] %v792_v21   ;;  %v298_v28 = vadd.f32 %v945_v9, %v259_v18  ;;  %v299_v29 = vadd.f32 %v945_v9, %v260_v19  ;;  %v739_v30 = vunpack.c.l.bf16 %v856_v20  ;;  %v740_v31 = vunpack.c.h.bf16 %v856_v20 }
  0x29   : > { %868 = vst [vmem:[%s968_s25 + $0x28] sm:$0xff] %v797_v25   ;;  %v392_v32 = vsel %vm328_vm12, %v296_v15, %v360_v26  ;;  %v393_v33 = vsel %vm329_vm13, %v297_v17, %v361_v27  ;;  %v743_v34 = vunpack.c.l.bf16 %v857_v24  ;;  %v744_v35 = vunpack.c.h.bf16 %v857_v24 }
  0x2a   : > { %v802_v37 = vpack.c.bf16 %v393_v33, %v392_v32  ;;  %vm330_vm14 = vcmp.gt.f32.partialorder %v298_v28, 0.0  ;;  %vm331_vm15 = vcmp.gt.f32.partialorder %v299_v29, 0.0  ;;  %v362_v38 = vmul.f32 0.2, %v298_v28 }
  0x2b   : > { %v363_v39 = vmul.f32 0.2, %v299_v29  ;;  %v261_v40 = vmul.f32 %v739_v30, %v936_v0  ;;  %v262_v41 = vmul.f32 %v740_v31, %v936_v0  ;;  %v263_v42 = vmul.f32 %v743_v34, %v936_v0 }
  0x2c   : > { %869 = vst [vmem:[%s968_s25 + $0x30] sm:$0xff] %v802_v37   ;;  %v394_v43 = vsel %vm330_vm14, %v298_v28, %v362_v38  ;;  %v264_v44 = vmul.f32 %v744_v35, %v936_v0  ;;  %v747_v45 = vunpack.c.l.bf16 %v858_v36  ;;  %v748_v46 = vunpack.c.h.bf16 %v858_v36 }
  0x2d   : > { %v395_v47 = vsel %vm331_vm15, %v299_v29, %v363_v39  ;;  %v300_v48 = vadd.f32 %v945_v9, %v261_v40  ;;  %v301_v49 = vadd.f32 %v945_v9, %v262_v41  ;;  %v302_v50 = vadd.f32 %v945_v9, %v263_v42  ;;  %v863_v41 = vld [vmem:[%s931_s18 + $0x78] sm:$0xff]  }
  0x2e   : > { %v807_v51 = vpack.c.bf16 %v395_v47, %v394_v43  ;;  %v303_v52 = vadd.f32 %v945_v9, %v264_v44  ;;  %v265_v53 = vmul.f32 %v747_v45, %v936_v0  ;;  %v266_v54 = vmul.f32 %v748_v46, %v936_v0 }
  0x2f   : > { %vm332_vm0 = vcmp.gt.f32.partialorder %v300_v48, 0.0  ;;  %vm333_vm1 = vcmp.gt.f32.partialorder %v301_v49, 0.0  ;;  %v364_v56 = vmul.f32 0.2, %v300_v48  ;;  %v365_v57 = vmul.f32 0.2, %v301_v49 }
  0x30   : > { %870 = vst [vmem:[%s968_s25 + $0x38] sm:$0xff] %v807_v51   ;;  %vm334_vm2 = vcmp.gt.f32.partialorder %v302_v50, 0.0  ;;  %vm335_vm3 = vcmp.gt.f32.partialorder %v303_v52, 0.0  ;;  %v366_v58 = vmul.f32 0.2, %v302_v50  ;;  %v304_v62 = vadd.f32 %v945_v9, %v265_v53 }
  0x31   : > { %v367_v59 = vmul.f32 0.2, %v303_v52  ;;  %v396_v60 = vsel %vm332_vm0, %v300_v48, %v364_v56  ;;  %v397_v61 = vsel %vm333_vm1, %v301_v49, %v365_v57  ;;  %v305_v63 = vadd.f32 %v945_v9, %v266_v54 }
  0x32   : > { %v812_v2 = vpack.c.bf16 %v397_v61, %v396_v60  ;;  %v398_v3 = vsel %vm334_vm2, %v302_v50, %v366_v58  ;;  %v751_v5 = vunpack.c.l.bf16 %v859_v55  ;;  %vm336_vm4 = vcmp.gt.f32.partialorder %v304_v62, 0.0 }
  0x33   : > { %v399_v4 = vsel %vm335_vm3, %v303_v52, %v367_v59  ;;  %vm337_vm5 = vcmp.gt.f32.partialorder %v305_v63, 0.0  ;;  %v368_v8 = vmul.f32 0.2, %v304_v62  ;;  %v369_v10 = vmul.f32 0.2, %v305_v63 }
  0x34   : > { %v817_v7 = vpack.c.bf16 %v399_v4, %v398_v3  ;;  %871 = vst [vmem:[%s968_s25 + $0x40] sm:$0xff] %v812_v2   ;;  %v752_v11 = vunpack.c.h.bf16 %v859_v55  ;;  %v267_v12 = vmul.f32 %v751_v5, %v936_v0  ;;  %v755_v13 = vunpack.c.l.bf16 %v860_v1 }
  0x35   : > { %v400_v14 = vsel %vm336_vm4, %v304_v62, %v368_v8  ;;  %v756_v15 = vunpack.c.h.bf16 %v860_v1  ;;  %v759_v16 = vunpack.c.l.bf16 %v861_v6  ;;  %v760_v17 = vunpack.c.h.bf16 %v861_v6 }
  0x36   : > { %872 = vst [vmem:[%s968_s25 + $0x48] sm:$0xff] %v817_v7   ;;  %v401_v18 = vsel %vm337_vm5, %v305_v63, %v369_v10  ;;  %v268_v19 = vmul.f32 %v752_v11, %v936_v0  ;;  %v306_v20 = vadd.f32 %v945_v9, %v267_v12  ;;  %v269_v21 = vmul.f32 %v755_v13, %v936_v0 }
  0x37   : > { %v822_v23 = vpack.c.bf16 %v401_v18, %v400_v14  ;;  %v270_v24 = vmul.f32 %v756_v15, %v936_v0  ;;  %v271_v25 = vmul.f32 %v759_v16, %v936_v0  ;;  %v272_v26 = vmul.f32 %v760_v17, %v936_v0 }
  0x38   : > { %v307_v27 = vadd.f32 %v945_v9, %v268_v19  ;;  %vm338_vm6 = vcmp.gt.f32.partialorder %v306_v20, 0.0  ;;  %v370_v28 = vmul.f32 0.2, %v306_v20  ;;  %v308_v29 = vadd.f32 %v945_v9, %v269_v21 }
  0x39   : > { %873 = vst [vmem:[%s968_s25 + $0x50] sm:$0xff] %v822_v23   ;;  %v309_v30 = vadd.f32 %v945_v9, %v270_v24  ;;  %v310_v31 = vadd.f32 %v945_v9, %v271_v25  ;;  %v311_v32 = vadd.f32 %v945_v9, %v272_v26  ;;  %v763_v33 = vunpack.c.l.bf16 %v862_v22 }
  0x3a   : > { %vm339_vm7 = vcmp.gt.f32.partialorder %v307_v27, 0.0  ;;  %v371_v34 = vmul.f32 0.2, %v307_v27  ;;  %v402_v35 = vsel %vm338_vm6, %v306_v20, %v370_v28  ;;  %vm340_vm8 = vcmp.gt.f32.partialorder %v308_v29, 0.0 }
  0x3b   : > { %vm341_vm9 = vcmp.gt.f32.partialorder %v309_v30, 0.0  ;;  %v372_v36 = vmul.f32 0.2, %v308_v29  ;;  %v373_v37 = vmul.f32 0.2, %v309_v30  ;;  %vm342_vm10 = vcmp.gt.f32.partialorder %v310_v31, 0.0 }
  0x3c   : > { %v403_v38 = vsel %vm339_vm7, %v307_v27, %v371_v34  ;;  %vm343_vm11 = vcmp.gt.f32.partialorder %v311_v32, 0.0  ;;  %v374_v39 = vmul.f32 0.2, %v310_v31  ;;  %v375_v40 = vmul.f32 0.2, %v311_v32 }
  0x3d   : > { %v827_v42 = vpack.c.bf16 %v403_v38, %v402_v35  ;;  %v404_v43 = vsel %vm340_vm8, %v308_v29, %v372_v36  ;;  %v405_v44 = vsel %vm341_vm9, %v309_v30, %v373_v37  ;;  %v764_v45 = vunpack.c.h.bf16 %v862_v22 }
  0x3e   : > { %v832_v46 = vpack.c.bf16 %v405_v44, %v404_v43  ;;  %v406_v47 = vsel %vm342_vm10, %v310_v31, %v374_v39  ;;  %v407_v48 = vsel %vm343_vm11, %v311_v32, %v375_v40  ;;  %v273_v49 = vmul.f32 %v763_v33, %v936_v0 }
  0x3f   : > { %874 = vst [vmem:[%s968_s25 + $0x58] sm:$0xff] %v827_v42   ;;  %v837_v50 = vpack.c.bf16 %v407_v48, %v406_v47  ;;  %v274_v51 = vmul.f32 %v764_v45, %v936_v0  ;;  %v767_v52 = vunpack.c.l.bf16 %v863_v41  ;;  %v768_v53 = vunpack.c.h.bf16 %v863_v41 }
  0x40   : > { %875 = vst [vmem:[%s968_s25 + $0x60] sm:$0xff] %v832_v46   ;;  %v312_v54 = vadd.f32 %v945_v9, %v273_v49 }
  0x41   : > { %876 = vst [vmem:[%s968_s25 + $0x68] sm:$0xff] %v837_v50   ;;  %v313_v55 = vadd.f32 %v945_v9, %v274_v51  ;;  %v275_v56 = vmul.f32 %v767_v52, %v936_v0  ;;  %v276_v57 = vmul.f32 %v768_v53, %v936_v0 }
  0x42   : > { %vm344_vm12 = vcmp.gt.f32.partialorder %v312_v54, 0.0  ;;  %v376_v58 = vmul.f32 0.2, %v312_v54 }
  0x43   : > { %vm345_vm13 = vcmp.gt.f32.partialorder %v313_v55, 0.0  ;;  %v377_v59 = vmul.f32 0.2, %v313_v55  ;;  %v314_v60 = vadd.f32 %v945_v9, %v275_v56  ;;  %v315_v61 = vadd.f32 %v945_v9, %v276_v57 }
  0x44   : > { %v408_v62 = vsel %vm344_vm12, %v312_v54, %v376_v58 }
  0x45   : > { %v409_v63 = vsel %vm345_vm13, %v313_v55, %v377_v59  ;;  %vm346_vm14 = vcmp.gt.f32.partialorder %v314_v60, 0.0  ;;  %vm347_vm15 = vcmp.gt.f32.partialorder %v315_v61, 0.0  ;;  %v378_v1 = vmul.f32 0.2, %v314_v60 }
  0x46   : > { %v842_v2 = vpack.c.bf16 %v409_v63, %v408_v62  ;;  %v379_v3 = vmul.f32 0.2, %v315_v61 }
  0x47   : > { %v410_v4 = vsel %vm346_vm14, %v314_v60, %v378_v1 }
  0x48   : > { %877 = vst [vmem:[%s968_s25 + $0x70] sm:$0xff] %v842_v2   ;;  %v411_v5 = vsel %vm347_vm15, %v315_v61, %v379_v3 }
  0x49   : > { %v847_v0 = vpack.c.bf16 %v411_v5, %v410_v4 }
  0x4b   : > { %878 = vst [vmem:[%s968_s25 + $0x78] sm:$0xff] %v847_v0  }
  0x4c PF: > { %s13_s12 = sadd.s32 1, %s893_s12  }
  0x4d   : > { %p10_p4 = scmp.ge.s32.totalorder %s13_s12, 4  }
  0x4f   :  { %12 = sbr.rel (!%p10_p4) target bundleno = 1 (0x1), region = 62 }

// kernel: discriminator_forward.10
= control target key start
LH: loop header
LB: loop body
LE: loop exit
PB: predicated region body
PF: predicated region fallthrough
CT: control target
= control target key end

     0   :  { %s846_s15 = smov 0   ;;  %s942_s0 = inlined_call_operand.vmem [shape: bf16[128,256], index: 0, kind: input, shape index: {}]   ;;  %s943_s1 = inlined_call_operand.vmem [shape: bf16[256,128], index: 1, kind: input, shape index: {}]   ;;  %s944_s2 = inlined_call_operand.vmem [shape: bf16[128,128], index: 2, kind: output, shape index: {0}]   ;;  %s945_s3 = inlined_call_operand.vmem [shape: f32[2,1,128], index: 3, kind: output, shape index: {1}]   ;;  %s946_s4 = inlined_call_operand.vmem [shape: f32[2,1,128], index: 4, kind: output, shape index: {2}]  }
   0x1 LB: > { %s852_s16 = sadd.s32 4294967295, %s819_s15   ;;  %p649_p0 = scmp.ge.s32.totalorder %s819_s15, 1  ;;  %s819_s15 = sphi %s846_s15, %s15_s15  }
   0x2   : > { %p169_p1 = scmp.lt.s32.totalorder %s819_s15, 3 }
   0x4   : > { %p170_p2 = pnand %p649_p0, %p169_p1 }
   0x5   : > { %v785_v0 = vld [vmem:[%s943_s1 + $0x40] sm:$0xff] (!%p170_p2)   ;;  %s650_s19 = sshll.u32 (!%p170_p2), %s852_s16, 3  ;;  %v787_v2 = vld [vmem:[%s943_s1 + $0x48] sm:$0xff] (!%p170_p2)   ;;  %v789_v4 = vld [vmem:[%s943_s1 + $0x50] sm:$0xff] (!%p170_p2)   ;;  %p215_p4 = scmp.lt.s32.totalorder (!%p170_p2), %s852_s16, 1 }
   0x6   : > { %173 = sbr.rel (%p170_p2) target bundleno = 288 (0x120), region = 28  ;;  %v786_v1 = vld [vmem:[%s943_s1] sm:$0xff] (!%p170_p2)   ;;  %721 = vmatprep.subr.bf16.mxu0 (!%p170_p2), %v785_v0  ;;  %761 = vmatprep.subr.bf16.mxu1 (!%p170_p2), %v785_v0  ;;  %v788_v3 = vld [vmem:[%s943_s1 + $0x8] sm:$0xff] (!%p170_p2)   ;;  %p203_p3 = scmp.lt.s32.totalorder (!%p170_p2), %s650_s19, 15  ;;  %v790_v5 = vld [vmem:[%s943_s1 + $0x10] sm:$0xff] (!%p170_p2)  }
   0x7   : > { %722 = vmatpush3.bf16.msra.mxu0 (!%p170_p2), %v786_v1  ;;  %769 = vmatpush3.bf16.msra.mxu1 (!%p170_p2), %v786_v1  ;;  %v791_v6 = vld [vmem:[%s943_s1 + $0x58] sm:$0xff] (!%p170_p2)   ;;  %v793_v8 = vld [vmem:[%s943_s1 + $0x60] sm:$0xff] (!%p170_p2)   ;;  %v795_v10 = vld [vmem:[%s943_s1 + $0x68] sm:$0xff] (!%p170_p2)  }
   0x8   : > { %723 = vmatprep.subr.bf16.mxu0 (!%p170_p2), %v787_v2  ;;  %762 = vmatprep.subr.bf16.mxu1 (!%p170_p2), %v787_v2  ;;  %v792_v7 = vld [vmem:[%s943_s1 + $0x18] sm:$0xff] (!%p170_p2)   ;;  %v794_v9 = vld [vmem:[%s943_s1 + $0x20] sm:$0xff] (!%p170_p2)   ;;  %v796_v13 = vld [vmem:[%s943_s1 + $0x28] sm:$0xff] (!%p170_p2)  }
   0x9   : > { %v797_v14 = vld [vmem:[%s943_s1 + $0x70] sm:$0xff] (!%p170_p2)   ;;  %v799_v16 = vld [vmem:[%s943_s1 + $0x78] sm:$0xff] (!%p170_p2)  }
   0xa   : > { %v798_v15 = vld [vmem:[%s943_s1 + $0x30] sm:$0xff] (!%p170_p2)   ;;  %v800_v17 = vld [vmem:[%s943_s1 + $0x38] sm:$0xff] (!%p170_p2)  }
   0xb   : > { %724 = vmatpush3.bf16.msra.mxu0 (!%p170_p2), %v788_v3  ;;  %770 = vmatpush3.bf16.msra.mxu1 (!%p170_p2), %v788_v3 }
   0xc   : > { %725 = vmatprep.subr.bf16.mxu0 (!%p170_p2), %v789_v4  ;;  %763 = vmatprep.subr.bf16.mxu1 (!%p170_p2), %v789_v4 }
   0xd   : > { %s948_s19 = smov (!%p203_p3, %s650_s19), 15  ;;  %s950_s16 = smov (!%p215_p4, %s852_s16), 1 }
   0xe   : > { %s689_s8 = sshll.u32 %s948_s19, 3  ;;  %s654_s5 = sshll.u32 %s948_s19, 2 }
   0xf   : > { %726 = vmatpush3.bf16.msra.mxu0 %v790_v5  ;;  %771 = vmatpush3.bf16.msra.mxu1 %v790_v5  ;;  %s890_s13 = scalar_lea.vmem %s942_s0, %s689_s8  ;;  %s925_s8 = scalar_lea.vmem %s944_s2, %s654_s5 }
  0x10   : > { %727 = vmatprep.subr.bf16.mxu0 %v791_v6  ;;  %764 = vmatprep.subr.bf16.mxu1 %v791_v6  ;;  %v803_v11 = vld [vmem:[%s890_s13 + $0x4] ss:$8 sps:$4 sm:$0xff]   ;;  %v801_v18 = vld [vmem:[%s890_s13] ss:$8 sps:$4 sm:$0xff]   ;;  %v807_v20 = vld [vmem:[%s890_s13 + $0x14] ss:$8 sps:$4 sm:$0xff]   ;;  %s217_s10 = scalar_lea.vmem %s945_s3, %s950_s16 }
  0x11   : > { %v806_v12 = vld [vmem:[%s890_s13 + $0x24] ss:$8 sps:$4 sm:$0xff]   ;;  %430 = vmatprep.mubr.bf16.mxu0 %v803_v11  ;;  %v804_v19 = vld [vmem:[%s890_s13 + $0x20] ss:$8 sps:$4 sm:$0xff]   ;;  %v810_v21 = vld [vmem:[%s890_s13 + $0x34] ss:$8 sps:$4 sm:$0xff]  }
  0x12   : > { %446 = vmatprep.mubr.bf16.mxu1 %v806_v12  ;;  %v809_v22 = vld [vmem:[%s890_s13 + $0x10] ss:$8 sps:$4 sm:$0xff]  }
  0x13   : > { %728 = vmatpush3.bf16.msra.mxu0 %v792_v7  ;;  %772 = vmatpush3.bf16.msra.mxu1 %v792_v7  ;;  %v812_v23 = vld [vmem:[%s890_s13 + $0x30] ss:$8 sps:$4 sm:$0xff]   ;;  %s220_s13 = scalar_lea.vmem %s946_s4, %s950_s16 }
  0x14   : > { %729 = vmatprep.subr.bf16.mxu0 %v793_v8  ;;  %765 = vmatprep.subr.bf16.mxu1 %v793_v8 }
  0x17   : > { %730 = vmatpush3.bf16.msra.mxu0 %v794_v9  ;;  %773 = vmatpush3.bf16.msra.mxu1 %v794_v9 }
  0x18   : > { %731 = vmatprep.subr.bf16.mxu0 %v795_v10  ;;  %766 = vmatprep.subr.bf16.mxu1 %v795_v10 }
  0x1b   : > { %732 = vmatpush3.bf16.msra.mxu0 %v796_v13  ;;  %774 = vmatpush3.bf16.msra.mxu1 %v796_v13 }
  0x1c   : > { %733 = vmatprep.subr.bf16.mxu0 %v797_v14  ;;  %767 = vmatprep.subr.bf16.mxu1 %v797_v14 }
  0x1f   : > { %734 = vmatpush3.bf16.msra.mxu0 %v798_v15  ;;  %775 = vmatpush3.bf16.msra.mxu1 %v798_v15 }
  0x20   : > { %735 = vmatprep.subr.bf16.mxu0 %v799_v16  ;;  %768 = vmatprep.subr.bf16.mxu1 %v799_v16 }
  0x23   : > { %736 = vmatpush3.bf16.msra.mxu0 %v800_v17  ;;  %776 = vmatpush3.bf16.msra.mxu1 %v800_v17 }
  0x26   : > { %431 = vmatmul.mubr.bf16.vlgmr.msra.gmra.mrb[0].mxu0 %v801_v18  ;;  %447 = vmatmul.mubr.bf16.vlgmr.msra.gmra.mrb[0].mxu1 %v804_v19 }
  0x27   : > { %438 = vmatprep.mubr.bf16.mxu0 %v807_v20  ;;  %454 = vmatprep.mubr.bf16.mxu1 %v810_v21 }
  0x2e   : > { %439 = vmatmul.mubr.bf16.gmra.mrb[4].mxu0 %v809_v22  ;;  %455 = vmatmul.mubr.bf16.gmra.mrb[4].mxu1 %v812_v23 }
  0xf9   : > { %v737_v24 = vpop.f32.mrb[0].mxu0  ;;  %v749_v25 = vpop.f32.mrb[0].mxu1 }
  0xfa   : > { %v738_v26 = vpop.f32.mrb[1].mxu0  ;;  %v750_v27 = vpop.f32.mrb[1].mxu1 }
  0xfb   : > { %v739_v28 = vadd.f32 %v738_v26, %v737_v24  ;;  %v740_v29 = vpop.f32.mrb[2].mxu0  ;;  %v751_v30 = vadd.f32 %v750_v27, %v749_v25  ;;  %v752_v31 = vpop.f32.mrb[2].mxu1 }
  0xfc   : > { %v741_v32 = vpop.f32.mrb[3].mxu0  ;;  %v753_v33 = vpop.f32.mrb[3].mxu1 }
  0xfd   : > { %v742_v34 = vadd.f32 %v741_v32, %v740_v29  ;;  %v754_v35 = vadd.f32 %v753_v33, %v752_v31  ;;  %v517_v36 = vmul.f32 %v739_v28, %v739_v28  ;;  %v521_v61 = vmul.f32 %v751_v30, %v751_v30 }
  0xff   : > { %v701_v37 = vpack.c.bf16 %v742_v34, %v739_v28  ;;  %v503_v38 = vadd.f32 %v742_v34, %v739_v28  ;;  %v518_v39 = vmul.f32 %v742_v34, %v742_v34  ;;  %v711_v40 = vpack.c.bf16 %v754_v35, %v751_v30 }
 0x100   : > { %v522_v0 = vmul.f32 %v754_v35, %v754_v35 }
 0x101   : > { %702 = vst [vmem:[%s925_s8] sm:$0xff] %v701_v37   ;;  %v525_v41 = vadd.f32 %v518_v39, %v517_v36  ;;  %v743_v42 = vpop.f32.mrb[4].mxu0  ;;  %719 = vst [vmem:[%s925_s8 + $0x10] sm:$0xff] %v711_v40   ;;  %v755_v43 = vpop.f32.mrb[4].mxu1 }
 0x102   : > { %v744_v44 = vpop.f32.mrb[5].mxu0  ;;  %v756_v45 = vpop.f32.mrb[5].mxu1 }
 0x103   : > { %v745_v46 = vadd.f32 %v744_v44, %v743_v42  ;;  %v746_v47 = vpop.f32.mrb[6].mxu0  ;;  %v757_v48 = vadd.f32 %v756_v45, %v755_v43  ;;  %v758_v49 = vpop.f32.mrb[6].mxu1 }
 0x104   : > { %v747_v50 = vpop.f32.mrb[7].mxu0  ;;  %v759_v51 = vpop.f32.mrb[7].mxu1 }
 0x105   : > { %v504_v52 = vadd.f32 %v745_v46, %v503_v38  ;;  %v519_v53 = vmul.f32 %v745_v46, %v745_v46  ;;  %v748_v54 = vadd.f32 %v747_v50, %v746_v47  ;;  %v760_v55 = vadd.f32 %v759_v51, %v758_v49 }
 0x106   : > { %v523_v3 = vmul.f32 %v757_v48, %v757_v48 }
 0x107   : > { %v526_v56 = vadd.f32 %v525_v41, %v519_v53  ;;  %v706_v57 = vpack.c.bf16 %v748_v54, %v745_v46  ;;  %v505_v58 = vadd.f32 %v748_v54, %v504_v52  ;;  %v520_v59 = vmul.f32 %v748_v54, %v748_v54 }
 0x108   : > { %v716_v60 = vpack.c.bf16 %v760_v55, %v757_v48  ;;  %v524_v8 = vmul.f32 %v760_v55, %v760_v55 }
 0x109   : > { %718 = vst [vmem:[%s925_s8 + $0x8] sm:$0xff] %v706_v57   ;;  %v506_v62 = vadd.f32 %v751_v30, %v505_v58  ;;  %v527_v63 = vadd.f32 %v526_v56, %v520_v59 }
 0x10a   : > { %720 = vst [vmem:[%s925_s8 + $0x18] sm:$0xff] %v716_v60  }
 0x10b   : > { %v528_v1 = vadd.f32 %v527_v63, %v521_v61  ;;  %v507_v2 = vadd.f32 %v754_v35, %v506_v62 }
 0x10d   : > { %v508_v4 = vadd.f32 %v757_v48, %v507_v2  ;;  %v529_v5 = vadd.f32 %v528_v1, %v522_v0 }
 0x10f   : > { %v530_v6 = vadd.f32 %v529_v5, %v523_v3  ;;  %v509_v7 = vadd.f32 %v760_v55, %v508_v4 }
 0x111   : > { %v510_v9 = vrot.slane %v509_v7, 4  ;;  %v531_v10 = vadd.f32 %v530_v6, %v524_v8 }
 0x113   : > { %v511_v11 = vadd.f32 %v510_v9, %v509_v7  ;;  %v532_v12 = vrot.slane %v531_v10, 4 }
 0x115   : > { %v512_v13 = vrot.slane %v511_v11, 2  ;;  %v533_v14 = vadd.f32 %v532_v12, %v531_v10 }
 0x117   : > { %v513_v15 = vadd.f32 %v512_v13, %v511_v11  ;;  %v534_v16 = vrot.slane %v533_v14, 2 }
 0x119   : > { %v514_v17 = vrot.slane %v513_v15, 1  ;;  %v535_v18 = vadd.f32 %v534_v16, %v533_v14 }
 0x11b   : > { %v515_v19 = vadd.f32 %v514_v17, %v513_v15  ;;  %v536_v20 = vrot.slane %v535_v18, 1 }
 0x11d   : > { %516 = vst [vmem:[%s217_s10] sm:$0x1] %v515_v19  ;;  %v537_v21 = vadd.f32 %v536_v20, %v535_v18 }
 0x11f   : > { %538 = vst [vmem:[%s220_s13] sm:$0x1] %v537_v21 }
 0x120 PF: > { %s15_s15 = sadd.s32 1, %s819_s15  }
 0x121   : > { %p12_p5 = scmp.ge.s32.totalorder %s15_s15, 4  }
 0x123   :  { %14 = sbr.rel (!%p12_p5) target bundleno = 1 (0x1), region = 82 }

// kernel: discriminator_forward.11
= control target key start
LH: loop header
LB: loop body
LE: loop exit
PB: predicated region body
PF: predicated region fallthrough
CT: control target
= control target key end

     0   :  { %s447_s12 = smov 0   ;;  %s477_s0 = inlined_call_operand.vmem [shape: bf16[128,128], index: 0, kind: input, shape index: {}]   ;;  %s478_s1 = inlined_call_operand.vmem [shape: f32[1,128], index: 1, kind: input, shape index: {}]   ;;  %s479_s2 = inlined_call_operand.vmem [shape: f32[1,128], index: 2, kind: input, shape index: {}]   ;;  %s480_s3 = inlined_call_operand.vmem [shape: bf16[128,128], index: 3, kind: output, shape index: {}]  }
   0x1 LB: > { %s340_s13 = sadd.s32 4294967295, %s425_s12   ;;  %p344_p0 = scmp.ge.s32.totalorder %s425_s12, 1  ;;  %s425_s12 = sphi %s447_s12, %s13_s12  }
   0x2   : > { %p138_p1 = scmp.lt.s32.totalorder %s425_s12, 3 }
   0x4   : > { %p139_p2 = pnand %p344_p0, %p138_p1 }
   0x5   : > { %s345_s14 = sshll.u32 (!%p139_p2), %s340_s13, 3  ;;  %v349_v0 = vld [vmem:[%s478_s1] ss:$0 sm:$0xff] (!%p139_p2) }
   0x6   : > { %142 = sbr.rel (%p139_p2) target bundleno = 34 (0x22), region = 32  ;;  %p163_p3 = scmp.lt.s32.totalorder (!%p139_p2), %s345_s14, 15  ;;  %v350_v13 = vld [vmem:[%s479_s2] ss:$0 sm:$0xff] (!%p139_p2) }
   0xd   : > { %s482_s14 = smov (!%p163_p3, %s345_s14), 15 }
   0xe   : > { %s346_s15 = sshll.u32 %s482_s14, 2 }
   0xf   : > { %s166_s18 = scalar_lea.vmem %s477_s0, %s346_s15  ;;  %s172_s25 = scalar_lea.vmem %s480_s3, %s346_s15 }
  0x10   : > { %v370_v1 = vld [vmem:[%s166_s18] sm:$0xff]   ;;  %v405_v2 = vld [vmem:[%s166_s18 + $0x8] sm:$0xff]   ;;  %v406_v3 = vld [vmem:[%s166_s18 + $0x10] sm:$0xff]  }
  0x11   : > { %v371_v4 = vunpack.c.l.bf16 %v370_v1  ;;  %v372_v5 = vunpack.c.h.bf16 %v370_v1  ;;  %v375_v6 = vunpack.c.l.bf16 %v405_v2  ;;  %v376_v7 = vunpack.c.h.bf16 %v405_v2  ;;  %v407_v8 = vld [vmem:[%s166_s18 + $0x18] sm:$0xff]  }
  0x12   : > { %v379_v9 = vunpack.c.l.bf16 %v406_v3  ;;  %v380_v10 = vunpack.c.h.bf16 %v406_v3  ;;  %v383_v11 = vunpack.c.l.bf16 %v407_v8  ;;  %v384_v12 = vunpack.c.h.bf16 %v407_v8 }
  0x13   : > { %v197_v14 = vmul.f32 %v371_v4, %v349_v0  ;;  %v198_v15 = vmul.f32 %v372_v5, %v349_v0  ;;  %v199_v16 = vmul.f32 %v375_v6, %v349_v0  ;;  %v200_v17 = vmul.f32 %v376_v7, %v349_v0 }
  0x14   : > { %v201_v18 = vmul.f32 %v379_v9, %v349_v0  ;;  %v202_v19 = vmul.f32 %v380_v10, %v349_v0  ;;  %v203_v20 = vmul.f32 %v383_v11, %v349_v0  ;;  %v204_v21 = vmul.f32 %v384_v12, %v349_v0 }
  0x15   : > { %v212_v22 = vadd.f32 %v350_v13, %v197_v14  ;;  %v213_v23 = vadd.f32 %v350_v13, %v198_v15  ;;  %v214_v24 = vadd.f32 %v350_v13, %v199_v16  ;;  %v215_v25 = vadd.f32 %v350_v13, %v200_v17 }
  0x16   : > { %v216_v26 = vadd.f32 %v350_v13, %v201_v18  ;;  %v217_v27 = vadd.f32 %v350_v13, %v202_v19  ;;  %v218_v28 = vadd.f32 %v350_v13, %v203_v20  ;;  %v219_v29 = vadd.f32 %v350_v13, %v204_v21 }
  0x17   : > { %vm220_vm0 = vcmp.gt.f32.partialorder %v212_v22, 0.0  ;;  %vm221_vm1 = vcmp.gt.f32.partialorder %v213_v23, 0.0  ;;  %v228_v30 = vmul.f32 0.2, %v212_v22  ;;  %v229_v31 = vmul.f32 0.2, %v213_v23 }
  0x18   : > { %vm222_vm2 = vcmp.gt.f32.partialorder %v214_v24, 0.0  ;;  %vm223_vm3 = vcmp.gt.f32.partialorder %v215_v25, 0.0  ;;  %v230_v32 = vmul.f32 0.2, %v214_v24  ;;  %v231_v33 = vmul.f32 0.2, %v215_v25 }
  0x19   : > { %v236_v34 = vsel %vm220_vm0, %v212_v22, %v228_v30  ;;  %v237_v35 = vsel %vm221_vm1, %v213_v23, %v229_v31  ;;  %vm224_vm4 = vcmp.gt.f32.partialorder %v216_v26, 0.0  ;;  %vm225_vm5 = vcmp.gt.f32.partialorder %v217_v27, 0.0 }
  0x1a   : > { %v388_v36 = vpack.c.bf16 %v237_v35, %v236_v34  ;;  %v238_v37 = vsel %vm222_vm2, %v214_v24, %v230_v32  ;;  %v239_v38 = vsel %vm223_vm3, %v215_v25, %v231_v33  ;;  %v232_v39 = vmul.f32 0.2, %v216_v26 }
  0x1b   : > { %v393_v40 = vpack.c.bf16 %v239_v38, %v238_v37  ;;  %v233_v41 = vmul.f32 0.2, %v217_v27  ;;  %vm226_vm6 = vcmp.gt.f32.partialorder %v218_v28, 0.0  ;;  %vm227_vm7 = vcmp.gt.f32.partialorder %v219_v29, 0.0 }
  0x1c   : > { %389 = vst [vmem:[%s172_s25] sm:$0xff] %v388_v36   ;;  %v240_v42 = vsel %vm224_vm4, %v216_v26, %v232_v39  ;;  %v234_v43 = vmul.f32 0.2, %v218_v28  ;;  %v235_v44 = vmul.f32 0.2, %v219_v29 }
  0x1d   : > { %408 = vst [vmem:[%s172_s25 + $0x8] sm:$0xff] %v393_v40   ;;  %v241_v45 = vsel %vm225_vm5, %v217_v27, %v233_v41 }
  0x1e   : > { %v398_v46 = vpack.c.bf16 %v241_v45, %v240_v42  ;;  %v242_v47 = vsel %vm226_vm6, %v218_v28, %v234_v43  ;;  %v243_v48 = vsel %vm227_vm7, %v219_v29, %v235_v44 }
  0x1f   : > { %v403_v49 = vpack.c.bf16 %v243_v48, %v242_v47 }
  0x20   : > { %409 = vst [vmem:[%s172_s25 + $0x10] sm:$0xff] %v398_v46  }
  0x21   : > { %410 = vst [vmem:[%s172_s25 + $0x18] sm:$0xff] %v403_v49  }
  0x22 PF: > { %s13_s12 = sadd.s32 1, %s425_s12  }
  0x23   : > { %p10_p4 = scmp.ge.s32.totalorder %s13_s12, 4  }
  0x25   :  { %12 = sbr.rel (!%p10_p4) target bundleno = 1 (0x1), region = 62 }

// kernel: discriminator_forward.13
= control target key start
LH: loop header
LB: loop body
LE: loop exit
PB: predicated region body
PF: predicated region fallthrough
CT: control target
= control target key end

     0   :  { %s330_s12 = smov 0   ;;  %s353_s0 = inlined_call_operand.vmem [shape: bf16[32,128], index: 0, kind: input, shape index: {}]   ;;  %s354_s1 = inlined_call_operand.vmem [shape: f32[1,128], index: 1, kind: input, shape index: {}]   ;;  %s355_s2 = inlined_call_operand.vmem [shape: f32[1,128], index: 2, kind: input, shape index: {}]   ;;  %s356_s3 = inlined_call_operand.vmem [shape: bf16[32,128], index: 3, kind: output, shape index: {}]  }
   0x1 LB: > { %s268_s13 = sadd.s32 4294967295, %s308_s12   ;;  %p272_p0 = scmp.ge.s32.totalorder %s308_s12, 1  ;;  %s308_s12 = sphi %s330_s12, %s13_s12  }
   0x2   : > { %p138_p1 = scmp.lt.s32.totalorder %s308_s12, 3 }
   0x4   : > { %p139_p2 = pnand %p272_p0, %p138_p1 }
   0x5   : > { %s273_s14 = sshll.u32 (!%p139_p2), %s268_s13, 1  ;;  %v277_v1 = vld [vmem:[%s354_s1] ss:$0 sm:$0xff] (!%p139_p2) }
   0x6   : > { %142 = sbr.rel (%p139_p2) target bundleno = 29 (0x1d), region = 32  ;;  %p163_p3 = scmp.lt.s32.totalorder (!%p139_p2), %s273_s14, 3  ;;  %v278_v4 = vld [vmem:[%s355_s2] ss:$0 sm:$0xff] (!%p139_p2) }
   0xd   : > { %s358_s14 = smov (!%p163_p3, %s273_s14), 3 }
   0xe   : > { %s274_s15 = sshll.u32 %s358_s14, 2 }
   0xf   : > { %s166_s18 = scalar_lea.vmem %s353_s0, %s274_s15  ;;  %s172_s25 = scalar_lea.vmem %s356_s3, %s274_s15 }
  0x10   : > { %v286_v0 = vld [vmem:[%s166_s18] sm:$0xff]  }
  0x11   : > { %v287_v2 = vunpack.c.l.bf16 %v286_v0  ;;  %v288_v3 = vunpack.c.h.bf16 %v286_v0 }
  0x13   : > { %v185_v5 = vmul.f32 %v287_v2, %v277_v1  ;;  %v186_v6 = vmul.f32 %v288_v3, %v277_v1 }
  0x15   : > { %v194_v7 = vadd.f32 %v278_v4, %v185_v5  ;;  %v195_v8 = vadd.f32 %v278_v4, %v186_v6 }
  0x17   : > { %vm196_vm0 = vcmp.gt.f32.partialorder %v194_v7, 0.0  ;;  %vm197_vm1 = vcmp.gt.f32.partialorder %v195_v8, 0.0  ;;  %v198_v9 = vmul.f32 0.2, %v194_v7  ;;  %v199_v10 = vmul.f32 0.2, %v195_v8 }
  0x19   : > { %v200_v11 = vsel %vm196_vm0, %v194_v7, %v198_v9  ;;  %v201_v12 = vsel %vm197_vm1, %v195_v8, %v199_v10 }
  0x1a   : > { %v292_v13 = vpack.c.bf16 %v201_v12, %v200_v11 }
  0x1c   : > { %293 = vst [vmem:[%s172_s25] sm:$0xff] %v292_v13  }
  0x1d PF: > { %s13_s12 = sadd.s32 1, %s308_s12  }
  0x1e   : > { %p10_p4 = scmp.ge.s32.totalorder %s13_s12, 4  }
  0x20   :  { %12 = sbr.rel (!%p10_p4) target bundleno = 1 (0x1), region = 62 }

// kernel: discriminator_forward.12
= control target key start
LH: loop header
LB: loop body
LE: loop exit
PB: predicated region body
PF: predicated region fallthrough
CT: control target
= control target key end

     0   :  { %s899_s15 = smov 0   ;;  %s1027_s0 = inlined_call_operand.vmem [shape: bf16[32,512], index: 0, kind: input, shape index: {}]   ;;  %s1028_s1 = inlined_call_operand.vmem [shape: bf16[512,128], index: 1, kind: input, shape index: {}]   ;;  %s1029_s2 = inlined_call_operand.vmem [shape: bf16[32,128], index: 2, kind: output, shape index: {0}]   ;;  %s1030_s3 = inlined_call_operand.vmem [shape: f32[2,1,128], index: 3, kind: output, shape index: {1}]   ;;  %s1031_s4 = inlined_call_operand.vmem [shape: f32[2,1,128], index: 4, kind: output, shape index: {2}]  }
   0x1 LB: > { %s905_s16 = sadd.s32 4294967295, %s872_s15   ;;  %p722_p0 = scmp.ge.s32.totalorder %s872_s15, 1  ;;  %s872_s15 = sphi %s899_s15, %s15_s15  }
   0x2   : > { %p169_p1 = scmp.lt.s32.totalorder %s872_s15, 3 }
   0x4   : > { %p170_p2 = pnand %p722_p0, %p169_p1 }
   0x5   : > { %v828_v0 = vld [vmem:[%s1028_s1 + $0x40] sm:$0xff] (!%p170_p2)   ;;  %v832_v4 = vld [vmem:[%s1028_s1 + $0x48] sm:$0xff] (!%p170_p2)   ;;  %v836_v8 = vld [vmem:[%s1028_s1 + $0x50] sm:$0xff] (!%p170_p2)   ;;  %s723_s25 = sshll.u32 (!%p170_p2), %s905_s16, 1  ;;  %p215_p4 = scmp.lt.s32.totalorder (!%p170_p2), %s905_s16, 1 }
   0x6   : > { %173 = sbr.rel (%p170_p2) target bundleno = 276 (0x114), region = 28  ;;  %v829_v1 = vld [vmem:[%s1028_s1 + $0xc0] sm:$0xff] (!%p170_p2)   ;;  %776 = vmatprep.subr.bf16.mxu0 (!%p170_p2), %v828_v0  ;;  %v833_v5 = vld [vmem:[%s1028_s1 + $0xc8] sm:$0xff] (!%p170_p2)   ;;  %v837_v9 = vld [vmem:[%s1028_s1 + $0xd0] sm:$0xff] (!%p170_p2)   ;;  %p203_p3 = scmp.lt.s32.totalorder (!%p170_p2), %s723_s25, 3 }
   0x7   : > { %v830_v2 = vld [vmem:[%s1028_s1] sm:$0xff] (!%p170_p2)   ;;  %798 = vmatprep.subr.bf16.mxu1 (!%p170_p2), %v829_v1  ;;  %v834_v6 = vld [vmem:[%s1028_s1 + $0x8] sm:$0xff] (!%p170_p2)   ;;  %v838_v10 = vld [vmem:[%s1028_s1 + $0x10] sm:$0xff] (!%p170_p2)  }
   0x8   : > { %v831_v3 = vld [vmem:[%s1028_s1 + $0x80] sm:$0xff] (!%p170_p2)   ;;  %777 = vmatpush3.bf16.msra.mxu0 (!%p170_p2), %v830_v2  ;;  %v835_v7 = vld [vmem:[%s1028_s1 + $0x88] sm:$0xff] (!%p170_p2)   ;;  %v839_v11 = vld [vmem:[%s1028_s1 + $0x90] sm:$0xff] (!%p170_p2)  }
   0x9   : > { %799 = vmatpush3.bf16.msra.mxu1 (!%p170_p2), %v831_v3  ;;  %778 = vmatprep.subr.bf16.mxu0 (!%p170_p2), %v832_v4  ;;  %v840_v12 = vld [vmem:[%s1028_s1 + $0x58] sm:$0xff] (!%p170_p2)   ;;  %v844_v16 = vld [vmem:[%s1028_s1 + $0x60] sm:$0xff] (!%p170_p2)   ;;  %v848_v20 = vld [vmem:[%s1028_s1 + $0x68] sm:$0xff] (!%p170_p2)  }
   0xa   : > { %800 = vmatprep.subr.bf16.mxu1 (!%p170_p2), %v833_v5  ;;  %v841_v13 = vld [vmem:[%s1028_s1 + $0xd8] sm:$0xff] (!%p170_p2)   ;;  %v845_v17 = vld [vmem:[%s1028_s1 + $0xe0] sm:$0xff] (!%p170_p2)   ;;  %v849_v21 = vld [vmem:[%s1028_s1 + $0xe8] sm:$0xff] (!%p170_p2)  }
   0xb   : > { %v842_v14 = vld [vmem:[%s1028_s1 + $0x18] sm:$0xff] (!%p170_p2)   ;;  %v846_v18 = vld [vmem:[%s1028_s1 + $0x20] sm:$0xff] (!%p170_p2)   ;;  %v850_v22 = vld [vmem:[%s1028_s1 + $0x28] sm:$0xff] (!%p170_p2)  }
   0xc   : > { %779 = vmatpush3.bf16.msra.mxu0 (!%p170_p2), %v834_v6  ;;  %v843_v15 = vld [vmem:[%s1028_s1 + $0x98] sm:$0xff] (!%p170_p2)   ;;  %v847_v19 = vld [vmem:[%s1028_s1 + $0xa0] sm:$0xff] (!%p170_p2)   ;;  %v851_v23 = vld [vmem:[%s1028_s1 + $0xa8] sm:$0xff] (!%p170_p2)  }
   0xd   : > { %801 = vmatpush3.bf16.msra.mxu1 %v835_v7  ;;  %780 = vmatprep.subr.bf16.mxu0 %v836_v8  ;;  %s1033_s25 = smov (!%p203_p3, %s723_s25), 3  ;;  %v852_v24 = vld [vmem:[%s1028_s1 + $0x70] sm:$0xff]   ;;  %v856_v28 = vld [vmem:[%s1028_s1 + $0x78] sm:$0xff]   ;;  %s1035_s16 = smov (!%p215_p4, %s905_s16), 1 }
   0xe   : > { %802 = vmatprep.subr.bf16.mxu1 %v837_v9  ;;  %v853_v25 = vld [vmem:[%s1028_s1 + $0xf0] sm:$0xff]   ;;  %s768_s24 = sshll.u32 %s1033_s25, 4  ;;  %v857_v29 = vld [vmem:[%s1028_s1 + $0xf8] sm:$0xff]   ;;  %s727_s13 = sshll.u32 %s1033_s25, 2 }
   0xf   : > { %v854_v26 = vld [vmem:[%s1028_s1 + $0x30] sm:$0xff]   ;;  %s207_s8 = scalar_lea.vmem %s1027_s0, %s768_s24  ;;  %v858_v30 = vld [vmem:[%s1028_s1 + $0x38] sm:$0xff]   ;;  %s213_s18 = scalar_lea.vmem %s1029_s2, %s727_s13 }
  0x10   : > { %781 = vmatpush3.bf16.msra.mxu0 %v838_v10  ;;  %v855_v27 = vld [vmem:[%s1028_s1 + $0xb0] sm:$0xff]   ;;  %v859_v31 = vld [vmem:[%s1028_s1 + $0xb8] sm:$0xff]   ;;  %s217_s20 = scalar_lea.vmem %s1030_s3, %s1035_s16  ;;  %s220_s23 = scalar_lea.vmem %s1031_s4, %s1035_s16 }
  0x11   : > { %803 = vmatpush3.bf16.msra.mxu1 %v839_v11  ;;  %782 = vmatprep.subr.bf16.mxu0 %v840_v12  ;;  %v860_v32 = vld [vmem:[%s207_s8] ss:$16 sps:$4 sm:$0xff]   ;;  %v862_v33 = vld [vmem:[%s207_s8 + $0x4] ss:$16 sps:$4 sm:$0xff]   ;;  %v863_v34 = vld [vmem:[%s207_s8 + $0x8] ss:$16 sps:$4 sm:$0xff]  }
  0x12   : > { %804 = vmatprep.subr.bf16.mxu1 %v841_v13  ;;  %v865_v35 = vld [vmem:[%s207_s8 + $0xc] ss:$16 sps:$4 sm:$0xff]   ;;  %534 = vmatprep.mubr.bf16.mxu0 %v862_v33 }
  0x13   : > { %575 = vmatprep.mubr.bf16.mxu1 %v865_v35 }
  0x14   : > { %783 = vmatpush3.bf16.msra.mxu0 %v842_v14 }
  0x15   : > { %805 = vmatpush3.bf16.msra.mxu1 %v843_v15  ;;  %784 = vmatprep.subr.bf16.mxu0 %v844_v16 }
  0x16   : > { %806 = vmatprep.subr.bf16.mxu1 %v845_v17 }
  0x18   : > { %785 = vmatpush3.bf16.msra.mxu0 %v846_v18 }
  0x19   : > { %807 = vmatpush3.bf16.msra.mxu1 %v847_v19  ;;  %786 = vmatprep.subr.bf16.mxu0 %v848_v20 }
  0x1a   : > { %808 = vmatprep.subr.bf16.mxu1 %v849_v21 }
  0x1c   : > { %787 = vmatpush3.bf16.msra.mxu0 %v850_v22 }
  0x1d   : > { %809 = vmatpush3.bf16.msra.mxu1 %v851_v23  ;;  %788 = vmatprep.subr.bf16.mxu0 %v852_v24 }
  0x1e   : > { %810 = vmatprep.subr.bf16.mxu1 %v853_v25 }
  0x20   : > { %789 = vmatpush3.bf16.msra.mxu0 %v854_v26 }
  0x21   : > { %811 = vmatpush3.bf16.msra.mxu1 %v855_v27  ;;  %790 = vmatprep.subr.bf16.mxu0 %v856_v28 }
  0x22   : > { %812 = vmatprep.subr.bf16.mxu1 %v857_v29 }
  0x24   : > { %791 = vmatpush3.bf16.msra.mxu0 %v858_v30 }
  0x25   : > { %813 = vmatpush3.bf16.msra.mxu1 %v859_v31 }
  0x27   : > { %535 = vmatmul.mubr.bf16.vlgmr.msra.gmra.mrb[0].mxu0 %v860_v32 }
  0x28   : > { %576 = vmatmul.mubr.bf16.vlgmr.msra.gmra.mrb[0].mxu1 %v863_v34 }
  0xfa   : > { %v792_v36 = vpop.f32.mrb[0].mxu0 }
  0xfb   : > { %v814_v37 = vpop.f32.mrb[0].mxu1  ;;  %v793_v38 = vpop.f32.mrb[1].mxu0 }
  0xfc   : > { %v794_v39 = vadd.f32 %v793_v38, %v792_v36  ;;  %v815_v40 = vpop.f32.mrb[1].mxu1  ;;  %v795_v41 = vpop.f32.mrb[2].mxu0 }
  0xfd   : > { %v816_v42 = vadd.f32 %v815_v40, %v814_v37  ;;  %v817_v43 = vpop.f32.mrb[2].mxu1  ;;  %v796_v44 = vpop.f32.mrb[3].mxu0 }
  0xfe   : > { %v797_v45 = vadd.f32 %v796_v44, %v795_v41  ;;  %v818_v46 = vpop.f32.mrb[3].mxu1 }
  0xff   : > { %v578_v47 = vadd.f32 %v816_v42, %v794_v39  ;;  %v819_v48 = vadd.f32 %v818_v46, %v817_v43 }
 0x101   : > { %v581_v49 = vadd.f32 %v819_v48, %v797_v45  ;;  %v602_v50 = vmul.f32 %v578_v47, %v578_v47 }
 0x103   : > { %v774_v51 = vpack.c.bf16 %v581_v49, %v578_v47  ;;  %v594_v52 = vadd.f32 %v581_v49, %v578_v47  ;;  %v603_v53 = vmul.f32 %v581_v49, %v581_v49 }
 0x105   : > { %775 = vst [vmem:[%s213_s18] sm:$0xff] %v774_v51   ;;  %v595_v54 = vrot.slane %v594_v52, 4  ;;  %v604_v55 = vadd.f32 %v603_v53, %v602_v50 }
 0x107   : > { %v596_v56 = vadd.f32 %v595_v54, %v594_v52  ;;  %v605_v57 = vrot.slane %v604_v55, 4 }
 0x109   : > { %v597_v58 = vrot.slane %v596_v56, 2  ;;  %v606_v59 = vadd.f32 %v605_v57, %v604_v55 }
 0x10b   : > { %v598_v60 = vadd.f32 %v597_v58, %v596_v56  ;;  %v607_v61 = vrot.slane %v606_v59, 2 }
 0x10d   : > { %v599_v62 = vrot.slane %v598_v60, 1  ;;  %v608_v63 = vadd.f32 %v607_v61, %v606_v59 }
 0x10f   : > { %v600_v0 = vadd.f32 %v599_v62, %v598_v60  ;;  %v609_v1 = vrot.slane %v608_v63, 1 }
 0x111   : > { %601 = vst [vmem:[%s217_s20] sm:$0x1] %v600_v0  ;;  %v610_v2 = vadd.f32 %v609_v1, %v608_v63 }
 0x113   : > { %611 = vst [vmem:[%s220_s23] sm:$0x1] %v610_v2 }
 0x114 PF: > { %s15_s15 = sadd.s32 1, %s872_s15  }
 0x115   : > { %p12_p5 = scmp.ge.s32.totalorder %s15_s15, 4  }
 0x117   :  { %14 = sbr.rel (!%p12_p5) target bundleno = 1 (0x1), region = 82 }

</bundles_post_ra>
